<compile_context>
chip_gen: v7x
topology: tpu7x:2x2x1
jax: 0.10.0
libtpu: 0.0.40
codegen_flags: <defaults>
</compile_context>

<pallas_src>
import functools

import jax
import jax.numpy as jnp
from jax.experimental import pallas as pl
from jax.experimental.pallas import tpu as pltpu

K = 3                 # kernel_size = 3 on every axis
KT = K * K * K        # 27 taps
NEG_SLOPE = 0.01      # torch.nn.LeakyReLU default negative_slope


def _round_up(v, m):
    return (v + m - 1) // m * m


def _fused_kernel(x_ref, w1_ref, w23_ref, mask_ref, out_ref, wgt_ref,
                  patch_ref, y_ref, *, cp, co, sp, g, offsets, neg_slope):
    """Fused first/second/weighting 3x3x3 'same' convs for one batch element.

    x_ref:     (1, cp, stot)  bf16  guarded padded-flat input (channels padded to cp)
    w1_ref:    (co1, KT*cp)   bf16  first-conv weights, tap-major / channel-minor
    w23_ref:   (2*co, KT*cp)  bf16  rows [0:co] second conv, rows [co:2co] weighting
    mask_ref:  (1, sp)        f32   1.0 at interior spatial positions, 0.0 on halo
    out_ref:   (1, co, sp)    f32   second conv (LeakyReLU) output, padded-flat coords
    wgt_ref:   (1, co, sp)    f32   weighting conv (Sigmoid) output, padded-flat coords
    patch_ref: (KT*cp, sp)    f32   im2col patch scratch (reused by all three convs)
    y_ref:     (cp, stot)     f32   guarded padded-flat first-conv output
    """

    def build_patch(src):
        # src: (cp, stot).  One lane-shifted slice per tap; the row blocks land at
        # sublane offsets that are multiples of cp (= 8), so every store is aligned.
        for t, off in enumerate(offsets):
            patch_ref[t * cp:(t + 1) * cp, :] = (
                src[:, g + off:g + off + sp].astype(jnp.float32))

    # ------------- first conv: y = LeakyReLU(Conv3d(x)); y stays in VMEM ----------
    build_patch(x_ref[0])
    acc1 = jnp.dot(w1_ref[...], patch_ref[...].astype(jnp.bfloat16),
                   preferred_element_type=jnp.float32)            # (co1, sp) f32
    y = jnp.where(acc1 >= 0.0, acc1, neg_slope * acc1)
    y = y * mask_ref[...]        # zero the halo -> acts as SAME padding for convs 2/3
    y_ref[...] = jnp.zeros_like(y_ref)       # zero guards (+ any padded channel rows)
    y_ref[0:y.shape[0], g:g + sp] = y

    # ------------- second + weighting convs share one patch / one matmul ----------
    build_patch(y_ref[...])
    acc23 = jnp.dot(w23_ref[...], patch_ref[...].astype(jnp.bfloat16),
                    preferred_element_type=jnp.float32)           # (2*co, sp) f32
    sec = acc23[0:co, :]
    wgt = acc23[co:2 * co, :]
    out_ref[0] = jnp.where(sec >= 0.0, sec, neg_slope * sec)      # LeakyReLU
    wgt_ref[0] = 1.0 / (1.0 + jnp.exp(-wgt))                      # Sigmoid in f32


def stacked_conv_blocks_sigmoid_forward(x_ncdhw, w_first, w_second, w_weighting):
    """Matches StackedConvBlocksSigmoid.forward: returns (x, weight), both NCDHW."""
    N, cin, D, H, W = x_ncdhw.shape
    co1 = w_first.shape[0]
    co = w_second.shape[0]
    pad = (K - 1) // 2
    DP, HP, WP = D + 2 * pad, H + 2 * pad, W + 2 * pad
    SP = DP * HP * WP                              # padded-flat spatial extent
    CP = _round_up(max(cin, co1), 8)               # channel rows -> full sublane tile
    G = _round_up(HP * WP + WP + 2, 128)           # lane guard >= largest tap offset
    STOT = _round_up(G + SP + G, 128)

    # ---- input: pad x once (channels -> CP, spatial halo, lane guards), bf16 ----
    xp = jnp.pad(x_ncdhw, ((0, 0), (0, CP - cin),
                           (pad, pad), (pad, pad), (pad, pad)))
    x_ext = jnp.pad(xp.reshape(N, CP, SP),
                    ((0, 0), (0, 0), (G, STOT - G - SP))).astype(jnp.bfloat16)

    # ---- weights: (Cout, Cin, kd, kh, kw) -> (Cout, 27*CP), tap-major layout ----
    def flatten_w(w):
        ci = w.shape[1]
        if ci < CP:
            w = jnp.pad(w, ((0, 0), (0, CP - ci), (0, 0), (0, 0), (0, 0)))
        return jnp.transpose(w, (0, 2, 3, 4, 1)).reshape(w.shape[0], KT * CP)

    w1_flat = flatten_w(w_first).astype(jnp.bfloat16)
    w23_flat = jnp.concatenate(
        [flatten_w(w_second), flatten_w(w_weighting)], axis=0).astype(jnp.bfloat16)

    # interior (non-halo) mask over the padded-flat spatial axis
    interior = jnp.pad(jnp.ones((D, H, W), jnp.float32),
                       ((pad, pad), (pad, pad), (pad, pad))).reshape(1, SP)

    # tap offsets in padded-flat coordinates
    offsets = tuple((kd - 1) * HP * WP + (kh - 1) * WP + (kw - 1)
                    for kd in range(K) for kh in range(K) for kw in range(K))

    kernel = functools.partial(_fused_kernel, cp=CP, co=co, sp=SP, g=G,
                               offsets=offsets, neg_slope=NEG_SLOPE)

    # TODO(synk): for realistic nnU-Net volumes (e.g. 128^3) add a D-tile grid axis
    # with a halo of 1 and cap per-buffer VMEM (v7x only has 64 MiB physical VMEM).
    out_flat, wgt_flat = pl.pallas_call(
        kernel,
        out_shape=(jax.ShapeDtypeStruct((N, co, SP), jnp.float32),
                   jax.ShapeDtypeStruct((N, co, SP), jnp.float32)),
        grid_spec=pltpu.PrefetchScalarGridSpec(
            num_scalar_prefetch=0,
            grid=(N,),
            in_specs=[
                pl.BlockSpec((1, CP, STOT), lambda n: (n, 0, 0)),
                pl.BlockSpec((co1, KT * CP), lambda n: (0, 0)),
                pl.BlockSpec((2 * co, KT * CP), lambda n: (0, 0)),
                pl.BlockSpec((1, SP), lambda n: (0, 0)),
            ],
            out_specs=(
                pl.BlockSpec((1, co, SP), lambda n: (n, 0, 0)),
                pl.BlockSpec((1, co, SP), lambda n: (n, 0, 0)),
            ),
            scratch_shapes=[
                pltpu.VMEM((KT * CP, SP), jnp.float32),   # im2col patch
                pltpu.VMEM((CP, STOT), jnp.float32),      # guarded padded-flat y
            ],
        ),
        compiler_params=pltpu.CompilerParams(
            dimension_semantics=("parallel",)),
    )(x_ext, w1_flat, w23_flat, interior)

    # drop the halo positions (cheap XLA slice on tiny arrays); stays NCDHW
    out = out_flat.reshape(N, co, DP, HP, WP)[
        :, :, pad:pad + D, pad:pad + H, pad:pad + W]
    weight = wgt_flat.reshape(N, co, DP, HP, WP)[
        :, :, pad:pad + D, pad:pad + H, pad:pad + W]
    return out, weight


# ---------------- pure-JAX references for the correctness check ----------------
def _ref_conv(x_ncdhw, w_oidhw):
    return jax.lax.conv_general_dilated(
        x_ncdhw, w_oidhw, window_strides=(1, 1, 1), padding="SAME",
        dimension_numbers=("NCDHW", "OIDHW", "NCDHW"),
        precision=jax.lax.Precision.HIGHEST)


def _lrelu(v):
    return jnp.where(v >= 0, v, NEG_SLOPE * v)


if __name__ == "__main__":
    key = jax.random.PRNGKey(0)
    k1, k2, k3, k4 = jax.random.split(key, 4)

    N, Cin, D, H, W = 2, 4, 8, 8, 8
    C0, C1 = 8, 8

    x = jax.random.normal(k1, (N, Cin, D, H, W), jnp.float32)
    # Deterministic synthetic parameters (conv_bias=False -> no biases).
    w_first = 0.1 * jax.random.normal(k2, (C0, Cin, K, K, K), jnp.float32)
    w_second = 0.1 * jax.random.normal(k3, (C1, C0, K, K, K), jnp.float32)
    w_weighting = 0.1 * jax.random.normal(k4, (C1, C0, K, K, K), jnp.float32)

    fwd = jax.jit(stacked_conv_blocks_sigmoid_forward)
    out, weight = fwd(x, w_first, w_second, w_weighting)
    jax.block_until_ready((out, weight))
    assert out.shape == (N, C1, D, H, W) and weight.shape == (N, C1, D, H, W)

    # (a) strict check against a reference that feeds the same bf16-rounded operands
    #     the kernel gives the MXU (isolates layout / shift / fusion correctness).
    bf = lambda a: a.astype(jnp.bfloat16).astype(jnp.float32)
    y_b = bf(_lrelu(_ref_conv(bf(x), bf(w_first))))
    weight_ref_b = jax.nn.sigmoid(_ref_conv(y_b, bf(w_weighting)))
    out_ref_b = _lrelu(_ref_conv(y_b, bf(w_second)))
    assert jnp.allclose(out, out_ref_b, atol=1e-2, rtol=1e-2)
    assert jnp.allclose(weight, weight_ref_b, atol=1e-2, rtol=1e-2)

    # (b) looser sanity check against the exact f32 module semantics.
    y_ref = _lrelu(_ref_conv(x, w_first))
    weight_ref = jax.nn.sigmoid(_ref_conv(y_ref, w_weighting))
    out_ref = _lrelu(_ref_conv(y_ref, w_second))
    assert jnp.allclose(out, out_ref, atol=5e-2, rtol=5e-2)
    assert jnp.allclose(weight, weight_ref, atol=5e-2, rtol=5e-2)

    print("KERNEL_OK")
</pallas_src>

<mosaic_0001>
module attributes {stable_mosaic.version = 11 : i64} {
  func.func @_fused_kernel(%arg0: i32, %arg1: memref<1x8x1280xbf16, #tpu.memory_space<vmem>>, %arg2: memref<8x216xbf16, #tpu.memory_space<vmem>>, %arg3: memref<16x216xbf16, #tpu.memory_space<vmem>>, %arg4: memref<1x1000xf32, #tpu.memory_space<vmem>>, %arg5: memref<1x8x1000xf32, #tpu.memory_space<vmem>>, %arg6: memref<1x8x1000xf32, #tpu.memory_space<vmem>>, %arg7: memref<216x1000xf32, #tpu.memory_space<vmem>>, %arg8: memref<8x1280xf32, #tpu.memory_space<vmem>>) attributes {dimension_semantics = [#tpu.dimension_semantics<parallel>], iteration_bounds = array<i64: 2>, scalar_prefetch = 0 : i64, scratch_operands = 2 : i64, tpu.core_type = #tpu.core_type<tc>, window_params = [{transform_indices = @transform_0, window_bounds = array<i64: 1, 8, 1280>}, {pipeline_mode = #tpu.pipeline_mode<synchronous>, transform_indices = @transform_1, window_bounds = array<i64: 8, 216>}, {pipeline_mode = #tpu.pipeline_mode<synchronous>, transform_indices = @transform_2, window_bounds = array<i64: 16, 216>}, {pipeline_mode = #tpu.pipeline_mode<synchronous>, transform_indices = @transform_3, window_bounds = array<i64: 1, 1000>}, {transform_indices = @transform_4, window_bounds = array<i64: 1, 8, 1000>}, {transform_indices = @transform_5, window_bounds = array<i64: 1, 8, 1000>}]} {
    %c0 = arith.constant 0 : index
    %c0_0 = arith.constant 0 : index
    %c0_1 = arith.constant 0 : index
    %0 = vector.load %arg1[%c0, %c0_0, %c0_1] : memref<1x8x1280xbf16, #tpu.memory_space<vmem>>, vector<1x8x1280xbf16>
    %1 = vector.shape_cast %0 : vector<1x8x1280xbf16> to vector<8x1280xbf16>
    %2 = vector.extract_strided_slice %1 {offsets = [0, 17], sizes = [8, 1000], strides = [1, 1]} : vector<8x1280xbf16> to vector<8x1000xbf16>
    %3 = arith.extf %2 : vector<8x1000xbf16> to vector<8x1000xf32>
    %c0_2 = arith.constant 0 : index
    %c0_3 = arith.constant 0 : index
    %4 = vector.load %arg7[%c0_2, %c0_3] : memref<216x1000xf32, #tpu.memory_space<vmem>>, vector<8x1000xf32>
    tpu.vector_store %arg7[%c0_2, %c0_3], %3 {strides = array<i32>} : memref<216x1000xf32, #tpu.memory_space<vmem>>, vector<8x1000xf32>,
    %5 = vector.extract_strided_slice %1 {offsets = [0, 18], sizes = [8, 1000], strides = [1, 1]} : vector<8x1280xbf16> to vector<8x1000xbf16>
    %6 = arith.extf %5 : vector<8x1000xbf16> to vector<8x1000xf32>
    %c8 = arith.constant 8 : index
    %c0_4 = arith.constant 0 : index
    %7 = vector.load %arg7[%c8, %c0_4] : memref<216x1000xf32, #tpu.memory_space<vmem>>, vector<8x1000xf32>
    tpu.vector_store %arg7[%c8, %c0_4], %6 {strides = array<i32>} : memref<216x1000xf32, #tpu.memory_space<vmem>>, vector<8x1000xf32>,
    %8 = vector.extract_strided_slice %1 {offsets = [0, 19], sizes = [8, 1000], strides = [1, 1]} : vector<8x1280xbf16> to vector<8x1000xbf16>
    %9 = arith.extf %8 : vector<8x1000xbf16> to vector<8x1000xf32>
    %c16 = arith.constant 16 : index
    %c0_5 = arith.constant 0 : index
    %10 = vector.load %arg7[%c16, %c0_5] : memref<216x1000xf32, #tpu.memory_space<vmem>>, vector<8x1000xf32>
    tpu.vector_store %arg7[%c16, %c0_5], %9 {strides = array<i32>} : memref<216x1000xf32, #tpu.memory_space<vmem>>, vector<8x1000xf32>,
    %11 = vector.extract_strided_slice %1 {offsets = [0, 27], sizes = [8, 1000], strides = [1, 1]} : vector<8x1280xbf16> to vector<8x1000xbf16>
    %12 = arith.extf %11 : vector<8x1000xbf16> to vector<8x1000xf32>
    %c24 = arith.constant 24 : index
    %c0_6 = arith.constant 0 : index
    %13 = vector.load %arg7[%c24, %c0_6] : memref<216x1000xf32, #tpu.memory_space<vmem>>, vector<8x1000xf32>
    tpu.vector_store %arg7[%c24, %c0_6], %12 {strides = array<i32>} : memref<216x1000xf32, #tpu.memory_space<vmem>>, vector<8x1000xf32>,
    %14 = vector.extract_strided_slice %1 {offsets = [0, 28], sizes = [8, 1000], strides = [1, 1]} : vector<8x1280xbf16> to vector<8x1000xbf16>
    %15 = arith.extf %14 : vector<8x1000xbf16> to vector<8x1000xf32>
    %c32 = arith.constant 32 : index
    %c0_7 = arith.constant 0 : index
    %16 = vector.load %arg7[%c32, %c0_7] : memref<216x1000xf32, #tpu.memory_space<vmem>>, vector<8x1000xf32>
    tpu.vector_store %arg7[%c32, %c0_7], %15 {strides = array<i32>} : memref<216x1000xf32, #tpu.memory_space<vmem>>, vector<8x1000xf32>,
    %17 = vector.extract_strided_slice %1 {offsets = [0, 29], sizes = [8, 1000], strides = [1, 1]} : vector<8x1280xbf16> to vector<8x1000xbf16>
    %18 = arith.extf %17 : vector<8x1000xbf16> to vector<8x1000xf32>
    %c40 = arith.constant 40 : index
    %c0_8 = arith.constant 0 : index
    %19 = vector.load %arg7[%c40, %c0_8] : memref<216x1000xf32, #tpu.memory_space<vmem>>, vector<8x1000xf32>
    tpu.vector_store %arg7[%c40, %c0_8], %18 {strides = array<i32>} : memref<216x1000xf32, #tpu.memory_space<vmem>>, vector<8x1000xf32>,
    %20 = vector.extract_strided_slice %1 {offsets = [0, 37], sizes = [8, 1000], strides = [1, 1]} : vector<8x1280xbf16> to vector<8x1000xbf16>
    %21 = arith.extf %20 : vector<8x1000xbf16> to vector<8x1000xf32>
    %c48 = arith.constant 48 : index
    %c0_9 = arith.constant 0 : index
    %22 = vector.load %arg7[%c48, %c0_9] : memref<216x1000xf32, #tpu.memory_space<vmem>>, vector<8x1000xf32>
    tpu.vector_store %arg7[%c48, %c0_9], %21 {strides = array<i32>} : memref<216x1000xf32, #tpu.memory_space<vmem>>, vector<8x1000xf32>,
    %23 = vector.extract_strided_slice %1 {offsets = [0, 38], sizes = [8, 1000], strides = [1, 1]} : vector<8x1280xbf16> to vector<8x1000xbf16>
    %24 = arith.extf %23 : vector<8x1000xbf16> to vector<8x1000xf32>
    %c56 = arith.constant 56 : index
    %c0_10 = arith.constant 0 : index
    %25 = vector.load %arg7[%c56, %c0_10] : memref<216x1000xf32, #tpu.memory_space<vmem>>, vector<8x1000xf32>
    tpu.vector_store %arg7[%c56, %c0_10], %24 {strides = array<i32>} : memref<216x1000xf32, #tpu.memory_space<vmem>>, vector<8x1000xf32>,
    %26 = vector.extract_strided_slice %1 {offsets = [0, 39], sizes = [8, 1000], strides = [1, 1]} : vector<8x1280xbf16> to vector<8x1000xbf16>
    %27 = arith.extf %26 : vector<8x1000xbf16> to vector<8x1000xf32>
    %c64 = arith.constant 64 : index
    %c0_11 = arith.constant 0 : index
    %28 = vector.load %arg7[%c64, %c0_11] : memref<216x1000xf32, #tpu.memory_space<vmem>>, vector<8x1000xf32>
    tpu.vector_store %arg7[%c64, %c0_11], %27 {strides = array<i32>} : memref<216x1000xf32, #tpu.memory_space<vmem>>, vector<8x1000xf32>,
    %29 = vector.extract_strided_slice %1 {offsets = [0, 117], sizes = [8, 1000], strides = [1, 1]} : vector<8x1280xbf16> to vector<8x1000xbf16>
    %30 = arith.extf %29 : vector<8x1000xbf16> to vector<8x1000xf32>
    %c72 = arith.constant 72 : index
    %c0_12 = arith.constant 0 : index
    %31 = vector.load %arg7[%c72, %c0_12] : memref<216x1000xf32, #tpu.memory_space<vmem>>, vector<8x1000xf32>
    tpu.vector_store %arg7[%c72, %c0_12], %30 {strides = array<i32>} : memref<216x1000xf32, #tpu.memory_space<vmem>>, vector<8x1000xf32>,
    %32 = vector.extract_strided_slice %1 {offsets = [0, 118], sizes = [8, 1000], strides = [1, 1]} : vector<8x1280xbf16> to vector<8x1000xbf16>
    %33 = arith.extf %32 : vector<8x1000xbf16> to vector<8x1000xf32>
    %c80 = arith.constant 80 : index
    %c0_13 = arith.constant 0 : index
    %34 = vector.load %arg7[%c80, %c0_13] : memref<216x1000xf32, #tpu.memory_space<vmem>>, vector<8x1000xf32>
    tpu.vector_store %arg7[%c80, %c0_13], %33 {strides = array<i32>} : memref<216x1000xf32, #tpu.memory_space<vmem>>, vector<8x1000xf32>,
    %35 = vector.extract_strided_slice %1 {offsets = [0, 119], sizes = [8, 1000], strides = [1, 1]} : vector<8x1280xbf16> to vector<8x1000xbf16>
    %36 = arith.extf %35 : vector<8x1000xbf16> to vector<8x1000xf32>
    %c88 = arith.constant 88 : index
    %c0_14 = arith.constant 0 : index
    %37 = vector.load %arg7[%c88, %c0_14] : memref<216x1000xf32, #tpu.memory_space<vmem>>, vector<8x1000xf32>
    tpu.vector_store %arg7[%c88, %c0_14], %36 {strides = array<i32>} : memref<216x1000xf32, #tpu.memory_space<vmem>>, vector<8x1000xf32>,
    %38 = vector.extract_strided_slice %1 {offsets = [0, 127], sizes = [8, 1000], strides = [1, 1]} : vector<8x1280xbf16> to vector<8x1000xbf16>
    %39 = arith.extf %38 : vector<8x1000xbf16> to vector<8x1000xf32>
    %c96 = arith.constant 96 : index
    %c0_15 = arith.constant 0 : index
    %40 = vector.load %arg7[%c96, %c0_15] : memref<216x1000xf32, #tpu.memory_space<vmem>>, vector<8x1000xf32>
    tpu.vector_store %arg7[%c96, %c0_15], %39 {strides = array<i32>} : memref<216x1000xf32, #tpu.memory_space<vmem>>, vector<8x1000xf32>,
    %41 = vector.extract_strided_slice %1 {offsets = [0, 128], sizes = [8, 1000], strides = [1, 1]} : vector<8x1280xbf16> to vector<8x1000xbf16>
    %42 = arith.extf %41 : vector<8x1000xbf16> to vector<8x1000xf32>
    %c104 = arith.constant 104 : index
    %c0_16 = arith.constant 0 : index
    %43 = vector.load %arg7[%c104, %c0_16] : memref<216x1000xf32, #tpu.memory_space<vmem>>, vector<8x1000xf32>
    tpu.vector_store %arg7[%c104, %c0_16], %42 {strides = array<i32>} : memref<216x1000xf32, #tpu.memory_space<vmem>>, vector<8x1000xf32>,
    %44 = vector.extract_strided_slice %1 {offsets = [0, 129], sizes = [8, 1000], strides = [1, 1]} : vector<8x1280xbf16> to vector<8x1000xbf16>
    %45 = arith.extf %44 : vector<8x1000xbf16> to vector<8x1000xf32>
    %c112 = arith.constant 112 : index
    %c0_17 = arith.constant 0 : index
    %46 = vector.load %arg7[%c112, %c0_17] : memref<216x1000xf32, #tpu.memory_space<vmem>>, vector<8x1000xf32>
    tpu.vector_store %arg7[%c112, %c0_17], %45 {strides = array<i32>} : memref<216x1000xf32, #tpu.memory_space<vmem>>, vector<8x1000xf32>,
    %47 = vector.extract_strided_slice %1 {offsets = [0, 137], sizes = [8, 1000], strides = [1, 1]} : vector<8x1280xbf16> to vector<8x1000xbf16>
    %48 = arith.extf %47 : vector<8x1000xbf16> to vector<8x1000xf32>
    %c120 = arith.constant 120 : index
    %c0_18 = arith.constant 0 : index
    %49 = vector.load %arg7[%c120, %c0_18] : memref<216x1000xf32, #tpu.memory_space<vmem>>, vector<8x1000xf32>
    tpu.vector_store %arg7[%c120, %c0_18], %48 {strides = array<i32>} : memref<216x1000xf32, #tpu.memory_space<vmem>>, vector<8x1000xf32>,
    %50 = vector.extract_strided_slice %1 {offsets = [0, 138], sizes = [8, 1000], strides = [1, 1]} : vector<8x1280xbf16> to vector<8x1000xbf16>
    %51 = arith.extf %50 : vector<8x1000xbf16> to vector<8x1000xf32>
    %c128 = arith.constant 128 : index
    %c0_19 = arith.constant 0 : index
    %52 = vector.load %arg7[%c128, %c0_19] : memref<216x1000xf32, #tpu.memory_space<vmem>>, vector<8x1000xf32>
    tpu.vector_store %arg7[%c128, %c0_19], %51 {strides = array<i32>} : memref<216x1000xf32, #tpu.memory_space<vmem>>, vector<8x1000xf32>,
    %53 = vector.extract_strided_slice %1 {offsets = [0, 139], sizes = [8, 1000], strides = [1, 1]} : vector<8x1280xbf16> to vector<8x1000xbf16>
    %54 = arith.extf %53 : vector<8x1000xbf16> to vector<8x1000xf32>
    %c136 = arith.constant 136 : index
    %c0_20 = arith.constant 0 : index
    %55 = vector.load %arg7[%c136, %c0_20] : memref<216x1000xf32, #tpu.memory_space<vmem>>, vector<8x1000xf32>
    tpu.vector_store %arg7[%c136, %c0_20], %54 {strides = array<i32>} : memref<216x1000xf32, #tpu.memory_space<vmem>>, vector<8x1000xf32>,
    %56 = vector.extract_strided_slice %1 {offsets = [0, 217], sizes = [8, 1000], strides = [1, 1]} : vector<8x1280xbf16> to vector<8x1000xbf16>
    %57 = arith.extf %56 : vector<8x1000xbf16> to vector<8x1000xf32>
    %c144 = arith.constant 144 : index
    %c0_21 = arith.constant 0 : index
    %58 = vector.load %arg7[%c144, %c0_21] : memref<216x1000xf32, #tpu.memory_space<vmem>>, vector<8x1000xf32>
    tpu.vector_store %arg7[%c144, %c0_21], %57 {strides = array<i32>} : memref<216x1000xf32, #tpu.memory_space<vmem>>, vector<8x1000xf32>,
    %59 = vector.extract_strided_slice %1 {offsets = [0, 218], sizes = [8, 1000], strides = [1, 1]} : vector<8x1280xbf16> to vector<8x1000xbf16>
    %60 = arith.extf %59 : vector<8x1000xbf16> to vector<8x1000xf32>
    %c152 = arith.constant 152 : index
    %c0_22 = arith.constant 0 : index
    %61 = vector.load %arg7[%c152, %c0_22] : memref<216x1000xf32, #tpu.memory_space<vmem>>, vector<8x1000xf32>
    tpu.vector_store %arg7[%c152, %c0_22], %60 {strides = array<i32>} : memref<216x1000xf32, #tpu.memory_space<vmem>>, vector<8x1000xf32>,
    %62 = vector.extract_strided_slice %1 {offsets = [0, 219], sizes = [8, 1000], strides = [1, 1]} : vector<8x1280xbf16> to vector<8x1000xbf16>
    %63 = arith.extf %62 : vector<8x1000xbf16> to vector<8x1000xf32>
    %c160 = arith.constant 160 : index
    %c0_23 = arith.constant 0 : index
    %64 = vector.load %arg7[%c160, %c0_23] : memref<216x1000xf32, #tpu.memory_space<vmem>>, vector<8x1000xf32>
    tpu.vector_store %arg7[%c160, %c0_23], %63 {strides = array<i32>} : memref<216x1000xf32, #tpu.memory_space<vmem>>, vector<8x1000xf32>,
    %65 = vector.extract_strided_slice %1 {offsets = [0, 227], sizes = [8, 1000], strides = [1, 1]} : vector<8x1280xbf16> to vector<8x1000xbf16>
    %66 = arith.extf %65 : vector<8x1000xbf16> to vector<8x1000xf32>
    %c168 = arith.constant 168 : index
    %c0_24 = arith.constant 0 : index
    %67 = vector.load %arg7[%c168, %c0_24] : memref<216x1000xf32, #tpu.memory_space<vmem>>, vector<8x1000xf32>
    tpu.vector_store %arg7[%c168, %c0_24], %66 {strides = array<i32>} : memref<216x1000xf32, #tpu.memory_space<vmem>>, vector<8x1000xf32>,
    %68 = vector.extract_strided_slice %1 {offsets = [0, 228], sizes = [8, 1000], strides = [1, 1]} : vector<8x1280xbf16> to vector<8x1000xbf16>
    %69 = arith.extf %68 : vector<8x1000xbf16> to vector<8x1000xf32>
    %c176 = arith.constant 176 : index
    %c0_25 = arith.constant 0 : index
    %70 = vector.load %arg7[%c176, %c0_25] : memref<216x1000xf32, #tpu.memory_space<vmem>>, vector<8x1000xf32>
    tpu.vector_store %arg7[%c176, %c0_25], %69 {strides = array<i32>} : memref<216x1000xf32, #tpu.memory_space<vmem>>, vector<8x1000xf32>,
    %71 = vector.extract_strided_slice %1 {offsets = [0, 229], sizes = [8, 1000], strides = [1, 1]} : vector<8x1280xbf16> to vector<8x1000xbf16>
    %72 = arith.extf %71 : vector<8x1000xbf16> to vector<8x1000xf32>
    %c184 = arith.constant 184 : index
    %c0_26 = arith.constant 0 : index
    %73 = vector.load %arg7[%c184, %c0_26] : memref<216x1000xf32, #tpu.memory_space<vmem>>, vector<8x1000xf32>
    tpu.vector_store %arg7[%c184, %c0_26], %72 {strides = array<i32>} : memref<216x1000xf32, #tpu.memory_space<vmem>>, vector<8x1000xf32>,
    %74 = vector.extract_strided_slice %1 {offsets = [0, 237], sizes = [8, 1000], strides = [1, 1]} : vector<8x1280xbf16> to vector<8x1000xbf16>
    %75 = arith.extf %74 : vector<8x1000xbf16> to vector<8x1000xf32>
    %c192 = arith.constant 192 : index
    %c0_27 = arith.constant 0 : index
    %76 = vector.load %arg7[%c192, %c0_27] : memref<216x1000xf32, #tpu.memory_space<vmem>>, vector<8x1000xf32>
    tpu.vector_store %arg7[%c192, %c0_27], %75 {strides = array<i32>} : memref<216x1000xf32, #tpu.memory_space<vmem>>, vector<8x1000xf32>,
    %77 = vector.extract_strided_slice %1 {offsets = [0, 238], sizes = [8, 1000], strides = [1, 1]} : vector<8x1280xbf16> to vector<8x1000xbf16>
    %78 = arith.extf %77 : vector<8x1000xbf16> to vector<8x1000xf32>
    %c200 = arith.constant 200 : index
    %c0_28 = arith.constant 0 : index
    %79 = vector.load %arg7[%c200, %c0_28] : memref<216x1000xf32, #tpu.memory_space<vmem>>, vector<8x1000xf32>
    tpu.vector_store %arg7[%c200, %c0_28], %78 {strides = array<i32>} : memref<216x1000xf32, #tpu.memory_space<vmem>>, vector<8x1000xf32>,
    %80 = vector.extract_strided_slice %1 {offsets = [0, 239], sizes = [8, 1000], strides = [1, 1]} : vector<8x1280xbf16> to vector<8x1000xbf16>
    %81 = arith.extf %80 : vector<8x1000xbf16> to vector<8x1000xf32>
    %c208 = arith.constant 208 : index
    %c0_29 = arith.constant 0 : index
    %82 = vector.load %arg7[%c208, %c0_29] : memref<216x1000xf32, #tpu.memory_space<vmem>>, vector<8x1000xf32>
    tpu.vector_store %arg7[%c208, %c0_29], %81 {strides = array<i32>} : memref<216x1000xf32, #tpu.memory_space<vmem>>, vector<8x1000xf32>,
    %c0_30 = arith.constant 0 : index
    %c0_31 = arith.constant 0 : index
    %83 = vector.load %arg2[%c0_30, %c0_31] : memref<8x216xbf16, #tpu.memory_space<vmem>>, vector<8x216xbf16>
    %c0_32 = arith.constant 0 : index
    %c0_33 = arith.constant 0 : index
    %84 = vector.load %arg7[%c0_32, %c0_33] : memref<216x1000xf32, #tpu.memory_space<vmem>>, vector<216x1000xf32>
    %85 = arith.truncf %84 : vector<216x1000xf32> to vector<216x1000xbf16>
    %cst = arith.constant dense<0.000000e+00> : vector<8x1000xf32>
    %86 = tpu.matmul %83, %85, %cst {dimension_numbers = #tpu.dot_dimension_numbers<[1], [0], [0], [1], [0, 0, 1, 1], [], []>} : vector<8x216xbf16>, vector<216x1000xbf16>, vector<8x1000xf32> -> vector<8x1000xf32>
    %cst_34 = arith.constant 0.000000e+00 : f32
    %87 = vector.broadcast %cst_34 : f32 to vector<8x1000xf32>
    %88 = arith.cmpf oge, %86, %87 : vector<8x1000xf32>
    %cst_35 = arith.constant 0.00999999977 : f32
    %89 = vector.broadcast %cst_35 : f32 to vector<8x1000xf32>
    %90 = arith.mulf %89, %86 : vector<8x1000xf32>
    %91 = arith.select %88, %86, %90 : vector<8x1000xi1>, vector<8x1000xf32>
    %c0_36 = arith.constant 0 : index
    %c0_37 = arith.constant 0 : index
    %92 = vector.load %arg4[%c0_36, %c0_37] : memref<1x1000xf32, #tpu.memory_space<vmem>>, vector<1x1000xf32>
    %93 = vector.broadcast %92 : vector<1x1000xf32> to vector<8x1000xf32>
    %94 = arith.mulf %91, %93 : vector<8x1000xf32>
    %cst_38 = arith.constant 0.000000e+00 : f32
    %95 = vector.broadcast %cst_38 : f32 to vector<8x1280xf32>
    %c0_39 = arith.constant 0 : index
    %c0_40 = arith.constant 0 : index
    %96 = vector.load %arg8[%c0_39, %c0_40] : memref<8x1280xf32, #tpu.memory_space<vmem>>, vector<8x1280xf32>
    tpu.vector_store %arg8[%c0_39, %c0_40], %95 {strides = array<i32>} : memref<8x1280xf32, #tpu.memory_space<vmem>>, vector<8x1280xf32>,
    %c0_41 = arith.constant 0 : index
    %c128_42 = arith.constant 128 : index
    %97 = vector.load %arg8[%c0_41, %c128_42] : memref<8x1280xf32, #tpu.memory_space<vmem>>, vector<8x1000xf32>
    tpu.vector_store %arg8[%c0_41, %c128_42], %94 {strides = array<i32>} : memref<8x1280xf32, #tpu.memory_space<vmem>>, vector<8x1000xf32>,
    %c0_43 = arith.constant 0 : index
    %c0_44 = arith.constant 0 : index
    %98 = vector.load %arg8[%c0_43, %c0_44] : memref<8x1280xf32, #tpu.memory_space<vmem>>, vector<8x1280xf32>
    %99 = vector.extract_strided_slice %98 {offsets = [0, 17], sizes = [8, 1000], strides = [1, 1]} : vector<8x1280xf32> to vector<8x1000xf32>
    %c0_45 = arith.constant 0 : index
    %c0_46 = arith.constant 0 : index
    %100 = vector.load %arg7[%c0_45, %c0_46] : memref<216x1000xf32, #tpu.memory_space<vmem>>, vector<8x1000xf32>
    tpu.vector_store %arg7[%c0_45, %c0_46], %99 {strides = array<i32>} : memref<216x1000xf32, #tpu.memory_space<vmem>>, vector<8x1000xf32>,
    %101 = vector.extract_strided_slice %98 {offsets = [0, 18], sizes = [8, 1000], strides = [1, 1]} : vector<8x1280xf32> to vector<8x1000xf32>
    %c8_47 = arith.constant 8 : index
    %c0_48 = arith.constant 0 : index
    %102 = vector.load %arg7[%c8_47, %c0_48] : memref<216x1000xf32, #tpu.memory_space<vmem>>, vector<8x1000xf32>
    tpu.vector_store %arg7[%c8_47, %c0_48], %101 {strides = array<i32>} : memref<216x1000xf32, #tpu.memory_space<vmem>>, vector<8x1000xf32>,
    %103 = vector.extract_strided_slice %98 {offsets = [0, 19], sizes = [8, 1000], strides = [1, 1]} : vector<8x1280xf32> to vector<8x1000xf32>
    %c16_49 = arith.constant 16 : index
    %c0_50 = arith.constant 0 : index
    %104 = vector.load %arg7[%c16_49, %c0_50] : memref<216x1000xf32, #tpu.memory_space<vmem>>, vector<8x1000xf32>
    tpu.vector_store %arg7[%c16_49, %c0_50], %103 {strides = array<i32>} : memref<216x1000xf32, #tpu.memory_space<vmem>>, vector<8x1000xf32>,
    %105 = vector.extract_strided_slice %98 {offsets = [0, 27], sizes = [8, 1000], strides = [1, 1]} : vector<8x1280xf32> to vector<8x1000xf32>
    %c24_51 = arith.constant 24 : index
    %c0_52 = arith.constant 0 : index
    %106 = vector.load %arg7[%c24_51, %c0_52] : memref<216x1000xf32, #tpu.memory_space<vmem>>, vector<8x1000xf32>
    tpu.vector_store %arg7[%c24_51, %c0_52], %105 {strides = array<i32>} : memref<216x1000xf32, #tpu.memory_space<vmem>>, vector<8x1000xf32>,
    %107 = vector.extract_strided_slice %98 {offsets = [0, 28], sizes = [8, 1000], strides = [1, 1]} : vector<8x1280xf32> to vector<8x1000xf32>
    %c32_53 = arith.constant 32 : index
    %c0_54 = arith.constant 0 : index
    %108 = vector.load %arg7[%c32_53, %c0_54] : memref<216x1000xf32, #tpu.memory_space<vmem>>, vector<8x1000xf32>
    tpu.vector_store %arg7[%c32_53, %c0_54], %107 {strides = array<i32>} : memref<216x1000xf32, #tpu.memory_space<vmem>>, vector<8x1000xf32>,
    %109 = vector.extract_strided_slice %98 {offsets = [0, 29], sizes = [8, 1000], strides = [1, 1]} : vector<8x1280xf32> to vector<8x1000xf32>
    %c40_55 = arith.constant 40 : index
    %c0_56 = arith.constant 0 : index
    %110 = vector.load %arg7[%c40_55, %c0_56] : memref<216x1000xf32, #tpu.memory_space<vmem>>, vector<8x1000xf32>
    tpu.vector_store %arg7[%c40_55, %c0_56], %109 {strides = array<i32>} : memref<216x1000xf32, #tpu.memory_space<vmem>>, vector<8x1000xf32>,
    %111 = vector.extract_strided_slice %98 {offsets = [0, 37], sizes = [8, 1000], strides = [1, 1]} : vector<8x1280xf32> to vector<8x1000xf32>
    %c48_57 = arith.constant 48 : index
    %c0_58 = arith.constant 0 : index
    %112 = vector.load %arg7[%c48_57, %c0_58] : memref<216x1000xf32, #tpu.memory_space<vmem>>, vector<8x1000xf32>
    tpu.vector_store %arg7[%c48_57, %c0_58], %111 {strides = array<i32>} : memref<216x1000xf32, #tpu.memory_space<vmem>>, vector<8x1000xf32>,
    %113 = vector.extract_strided_slice %98 {offsets = [0, 38], sizes = [8, 1000], strides = [1, 1]} : vector<8x1280xf32> to vector<8x1000xf32>
    %c56_59 = arith.constant 56 : index
    %c0_60 = arith.constant 0 : index
    %114 = vector.load %arg7[%c56_59, %c0_60] : memref<216x1000xf32, #tpu.memory_space<vmem>>, vector<8x1000xf32>
    tpu.vector_store %arg7[%c56_59, %c0_60], %113 {strides = array<i32>} : memref<216x1000xf32, #tpu.memory_space<vmem>>, vector<8x1000xf32>,
    %115 = vector.extract_strided_slice %98 {offsets = [0, 39], sizes = [8, 1000], strides = [1, 1]} : vector<8x1280xf32> to vector<8x1000xf32>
    %c64_61 = arith.constant 64 : index
    %c0_62 = arith.constant 0 : index
    %116 = vector.load %arg7[%c64_61, %c0_62] : memref<216x1000xf32, #tpu.memory_space<vmem>>, vector<8x1000xf32>
    tpu.vector_store %arg7[%c64_61, %c0_62], %115 {strides = array<i32>} : memref<216x1000xf32, #tpu.memory_space<vmem>>, vector<8x1000xf32>,
    %117 = vector.extract_strided_slice %98 {offsets = [0, 117], sizes = [8, 1000], strides = [1, 1]} : vector<8x1280xf32> to vector<8x1000xf32>
    %c72_63 = arith.constant 72 : index
    %c0_64 = arith.constant 0 : index
    %118 = vector.load %arg7[%c72_63, %c0_64] : memref<216x1000xf32, #tpu.memory_space<vmem>>, vector<8x1000xf32>
    tpu.vector_store %arg7[%c72_63, %c0_64], %117 {strides = array<i32>} : memref<216x1000xf32, #tpu.memory_space<vmem>>, vector<8x1000xf32>,
    %119 = vector.extract_strided_slice %98 {offsets = [0, 118], sizes = [8, 1000], strides = [1, 1]} : vector<8x1280xf32> to vector<8x1000xf32>
    %c80_65 = arith.constant 80 : index
    %c0_66 = arith.constant 0 : index
    %120 = vector.load %arg7[%c80_65, %c0_66] : memref<216x1000xf32, #tpu.memory_space<vmem>>, vector<8x1000xf32>
    tpu.vector_store %arg7[%c80_65, %c0_66], %119 {strides = array<i32>} : memref<216x1000xf32, #tpu.memory_space<vmem>>, vector<8x1000xf32>,
    %121 = vector.extract_strided_slice %98 {offsets = [0, 119], sizes = [8, 1000], strides = [1, 1]} : vector<8x1280xf32> to vector<8x1000xf32>
    %c88_67 = arith.constant 88 : index
    %c0_68 = arith.constant 0 : index
    %122 = vector.load %arg7[%c88_67, %c0_68] : memref<216x1000xf32, #tpu.memory_space<vmem>>, vector<8x1000xf32>
    tpu.vector_store %arg7[%c88_67, %c0_68], %121 {strides = array<i32>} : memref<216x1000xf32, #tpu.memory_space<vmem>>, vector<8x1000xf32>,
    %123 = vector.extract_strided_slice %98 {offsets = [0, 127], sizes = [8, 1000], strides = [1, 1]} : vector<8x1280xf32> to vector<8x1000xf32>
    %c96_69 = arith.constant 96 : index
    %c0_70 = arith.constant 0 : index
    %124 = vector.load %arg7[%c96_69, %c0_70] : memref<216x1000xf32, #tpu.memory_space<vmem>>, vector<8x1000xf32>
    tpu.vector_store %arg7[%c96_69, %c0_70], %123 {strides = array<i32>} : memref<216x1000xf32, #tpu.memory_space<vmem>>, vector<8x1000xf32>,
    %125 = vector.extract_strided_slice %98 {offsets = [0, 128], sizes = [8, 1000], strides = [1, 1]} : vector<8x1280xf32> to vector<8x1000xf32>
    %c104_71 = arith.constant 104 : index
    %c0_72 = arith.constant 0 : index
    %126 = vector.load %arg7[%c104_71, %c0_72] : memref<216x1000xf32, #tpu.memory_space<vmem>>, vector<8x1000xf32>
    tpu.vector_store %arg7[%c104_71, %c0_72], %125 {strides = array<i32>} : memref<216x1000xf32, #tpu.memory_space<vmem>>, vector<8x1000xf32>,
    %127 = vector.extract_strided_slice %98 {offsets = [0, 129], sizes = [8, 1000], strides = [1, 1]} : vector<8x1280xf32> to vector<8x1000xf32>
    %c112_73 = arith.constant 112 : index
    %c0_74 = arith.constant 0 : index
    %128 = vector.load %arg7[%c112_73, %c0_74] : memref<216x1000xf32, #tpu.memory_space<vmem>>, vector<8x1000xf32>
    tpu.vector_store %arg7[%c112_73, %c0_74], %127 {strides = array<i32>} : memref<216x1000xf32, #tpu.memory_space<vmem>>, vector<8x1000xf32>,
    %129 = vector.extract_strided_slice %98 {offsets = [0, 137], sizes = [8, 1000], strides = [1, 1]} : vector<8x1280xf32> to vector<8x1000xf32>
    %c120_75 = arith.constant 120 : index
    %c0_76 = arith.constant 0 : index
    %130 = vector.load %arg7[%c120_75, %c0_76] : memref<216x1000xf32, #tpu.memory_space<vmem>>, vector<8x1000xf32>
    tpu.vector_store %arg7[%c120_75, %c0_76], %129 {strides = array<i32>} : memref<216x1000xf32, #tpu.memory_space<vmem>>, vector<8x1000xf32>,
    %131 = vector.extract_strided_slice %98 {offsets = [0, 138], sizes = [8, 1000], strides = [1, 1]} : vector<8x1280xf32> to vector<8x1000xf32>
    %c128_77 = arith.constant 128 : index
    %c0_78 = arith.constant 0 : index
    %132 = vector.load %arg7[%c128_77, %c0_78] : memref<216x1000xf32, #tpu.memory_space<vmem>>, vector<8x1000xf32>
    tpu.vector_store %arg7[%c128_77, %c0_78], %131 {strides = array<i32>} : memref<216x1000xf32, #tpu.memory_space<vmem>>, vector<8x1000xf32>,
    %133 = vector.extract_strided_slice %98 {offsets = [0, 139], sizes = [8, 1000], strides = [1, 1]} : vector<8x1280xf32> to vector<8x1000xf32>
    %c136_79 = arith.constant 136 : index
    %c0_80 = arith.constant 0 : index
    %134 = vector.load %arg7[%c136_79, %c0_80] : memref<216x1000xf32, #tpu.memory_space<vmem>>, vector<8x1000xf32>
    tpu.vector_store %arg7[%c136_79, %c0_80], %133 {strides = array<i32>} : memref<216x1000xf32, #tpu.memory_space<vmem>>, vector<8x1000xf32>,
    %135 = vector.extract_strided_slice %98 {offsets = [0, 217], sizes = [8, 1000], strides = [1, 1]} : vector<8x1280xf32> to vector<8x1000xf32>
    %c144_81 = arith.constant 144 : index
    %c0_82 = arith.constant 0 : index
    %136 = vector.load %arg7[%c144_81, %c0_82] : memref<216x1000xf32, #tpu.memory_space<vmem>>, vector<8x1000xf32>
    tpu.vector_store %arg7[%c144_81, %c0_82], %135 {strides = array<i32>} : memref<216x1000xf32, #tpu.memory_space<vmem>>, vector<8x1000xf32>,
    %137 = vector.extract_strided_slice %98 {offsets = [0, 218], sizes = [8, 1000], strides = [1, 1]} : vector<8x1280xf32> to vector<8x1000xf32>
    %c152_83 = arith.constant 152 : index
    %c0_84 = arith.constant 0 : index
    %138 = vector.load %arg7[%c152_83, %c0_84] : memref<216x1000xf32, #tpu.memory_space<vmem>>, vector<8x1000xf32>
    tpu.vector_store %arg7[%c152_83, %c0_84], %137 {strides = array<i32>} : memref<216x1000xf32, #tpu.memory_space<vmem>>, vector<8x1000xf32>,
    %139 = vector.extract_strided_slice %98 {offsets = [0, 219], sizes = [8, 1000], strides = [1, 1]} : vector<8x1280xf32> to vector<8x1000xf32>
    %c160_85 = arith.constant 160 : index
    %c0_86 = arith.constant 0 : index
    %140 = vector.load %arg7[%c160_85, %c0_86] : memref<216x1000xf32, #tpu.memory_space<vmem>>, vector<8x1000xf32>
    tpu.vector_store %arg7[%c160_85, %c0_86], %139 {strides = array<i32>} : memref<216x1000xf32, #tpu.memory_space<vmem>>, vector<8x1000xf32>,
    %141 = vector.extract_strided_slice %98 {offsets = [0, 227], sizes = [8, 1000], strides = [1, 1]} : vector<8x1280xf32> to vector<8x1000xf32>
    %c168_87 = arith.constant 168 : index
    %c0_88 = arith.constant 0 : index
    %142 = vector.load %arg7[%c168_87, %c0_88] : memref<216x1000xf32, #tpu.memory_space<vmem>>, vector<8x1000xf32>
    tpu.vector_store %arg7[%c168_87, %c0_88], %141 {strides = array<i32>} : memref<216x1000xf32, #tpu.memory_space<vmem>>, vector<8x1000xf32>,
    %143 = vector.extract_strided_slice %98 {offsets = [0, 228], sizes = [8, 1000], strides = [1, 1]} : vector<8x1280xf32> to vector<8x1000xf32>
    %c176_89 = arith.constant 176 : index
    %c0_90 = arith.constant 0 : index
    %144 = vector.load %arg7[%c176_89, %c0_90] : memref<216x1000xf32, #tpu.memory_space<vmem>>, vector<8x1000xf32>
    tpu.vector_store %arg7[%c176_89, %c0_90], %143 {strides = array<i32>} : memref<216x1000xf32, #tpu.memory_space<vmem>>, vector<8x1000xf32>,
    %145 = vector.extract_strided_slice %98 {offsets = [0, 229], sizes = [8, 1000], strides = [1, 1]} : vector<8x1280xf32> to vector<8x1000xf32>
    %c184_91 = arith.constant 184 : index
    %c0_92 = arith.constant 0 : index
    %146 = vector.load %arg7[%c184_91, %c0_92] : memref<216x1000xf32, #tpu.memory_space<vmem>>, vector<8x1000xf32>
    tpu.vector_store %arg7[%c184_91, %c0_92], %145 {strides = array<i32>} : memref<216x1000xf32, #tpu.memory_space<vmem>>, vector<8x1000xf32>,
    %147 = vector.extract_strided_slice %98 {offsets = [0, 237], sizes = [8, 1000], strides = [1, 1]} : vector<8x1280xf32> to vector<8x1000xf32>
    %c192_93 = arith.constant 192 : index
    %c0_94 = arith.constant 0 : index
    %148 = vector.load %arg7[%c192_93, %c0_94] : memref<216x1000xf32, #tpu.memory_space<vmem>>, vector<8x1000xf32>
    tpu.vector_store %arg7[%c192_93, %c0_94], %147 {strides = array<i32>} : memref<216x1000xf32, #tpu.memory_space<vmem>>, vector<8x1000xf32>,
    %149 = vector.extract_strided_slice %98 {offsets = [0, 238], sizes = [8, 1000], strides = [1, 1]} : vector<8x1280xf32> to vector<8x1000xf32>
    %c200_95 = arith.constant 200 : index
    %c0_96 = arith.constant 0 : index
    %150 = vector.load %arg7[%c200_95, %c0_96] : memref<216x1000xf32, #tpu.memory_space<vmem>>, vector<8x1000xf32>
    tpu.vector_store %arg7[%c200_95, %c0_96], %149 {strides = array<i32>} : memref<216x1000xf32, #tpu.memory_space<vmem>>, vector<8x1000xf32>,
    %151 = vector.extract_strided_slice %98 {offsets = [0, 239], sizes = [8, 1000], strides = [1, 1]} : vector<8x1280xf32> to vector<8x1000xf32>
    %c208_97 = arith.constant 208 : index
    %c0_98 = arith.constant 0 : index
    %152 = vector.load %arg7[%c208_97, %c0_98] : memref<216x1000xf32, #tpu.memory_space<vmem>>, vector<8x1000xf32>
    tpu.vector_store %arg7[%c208_97, %c0_98], %151 {strides = array<i32>} : memref<216x1000xf32, #tpu.memory_space<vmem>>, vector<8x1000xf32>,
    %c0_99 = arith.constant 0 : index
    %c0_100 = arith.constant 0 : index
    %153 = vector.load %arg3[%c0_99, %c0_100] : memref<16x216xbf16, #tpu.memory_space<vmem>>, vector<16x216xbf16>
    %c0_101 = arith.constant 0 : index
    %c0_102 = arith.constant 0 : index
    %154 = vector.load %arg7[%c0_101, %c0_102] : memref<216x1000xf32, #tpu.memory_space<vmem>>, vector<216x1000xf32>
    %155 = arith.truncf %154 : vector<216x1000xf32> to vector<216x1000xbf16>
    %cst_103 = arith.constant dense<0.000000e+00> : vector<16x1000xf32>
    %156 = tpu.matmul %153, %155, %cst_103 {dimension_numbers = #tpu.dot_dimension_numbers<[1], [0], [0], [1], [0, 0, 1, 1], [], []>} : vector<16x216xbf16>, vector<216x1000xbf16>, vector<16x1000xf32> -> vector<16x1000xf32>
    %157 = vector.extract_strided_slice %156 {offsets = [0, 0], sizes = [8, 1000], strides = [1, 1]} : vector<16x1000xf32> to vector<8x1000xf32>
    %158 = vector.extract_strided_slice %156 {offsets = [8, 0], sizes = [8, 1000], strides = [1, 1]} : vector<16x1000xf32> to vector<8x1000xf32>
    %cst_104 = arith.constant 0.000000e+00 : f32
    %159 = vector.broadcast %cst_104 : f32 to vector<8x1000xf32>
    %160 = arith.cmpf oge, %157, %159 : vector<8x1000xf32>
    %cst_105 = arith.constant 0.00999999977 : f32
    %161 = vector.broadcast %cst_105 : f32 to vector<8x1000xf32>
    %162 = arith.mulf %161, %157 : vector<8x1000xf32>
    %163 = arith.select %160, %157, %162 : vector<8x1000xi1>, vector<8x1000xf32>
    %c0_106 = arith.constant 0 : index
    %c0_107 = arith.constant 0 : index
    %c0_108 = arith.constant 0 : index
    %164 = vector.load %arg5[%c0_106, %c0_107, %c0_108] : memref<1x8x1000xf32, #tpu.memory_space<vmem>>, vector<1x8x1000xf32>
    %165 = vector.shape_cast %164 : vector<1x8x1000xf32> to vector<8x1000xf32>
    %166 = vector.shape_cast %163 : vector<8x1000xf32> to vector<1x8x1000xf32>
    tpu.vector_store %arg5[%c0_106, %c0_107, %c0_108], %166 {strides = array<i32>} : memref<1x8x1000xf32, #tpu.memory_space<vmem>>, vector<1x8x1000xf32>,
    %cst_109 = arith.constant 0.000000e+00 : f32
    %167 = vector.broadcast %cst_109 : f32 to vector<8x1000xf32>
    %168 = arith.subf %167, %158 : vector<8x1000xf32>
    %169 = math.exp %168 : vector<8x1000xf32>
    %cst_110 = arith.constant 1.000000e+00 : f32
    %170 = vector.broadcast %cst_110 : f32 to vector<8x1000xf32>
    %171 = arith.addf %170, %169 : vector<8x1000xf32>
    %cst_111 = arith.constant 1.000000e+00 : f32
    %172 = vector.broadcast %cst_111 : f32 to vector<8x1000xf32>
    %173 = arith.divf %172, %171 : vector<8x1000xf32>
    %c0_112 = arith.constant 0 : index
    %c0_113 = arith.constant 0 : index
    %c0_114 = arith.constant 0 : index
    %174 = vector.load %arg6[%c0_112, %c0_113, %c0_114] : memref<1x8x1000xf32, #tpu.memory_space<vmem>>, vector<1x8x1000xf32>
    %175 = vector.shape_cast %174 : vector<1x8x1000xf32> to vector<8x1000xf32>
    %176 = vector.shape_cast %173 : vector<8x1000xf32> to vector<1x8x1000xf32>
    tpu.vector_store %arg6[%c0_112, %c0_113, %c0_114], %176 {strides = array<i32>} : memref<1x8x1000xf32, #tpu.memory_space<vmem>>, vector<1x8x1000xf32>,
    return
  }
  func.func @transform_0(%arg0: i32) -> (i32, i32, i32) {
    %c0_i32 = arith.constant 0 : i32
    %c0_i32_0 = arith.constant 0 : i32
    %c0_i32_1 = arith.constant 0 : i32
    return %arg0, %c0_i32, %c0_i32_0 : i32, i32, i32
  }
  func.func @transform_1(%arg0: i32) -> (i32, i32) {
    %c0_i32 = arith.constant 0 : i32
    %c0_i32_0 = arith.constant 0 : i32
    %c0_i32_1 = arith.constant 0 : i32
    return %c0_i32, %c0_i32_0 : i32, i32
  }
  func.func @transform_2(%arg0: i32) -> (i32, i32) {
    %c0_i32 = arith.constant 0 : i32
    %c0_i32_0 = arith.constant 0 : i32
    %c0_i32_1 = arith.constant 0 : i32
    return %c0_i32, %c0_i32_0 : i32, i32
  }
  func.func @transform_3(%arg0: i32) -> (i32, i32) {
    %c0_i32 = arith.constant 0 : i32
    %c0_i32_0 = arith.constant 0 : i32
    %c0_i32_1 = arith.constant 0 : i32
    return %c0_i32, %c0_i32_0 : i32, i32
  }
  func.func @transform_4(%arg0: i32) -> (i32, i32, i32) {
    %c0_i32 = arith.constant 0 : i32
    %c0_i32_0 = arith.constant 0 : i32
    %c0_i32_1 = arith.constant 0 : i32
    return %arg0, %c0_i32, %c0_i32_0 : i32, i32, i32
  }
  func.func @transform_5(%arg0: i32) -> (i32, i32, i32) {
    %c0_i32 = arith.constant 0 : i32
    %c0_i32_0 = arith.constant 0 : i32
    %c0_i32_1 = arith.constant 0 : i32
    return %arg0, %c0_i32, %c0_i32_0 : i32, i32, i32
  }
}

</mosaic_0001>

<bundles_post_ra>
// kernel: stacked_conv_blocks_sigmoid_forward.1
= control target key start
LH: loop header
LB: loop body
LE: loop exit
PB: predicated region body
PF: predicated region fallthrough
CT: control target
= control target key end

     0   :  { %s4356_s18 = smov 0   ;;  %s6686_s0 = inlined_call_operand.vmem [shape: bf16[2,8,1280], index: 0, kind: input, shape index: {}]   ;;  %s6687_s1 = inlined_call_operand.vmem [shape: bf16[8,216], index: 1, kind: input, shape index: {}]   ;;  %s6688_s2 = inlined_call_operand.vmem [shape: bf16[16,216], index: 2, kind: input, shape index: {}]   ;;  %s6689_s3 = inlined_call_operand.vmem [shape: f32[1,1000], index: 3, kind: input, shape index: {}]   ;;  %s6690_s4 = inlined_call_operand.vmem [shape: f32[2,8,1000], index: 4, kind: output, shape index: {0}]   ;;  %s6691_s5 = inlined_call_operand.vmem [shape: f32[2,8,1000], index: 5, kind: output, shape index: {1}]  }
   0x1 LB: > { %s3866_s19 = sadd.s32 4294967295, %s4297_s18   ;;  %p3870_p0 = scmp.ge.s32.totalorder %s4297_s18, 1  ;;  %s4297_s18 = sphi %s4356_s18, %s16_s18  }
   0x2   : > { %p190_p1 = scmp.lt.s32.totalorder %s4297_s18, 3 }
   0x4   : > { %p191_p2 = pnand %p3870_p0, %p190_p1 }
   0x5   : > { %p223_p3 = scmp.lt.s32.totalorder (!%p191_p2), %s3866_s19, 1  ;;  %s6718_s24 = smov (!%p191_p2), 111   ;;  %v4314_v14 = vmov (!%p191_p2), 0.0   ;;  %vm6717_vm0 = vcmask (!%p191_p2), 908288   ;;  %vm6722_vm1 = vcmask (!%p191_p2), 900096   ;;  %vm6724_vm2 = vcmask (!%p191_p2), 891904  }
   0x6   : > { %194 = sbr.rel (%p191_p2) target bundleno = 1336 (0x538), region = 36  ;;  %s6713_s25 = smov (!%p191_p2), 110   ;;  %2022 = vst [vmem:[#allocation3] sm:$0xff] (!%p191_p2), %v4314_v14  ;;  %2030 = vst [vmem:[#allocation3 + $0x40] sm:$0xff] (!%p191_p2), %v4314_v14  ;;  %vm6723_vm3 = vcmask (!%p191_p2), 826368   ;;  %v4552_v52 = vld [vmem:[%s6687_s1] sm:$0xff] (!%p191_p2) }
   0x7   : > { %s6704_s26 = smov (!%p191_p2), 109   ;;  %s4302_s27 = smov (!%p191_p2), 101   ;;  %v4563_v55 = vcombine.high (!%p191_p2), %v4552_v52, %v4552_v52  ;;  %vm6706_vm4 = vcmask (!%p191_p2), 719872   ;;  %vm6726_vm5 = vcmask (!%p191_p2), 818176   ;;  %vm6725_vm6 = vcmask (!%p191_p2), 809984  }
   0x8   : > { %s4303_s28 = smov (!%p191_p2), 100   ;;  %s6692_s29 = smov (!%p191_p2), 99   ;;  %vm6731_vm7 = vcmask (!%p191_p2), 744448   ;;  %vm6730_vm8 = vcmask (!%p191_p2), 736256   ;;  %vm6742_vm9 = vcmask (!%p191_p2), 728064   ;;  %vm6741_vm10 = vcmask (!%p191_p2), 89088  }
   0x9   : > { %s4305_s30 = smov (!%p191_p2), 91   ;;  %s6694_s6 = smov (!%p191_p2), 90   ;;  %3879 = vmatprep.mubr.msk.bf16.mxu0 (!%p191_p2), %vm6706_vm4, %v4563_v55  ;;  %3881 = vmatprep.mubr.msk.bf16.mxu1 (!%p191_p2), %vm6706_vm4, %v4563_v55  ;;  %vm702_vm11 = vcmask (!%p191_p2), 80896   ;;  %vm745_vm12 = vcmask (!%p191_p2), 72704   ;;  %vm6783_vm13 = vcmask (!%p191_p2), 1043456   ;;  %vm864_vm14 = vcmask (!%p191_p2), 1039360  }
   0xa   : > { %s4307_s7 = smov (!%p191_p2), 89   ;;  %s4308_s8 = smov (!%p191_p2), 11   ;;  %vm788_vm15 = vcmask (!%p191_p2), 7168   ;;  %vm908_vm4 = vcmask (!%p191_p2), 973824  }
   0xb   : > { %s6720_s9 = smov (!%p191_p2), 10   ;;  %s6698_s10 = smov (!%p191_p2), 9  }
   0xc   : > { %s6700_s11 = smov (!%p191_p2), 127   ;;  %s6702_s12 = smov (!%p191_p2), 119  }
   0xd   : > { %s7015_s19 = smov (!%p223_p3, %s3866_s19), 1  ;;  %s4313_s13 = smov 1  }
   0xe   : > { %s3900_s20 = smul.u32 40, %s7015_s19  ;;  %s4315_s14 = smov 118  }
   0xf   : > { %s4316_s15 = smov 117   ;;  %s6781_s16 = smov 39  }
  0x10   : > { %s4370_s23 = scalar_lea.vmem %s6686_s0, %s3900_s20  ;;  %s6779_s17 = smov 38  }
  0x11   : > { %v4373_v0 = vld [vmem:[%s4370_s23 + $0x10] sm:$0xff]  ;;  %v4376_v1 = vld [vmem:[%s4370_s23] sm:$0xff]  ;;  %v4379_v2 = vld [vmem:[%s4370_s23 + $0x8] sm:$0xff]  ;;  %s6777_s20 = smov 37   ;;  %s6775_s21 = smov 29  }
  0x12   : > { %v248_v3 = vunpack.c.l.bf16 %v4373_v0  ;;  %v249_v4 = vunpack.c.h.bf16 %v4373_v0  ;;  %v244_v5 = vunpack.c.l.bf16 %v4376_v1  ;;  %v245_v6 = vunpack.c.h.bf16 %v4376_v1  ;;  %s6773_s22 = smov 28   ;;  %v4525_v37 = vld [vmem:[%s4370_s23 + $0x18] sm:$0xff] }
  0x13   : > { %v246_v7 = vunpack.c.l.bf16 %v4379_v2  ;;  %v247_v8 = vunpack.c.h.bf16 %v4379_v2  ;;  %v250_v44 = vunpack.c.l.bf16 %v4525_v37  ;;  %v251_v45 = vunpack.c.h.bf16 %v4525_v37 }
  0x14   : > { %v4387_v9 = vpack.i.bf16 %v249_v4, %v248_v3  ;;  %v3936_v10 = vpack.i.bf16 %v245_v6, %v244_v5 }
  0x15   : > { %v3951_v11 = vpack.i.bf16 %v246_v7, %v245_v6  ;;  %v3941_v12 = vpack.i.bf16 %v247_v8, %v246_v7  ;;  %v3956_v13 = vpack.i.bf16 %v247_v8, %v244_v5  ;;  %v4559_v54 = vpack.i.bf16 %v251_v45, %v250_v44 }
  0x16   : > { %3947 = vrot.lane.b32.xlu1 %v4387_v9, %s6718_s24  ;;  %3937 = vrot.lane.b32.xlu0 %v3936_v10, %s6718_s24 }
  0x1a   : > { %3952 = vrot.lane.b32.xlu1 %v3951_v11, %s6713_s25  ;;  %3942 = vrot.lane.b32.xlu0 %v3941_v12, %s6718_s24 }
  0x1e   : > { %3962 = vrot.lane.b32.xlu1 %v3951_v11, %s6704_s26  ;;  %3957 = vrot.lane.b32.xlu0 %v3956_v13, %s6713_s25 }
  0x22   : > { %3972 = vrot.lane.b32.xlu1 %v3956_v13, %s6704_s26  ;;  %3967 = vrot.lane.b32.xlu0 %v3951_v11, %s4302_s27 }
  0x26   : > { %3982 = vrot.lane.b32.xlu1 %v3951_v11, %s4303_s28  ;;  %3977 = vrot.lane.b32.xlu0 %v3956_v13, %s4302_s27 }
  0x2a   : > { %3992 = vrot.lane.b32.xlu1 %v3956_v13, %s4303_s28  ;;  %3987 = vrot.lane.b32.xlu0 %v3951_v11, %s6692_s29 }
  0x2e   : > { %4002 = vrot.lane.b32.xlu1 %v3951_v11, %s4305_s30  ;;  %3997 = vrot.lane.b32.xlu0 %v3956_v13, %s6692_s29 }
  0x32   : > { %4012 = vrot.lane.b32.xlu1 %v3956_v13, %s4305_s30  ;;  %4007 = vrot.lane.b32.xlu0 %v3951_v11, %s6694_s6 }
  0x36   : > { %4022 = vrot.lane.b32.xlu1 %v3951_v11, %s4307_s7  ;;  %4017 = vrot.lane.b32.xlu0 %v3956_v13, %s6694_s6 }
  0x3a   : > { %4032 = vrot.lane.b32.xlu1 %v3956_v13, %s4307_s7  ;;  %4027 = vrot.lane.b32.xlu0 %v3951_v11, %s4308_s8 }
  0x3e   : > { %4042 = vrot.lane.b32.xlu1 %v3951_v11, %s6720_s9  ;;  %4037 = vrot.lane.b32.xlu0 %v3956_v13, %s4308_s8 }
  0x42   : > { %4052 = vrot.lane.b32.xlu1 %v3956_v13, %s6720_s9  ;;  %4047 = vrot.lane.b32.xlu0 %v3951_v11, %s6698_s10 }
  0x46   : > { %848 = vrot.lane.b32.xlu1 %v4376_v1, %s6700_s11  ;;  %4057 = vrot.lane.b32.xlu0 %v3956_v13, %s6698_s10 }
  0x4a   : > { %892 = vrot.lane.b32.xlu1 %v4376_v1, %s6702_s12  ;;  %850 = vrot.lane.b32.xlu0 %v4379_v2, %s6700_s11 }
  0x4e   : > { %4062 = vrot.lane.b32.xlu1 %v3951_v11, %s4313_s13  ;;  %894 = vrot.lane.b32.xlu0 %v4379_v2, %s6702_s12 }
  0x52   : > { %4072 = vrot.lane.b32.xlu1 %v4387_v9, %s6713_s25  ;;  %4067 = vrot.lane.b32.xlu0 %v3956_v13, %s4313_s13 }
  0x56   : > { %938 = vrot.lane.b32.xlu1 %v4379_v2, %s4315_s14  ;;  %936 = vrot.lane.b32.xlu0 %v4376_v1, %s4315_s14 }
  0x5a   : > { %982 = vrot.lane.b32.xlu1 %v4379_v2, %s4316_s15  ;;  %980 = vrot.lane.b32.xlu0 %v4376_v1, %s4316_s15 }
  0x5e   : > { %4082 = vrot.lane.b32.xlu1 %v4387_v9, %s4302_s27  ;;  %4077 = vrot.lane.b32.xlu0 %v4387_v9, %s6704_s26 }
  0x62   : > { %1026 = vrot.lane.b32.xlu1 %v4379_v2, %s6781_s16  ;;  %1024 = vrot.lane.b32.xlu0 %v4376_v1, %s6781_s16 }
  0x66   : > { %1070 = vrot.lane.b32.xlu1 %v4379_v2, %s6779_s17  ;;  %1068 = vrot.lane.b32.xlu0 %v4376_v1, %s6779_s17 }
  0x6a   : > { %4092 = vrot.lane.b32.xlu1 %v4387_v9, %s6692_s29  ;;  %4087 = vrot.lane.b32.xlu0 %v4387_v9, %s4303_s28  ;;  %s6696_s29 = smov 27  }
  0x6e   : > { %1114 = vrot.lane.b32.xlu1 %v4379_v2, %s6777_s20  ;;  %1112 = vrot.lane.b32.xlu0 %v4376_v1, %s6777_s20 }
  0x72   : > { %1158 = vrot.lane.b32.xlu1 %v4379_v2, %s6775_s21  ;;  %1156 = vrot.lane.b32.xlu0 %v4376_v1, %s6775_s21 }
  0x76   : > { %4102 = vrot.lane.b32.xlu1 %v4387_v9, %s6694_s6  ;;  %4097 = vrot.lane.b32.xlu0 %v4387_v9, %s4305_s30  ;;  %s6760_s6 = smov 19  }
  0x7a   : > { %1202 = vrot.lane.b32.xlu1 %v4379_v2, %s6773_s22  ;;  %1200 = vrot.lane.b32.xlu0 %v4376_v1, %s6773_s22 }
  0x7e   : > { %1246 = vrot.lane.b32.xlu1 %v4379_v2, %s6696_s29  ;;  %1244 = vrot.lane.b32.xlu0 %v4376_v1, %s6696_s29  ;;  %s6748_s29 = smov 18  }
  0x82   : > { %4112 = vrot.lane.b32.xlu1 %v4387_v9, %s4308_s8  ;;  %4107 = vrot.lane.b32.xlu0 %v4387_v9, %s4307_s7 }
  0x86   : > { %1290 = vrot.lane.b32.xlu1 %v4379_v2, %s6760_s6  ;;  %1288 = vrot.lane.b32.xlu0 %v4376_v1, %s6760_s6 }
  0x88   : > { %v4481_v15 = vpop.permute.xlu1 %3947  ;;  %v3938_v16 = vpop.permute.xlu0 %3937 }
  0x89   : > { %v6707_v17 = vunpack.i.h.bf16 %v4481_v15  ;;  %v3949_v18 = vunpack.i.l.bf16 %v4481_v15  ;;  %v3940_v22 = vunpack.i.h.bf16 %v3938_v16  ;;  %v3939_v26 = vunpack.i.l.bf16 %v3938_v16 }
  0x8a   : > { %1334 = vrot.lane.b32.xlu1 %v4379_v2, %s6748_s29  ;;  %1332 = vrot.lane.b32.xlu0 %v4376_v1, %s6748_s29 }
  0x8b   : > { %v281_v19 = vsel %vm6717_vm0, %v3949_v18, %v6707_v17  ;;  %v277_v33 = vsel %vm6717_vm0, %v3939_v26, %v3940_v22 }
  0x8c   : > { %296 = vst [vmem:[#allocation2 + $0x20] sm:$0xff] %v281_v19  ;;  %v4494_v20 = vpop.permute.xlu1 %3952  ;;  %v4496_v21 = vpop.permute.xlu0 %3942 }
  0x8d   : > { %v3955_v23 = vunpack.i.h.bf16 %v4494_v20  ;;  %v3954_v24 = vunpack.i.l.bf16 %v4494_v20  ;;  %v3944_v25 = vunpack.i.l.bf16 %v4496_v21 }
  0x8e   : > { %4122 = vrot.lane.b32.xlu1 %v4387_v9, %s6698_s10  ;;  %4117 = vrot.lane.b32.xlu0 %v4387_v9, %s6720_s9  ;;  %s6752_s10 = smov 17  }
  0x8f   : > { %v319_v27 = vsel %vm6722_vm1, %v3954_v24, %v3955_v23  ;;  %v278_v28 = vsel %vm6717_vm0, %v3940_v22, %v3944_v25 }
  0x90   : > { %v4511_v29 = vpop.permute.xlu1 %3962  ;;  %v4513_v30 = vpop.permute.xlu0 %3957  ;;  %v1638_v31 = vpack.c.bf16 %v319_v27, %v278_v28 }
  0x91   : > { %v3959_v32 = vunpack.i.l.bf16 %v4513_v30  ;;  %v3965_v34 = vunpack.i.h.bf16 %v4511_v29  ;;  %v3964_v35 = vunpack.i.l.bf16 %v4511_v29 }
  0x92   : > { %1378 = vrot.lane.b32.xlu1 %v4379_v2, %s6752_s10  ;;  %1376 = vrot.lane.b32.xlu0 %v4376_v1, %s6752_s10 }
  0x93   : > { %v318_v36 = vsel %vm6722_vm1, %v3959_v32, %v3954_v24  ;;  %1784 = vmatprep.subr.bf16.mxu0 %v1638_v31  ;;  %v359_v46 = vsel %vm6724_vm2, %v3964_v35, %v3965_v34 }
  0x94   : > { %v4527_v38 = vpop.permute.xlu1 %3972  ;;  %v4529_v39 = vpop.permute.xlu0 %3967  ;;  %v1637_v40 = vpack.c.bf16 %v318_v36, %v277_v33 }
  0x95   : > { %v3970_v41 = vunpack.i.h.bf16 %v4529_v39  ;;  %v3969_v42 = vunpack.i.l.bf16 %v4529_v39  ;;  %v3974_v43 = vunpack.i.l.bf16 %v4527_v38 }
  0x96   : > { %896 = vrot.lane.b32.xlu1 %v4373_v0, %s6702_s12  ;;  %852 = vrot.lane.b32.xlu0 %v4373_v0, %s6700_s11  ;;  %s6784_s11 = smov 99   ;;  %s6785_s12 = smov 27  }
  0x97   : > { %v403_v47 = vsel %vm6723_vm3, %v3969_v42, %v3970_v41  ;;  %1785 = vmatpush1.bf16.msra.mxu0 %v1637_v40  ;;  %v358_v53 = vsel %vm6724_vm2, %v3974_v43, %v3964_v35 }
  0x98   : > { %v3983_v48 = vpop.permute.xlu1 %3982  ;;  %v4546_v49 = vpop.permute.xlu0 %3977  ;;  %v1646_v50 = vpack.c.bf16 %v403_v47, %v359_v46 }
  0x99   : > { %v3979_v51 = vunpack.i.l.bf16 %v4546_v49  ;;  %v3985_v56 = vunpack.i.h.bf16 %v3983_v48  ;;  %v3984_v57 = vunpack.i.l.bf16 %v3983_v48 }
  0x9a   : > { %940 = vrot.lane.b32.xlu1 %v4373_v0, %s4315_s14  ;;  %4127 = vrot.lane.b32.xlu0 %v4387_v9, %s4313_s13 }
  0x9b   : > { %v402_v58 = vsel %vm6723_vm3, %v3979_v51, %v3969_v42  ;;  %1786 = vmatprep.subr.bf16.mxu0 %v1646_v50  ;;  %v446_v5 = vsel %vm6726_vm5, %v3984_v57, %v3985_v56 }
  0x9c   : > { %v4566_v59 = vpop.permute.xlu1 %3992  ;;  %v3988_v60 = vpop.permute.xlu0 %3987  ;;  %v1645_v61 = vpack.c.bf16 %v402_v58, %v358_v53 }
  0x9d   : > { %v3990_v62 = vunpack.i.h.bf16 %v3988_v60  ;;  %v3989_v63 = vunpack.i.l.bf16 %v3988_v60  ;;  %v3995_v3 = vunpack.i.h.bf16 %v4566_v59  ;;  %v3994_v4 = vunpack.i.l.bf16 %v4566_v59 }
  0x9e   : > { %4132 = vrot.lane.b32.xlu1 %v4559_v54, %s6718_s24  ;;  %984 = vrot.lane.b32.xlu0 %v4373_v0, %s4316_s15  ;;  %s6788_s24 = smov 119  }
  0x9f   : > { %v489_v6 = vsel %vm6725_vm6, %v3989_v63, %v3990_v62  ;;  %1787 = vmatpush1.bf16.msra.mxu0 %v1645_v61  ;;  %v445_v12 = vsel %vm6726_vm5, %v3994_v4, %v3984_v57  ;;  %v4588_v13 = vsel %vm6726_vm5, %v3985_v56, %v3995_v3 }
  0xa0   : > { %v4003_v7 = vpop.permute.xlu1 %4002  ;;  %v4580_v8 = vpop.permute.xlu0 %3997  ;;  %v1654_v9 = vpack.c.bf16 %v489_v6, %v446_v5 }
  0xa1   : > { %v4000_v10 = vunpack.i.h.bf16 %v4580_v8  ;;  %v3999_v11 = vunpack.i.l.bf16 %v4580_v8  ;;  %v4005_v16 = vunpack.i.h.bf16 %v4003_v7  ;;  %v4004_v19 = vunpack.i.l.bf16 %v4003_v7 }
  0xa2   : > { %1028 = vrot.lane.b32.xlu1 %v4373_v0, %s6781_s16  ;;  %4137 = vrot.lane.b32.xlu0 %v4559_v54, %s6713_s25  ;;  %s6787_s25 = smov 9  }
  0xa3   : > { %v488_v22 = vsel %vm6725_vm6, %v3999_v11, %v3989_v63  ;;  %v4598_v24 = vsel %vm6725_vm6, %v3990_v62, %v4000_v10  ;;  %1788 = vmatprep.subr.bf16.mxu0 %v1654_v9  ;;  %v532_v40 = vsel %vm6731_vm7, %v4004_v19, %v4005_v16 }
  0xa4   : > { %v4600_v26 = vpop.permute.xlu1 %4012  ;;  %v4008_v27 = vpop.permute.xlu0 %4007  ;;  %v1653_v28 = vpack.c.bf16 %v488_v22, %v445_v12  ;;  %v1655_v31 = vpack.c.bf16 %v4598_v24, %v4588_v13 }
  0xa5   : > { %v4010_v32 = vunpack.i.h.bf16 %v4008_v27  ;;  %v4009_v33 = vunpack.i.l.bf16 %v4008_v27  ;;  %v4015_v35 = vunpack.i.h.bf16 %v4600_v26  ;;  %v4014_v36 = vunpack.i.l.bf16 %v4600_v26 }
  0xa6   : > { %4142 = vrot.lane.b32.xlu1 %v4559_v54, %s6704_s26  ;;  %1072 = vrot.lane.b32.xlu0 %v4373_v0, %s6779_s17  ;;  %s6786_s26 = smov 90  }
  0xa7   : > { %v575_v42 = vsel %vm6730_vm8, %v4009_v33, %v4010_v32  ;;  %1789 = vmatpush1.bf16.msra.mxu0 %v1653_v28  ;;  %v531_v48 = vsel %vm6731_vm7, %v4014_v36, %v4004_v19  ;;  %v4620_v50 = vsel %vm6731_vm7, %v4005_v16, %v4015_v35 }
  0xa8   : > { %v4023_v43 = vpop.permute.xlu1 %4022  ;;  %v4612_v44 = vpop.permute.xlu0 %4017  ;;  %v1662_v45 = vpack.c.bf16 %v575_v42, %v532_v40 }
  0xa9   : > { %v4020_v46 = vunpack.i.h.bf16 %v4612_v44  ;;  %v4019_v47 = vunpack.i.l.bf16 %v4612_v44  ;;  %v4025_v51 = vunpack.i.h.bf16 %v4023_v43  ;;  %v4024_v53 = vunpack.i.l.bf16 %v4023_v43 }
  0xaa   : > { %1116 = vrot.lane.b32.xlu1 %v4373_v0, %s6777_s20  ;;  %4147 = vrot.lane.b32.xlu0 %v4559_v54, %s4302_s27 }
  0xab   : > { %v574_v56 = vsel %vm6730_vm8, %v4019_v47, %v4009_v33  ;;  %v4630_v57 = vsel %vm6730_vm8, %v4010_v32, %v4020_v46  ;;  %1790 = vmatprep.subr.bf16.mxu0 %v1662_v45  ;;  %v618_v7 = vsel %vm6742_vm9, %v4024_v53, %v4025_v51 }
  0xac   : > { %v4632_v58 = vpop.permute.xlu1 %4032  ;;  %v4028_v60 = vpop.permute.xlu0 %4027  ;;  %v1661_v61 = vpack.c.bf16 %v574_v56, %v531_v48 }
  0xad   : > { %v4030_v63 = vunpack.i.h.bf16 %v4028_v60  ;;  %v4029_v4 = vunpack.i.l.bf16 %v4028_v60  ;;  %v6715_v5 = vunpack.i.h.bf16 %v4632_v58  ;;  %v4034_v6 = vunpack.i.l.bf16 %v4632_v58 }
  0xae   : > { %4152 = vrot.lane.b32.xlu1 %v4559_v54, %s4303_s28  ;;  %1160 = vrot.lane.b32.xlu0 %v4373_v0, %s6775_s21 }
  0xaf   : > { %v661_v9 = vsel %vm6741_vm10, %v4029_v4, %v4030_v63  ;;  %1791 = vmatpush1.bf16.msra.mxu0 %v1661_v61  ;;  %v617_v27 = vsel %vm6742_vm9, %v4034_v6, %v4024_v53  ;;  %v4652_v28 = vsel %vm6742_vm9, %v4025_v51, %v6715_v5 }
  0xb0   : > { %v4043_v11 = vpop.permute.xlu1 %4042  ;;  %v4644_v12 = vpop.permute.xlu0 %4037  ;;  %v1670_v16 = vpack.c.bf16 %v661_v9, %v618_v7 }
  0xb1   : > { %v6716_v19 = vunpack.i.h.bf16 %v4644_v12  ;;  %v4039_v22 = vunpack.i.l.bf16 %v4644_v12  ;;  %v4045_v32 = vunpack.i.h.bf16 %v4043_v11  ;;  %v4044_v33 = vunpack.i.l.bf16 %v4043_v11 }
  0xb2   : > { %1204 = vrot.lane.b32.xlu1 %v4373_v0, %s6773_s22  ;;  %4157 = vrot.lane.b32.xlu0 %v4559_v54, %s6784_s11  ;;  %v818_v11 = vrot.slane %v4376_v1, 4 }
  0xb3   : > { %v660_v36 = vsel %vm6741_vm10, %v4039_v22, %v4029_v4  ;;  %v4662_v40 = vsel %vm6741_vm10, %v4030_v63, %v6716_v19  ;;  %1792 = vmatprep.subr.bf16.mxu0 %v1670_v16  ;;  %v704_v53 = vsel %vm702_vm11, %v4044_v33, %v4045_v32  ;;  %v819_v16 = vrot.slane %v4379_v2, 4 }
  0xb4   : > { %v4664_v42 = vpop.permute.xlu1 %4052  ;;  %v4048_v43 = vpop.permute.xlu0 %4047  ;;  %v1669_v45 = vpack.c.bf16 %v660_v36, %v617_v27 }
  0xb5   : > { %v4050_v48 = vunpack.i.h.bf16 %v4048_v43  ;;  %v4049_v51 = vunpack.i.l.bf16 %v4048_v43  ;;  %v6710_v56 = vunpack.i.h.bf16 %v4664_v42  ;;  %v4054_v60 = vunpack.i.l.bf16 %v4664_v42 }
  0xb6   : > { %4162 = vrot.lane.b32.xlu1 %v4559_v54, %s4305_s30  ;;  %1248 = vrot.lane.b32.xlu0 %v4373_v0, %s6785_s12 }
  0xb7   : > { %v747_v61 = vsel %vm745_vm12, %v4049_v51, %v4050_v48  ;;  %1793 = vmatpush1.bf16.msra.mxu0 %v1669_v45  ;;  %v703_v22 = vsel %vm702_vm11, %v4054_v60, %v4044_v33  ;;  %v4690_v27 = vsel %vm702_vm11, %v4045_v32, %v6710_v56  ;;  %v824_v32 = vsel %vm6783_vm13, %v818_v11, %v819_v16 }
  0xb8   : > { %v849_v63 = vpop.permute.xlu1 %848  ;;  %v4676_v4 = vpop.permute.xlu0 %4057  ;;  %v1678_v6 = vpack.c.bf16 %v747_v61, %v704_v53 }
  0xb9   : > { %v6711_v7 = vunpack.i.h.bf16 %v4676_v4  ;;  %v4059_v9 = vunpack.i.l.bf16 %v4676_v4 }
  0xba   : > { %1292 = vrot.lane.b32.xlu1 %v4373_v0, %s6760_s6  ;;  %4167 = vrot.lane.b32.xlu0 %v4559_v54, %s6786_s26 }
  0xbb   : > { %v746_v36 = vsel %vm745_vm12, %v4059_v9, %v4049_v51  ;;  %v4696_v1 = vsel %vm745_vm12, %v4050_v48, %v6711_v7  ;;  %1794 = vmatprep.subr.bf16.mxu0 %v1678_v6  ;;  %v6709_v51 = vrot.slane %v4373_v0, 4  ;;  %v858_v48 = vrot.slane %v849_v63, 4 }
  0xbc   : > { %v893_v2 = vpop.permute.xlu1 %892  ;;  %v4698_v43 = vpop.permute.xlu0 %850  ;;  %v1677_v45 = vpack.c.bf16 %v746_v36, %v703_v22  ;;  %v833_v6 = vunpack.c.h.bf16 %v824_v32  ;;  %v3945_v63 = vunpack.i.h.bf16 %v4496_v21 }
  0xbd   : > { %v6708_v53 = vrot.slane %v4698_v43, 4  ;;  %v4717_v36 = vsel %vm6783_vm13, %v819_v16, %v6709_v51 }
  0xbe   : > { %4172 = vrot.lane.b32.xlu1 %v4559_v54, %s4307_s7  ;;  %1336 = vrot.lane.b32.xlu0 %v4373_v0, %s6748_s29  ;;  %v834_v7 = vunpack.c.l.bf16 %v4717_v36 }
  0xbf   : > { %1795 = vmatpush1.bf16.msra.mxu0 %v1677_v45  ;;  %v863_v9 = vsel %vm6783_vm13, %v858_v48, %v6708_v53  ;;  %v902_v45 = vrot.slane %v893_v2, 4  ;;  %v3960_v48 = vunpack.i.h.bf16 %v4513_v30  ;;  %v832_v53 = vunpack.c.l.bf16 %v824_v32 }
  0xc0   : > { %v4063_v60 = vpop.permute.xlu1 %4062  ;;  %v4709_v61 = vpop.permute.xlu0 %894  ;;  %v865_v16 = vsel %vm864_vm14, %v863_v9, %v4698_v43 }
  0xc1   : > { %v4065_v11 = vunpack.i.h.bf16 %v4063_v60  ;;  %v4064_v22 = vunpack.i.l.bf16 %v4063_v60  ;;  %v6712_v17 = vrot.slane %v4709_v61, 4 }
  0xc2   : > { %1380 = vrot.lane.b32.xlu1 %v4373_v0, %s6752_s10  ;;  %4177 = vrot.lane.b32.xlu0 %v4559_v54, %s4308_s8 }
  0xc3   : > { %v790_v60 = vsel %vm788_vm15, %v4064_v22, %v4065_v11  ;;  %v907_v2 = vsel %vm6783_vm13, %v902_v45, %v6712_v17  ;;  %v280_v45 = vsel %vm6717_vm0, %v3945_v63, %v3949_v18  ;;  %v279_v17 = vsel %vm6717_vm0, %v3944_v25, %v3945_v63 }
  0xc4   : > { %v4732_v51 = vpop.permute.xlu1 %4072  ;;  %v4734_v33 = vpop.permute.xlu0 %4067  ;;  %v1686_v56 = vpack.c.bf16 %v833_v6, %v790_v60  ;;  %v909_v30 = vsel %vm908_vm4, %v907_v2, %v4709_v61  ;;  %v320_v60 = vsel %vm6722_vm1, %v3955_v23, %v3960_v48  ;;  %vm6750_vm0 = vcmask 965632  }
  0xc5   : > { %v4075_v47 = vunpack.i.h.bf16 %v4732_v51  ;;  %v4074_v32 = vunpack.i.l.bf16 %v4732_v51  ;;  %v4070_v9 = vunpack.i.h.bf16 %v4734_v33  ;;  %v4069_v6 = vunpack.i.l.bf16 %v4734_v33 }
  0xc6   : > { %4187 = vrot.lane.b32.xlu1 %v4559_v54, %s6787_s25  ;;  %4182 = vrot.lane.b32.xlu0 %v4559_v54, %s6720_s9  ;;  %s6789_s9 = smov 127  }
  0xc7   : > { %v321_v2 = vsel %vm6722_vm1, %v3960_v48, %v4074_v32  ;;  %v322_v18 = vsel %vm6722_vm1, %v4074_v32, %v4075_v47  ;;  %v791_v21 = vsel %vm788_vm15, %v4065_v11, %v4070_v9  ;;  %1796 = vmatprep.subr.bf16.mxu0 %v1686_v56  ;;  %v789_v25 = vsel %vm788_vm15, %v4069_v6, %v4064_v22  ;;  %v4777_v32 = vld [vmem:[%s4370_s23 + $0x20] sm:$0xff]  ;;  %s6791_s23 = smov 10  }
  0xc8   : > { %337 = vst [vmem:[#allocation2 + $0x60] sm:$0xff] %v322_v18  ;;  %v4764_v63 = vpop.permute.xlu1 %938  ;;  %v937_v20 = vpop.permute.xlu0 %936  ;;  %v1640_v5 = vpack.c.bf16 %v321_v2, %v280_v45  ;;  %v1685_v19 = vpack.c.bf16 %v832_v53, %v789_v25  ;;  %v4767_v62 = vpack.c.bf16 %v834_v7, %v791_v21  ;;  %v4242_v56 = vcombine.high %v865_v16, %v909_v30 }
  0xc9   : > { %v947_v23 = vrot.slane %v4764_v63, 4  ;;  %v946_v48 = vrot.slane %v937_v20, 4  ;;  %v1639_v11 = vpack.c.bf16 %v320_v60, %v279_v17  ;;  %vm6756_vm1 = vcmask 957440  }
  0xca   : > { %898 = vrot.lane.b32.xlu1 %v4525_v37, %s6788_s24  ;;  %854 = vrot.lane.b32.xlu0 %v4525_v37, %s6789_s9  ;;  %v4243_v60 = vcombine.low %v865_v16, %v909_v30  ;;  %v3980_v2 = vunpack.i.h.bf16 %v4546_v49  ;;  %v3975_v18 = vunpack.i.h.bf16 %v4527_v38 }
  0xcb   : > { %v951_v22 = vsel %vm6783_vm13, %v946_v48, %v947_v23  ;;  %1797 = vmatpush1.bf16.msra.mxu0 %v1685_v19  ;;  %1825 = vmatprep.subr.bf16.mxu1 %v1640_v5  ;;  %v4790_v5 = vunpack.c.l.bf16 %v4777_v32 }
  0xcc   : > { %v4779_v53 = vpop.permute.xlu1 %982  ;;  %v981_v7 = vpop.permute.xlu0 %980  ;;  %1798 = vmatprep.subr.bf16.mxu0 %v4242_v56  ;;  %1826 = vmatpush1.bf16.msra.mxu1 %v1639_v11  ;;  %v953_v45 = vsel %vm6750_vm0, %v951_v22, %v4764_v63  ;;  %v404_v25 = vsel %vm6723_vm3, %v3970_v41, %v3980_v2 }
  0xcd   : > { %v991_v6 = vrot.slane %v4779_v53, 4  ;;  %v990_v17 = vrot.slane %v981_v7, 4  ;;  %v4196_v38 = vpack.i.bf16 %v4314_v14, %v4790_v5  ;;  %v360_v14 = vsel %vm6724_vm2, %v3965_v34, %v3975_v18 }
  0xce   : > { %942 = vrot.lane.b32.xlu1 %v4525_v37, %s4315_s14  ;;  %4192 = vrot.lane.b32.xlu0 %v4559_v54, %s4313_s13 }
  0xcf   : > { %v995_v19 = vsel %vm6783_vm13, %v990_v17, %v991_v6  ;;  %1799 = vmatpush1.bf16.msra.mxu0 %v4243_v60 }
  0xd0   : > { %v997_v16 = vsel %vm6756_vm1, %v995_v19, %v4779_v53  ;;  %v4798_v49 = vpop.permute.xlu1 %4082  ;;  %v4800_v30 = vpop.permute.xlu0 %4077 }
  0xd1   : > { %v6737_v21 = vunpack.i.h.bf16 %v4798_v49  ;;  %v4084_v54 = vunpack.i.l.bf16 %v4798_v49  ;;  %v4079_v20 = vunpack.i.l.bf16 %v4800_v30  ;;  %v4244_v39 = vcombine.high %v953_v45, %v997_v16 }
  0xd2   : > { %1030 = vrot.lane.b32.xlu1 %v4525_v37, %s6781_s16  ;;  %986 = vrot.lane.b32.xlu0 %v4525_v37, %s4316_s15  ;;  %v4245_v11 = vcombine.low %v953_v45, %v997_v16  ;;  %v1647_v45 = vpack.c.bf16 %v404_v25, %v360_v14 }
  0xd3   : > { %v405_v48 = vsel %vm6723_vm3, %v3980_v2, %v4084_v54  ;;  %v406_v56 = vsel %vm6723_vm3, %v4084_v54, %v6737_v21  ;;  %v361_v41 = vsel %vm6724_vm2, %v3975_v18, %v4079_v20  ;;  %1800 = vmatprep.subr.bf16.mxu0 %v4244_v39  ;;  %vm1040_vm3 = vcmask 318464  }
  0xd4   : > { %422 = vst [vmem:[#allocation2 + $0xe0] sm:$0xff] %v406_v56  ;;  %v4821_v22 = vpop.permute.xlu1 %1026  ;;  %v1025_v7 = vpop.permute.xlu0 %1024  ;;  %v1648_v2 = vpack.c.bf16 %v405_v48, %v361_v41  ;;  %1801 = vmatpush1.bf16.msra.mxu0 %v4245_v11  ;;  %vm6763_vm2 = vcmask 310272  }
  0xd5   : > { %v1035_v17 = vrot.slane %v4821_v22, 4  ;;  %v1034_v60 = vrot.slane %v1025_v7, 4 }
  0xd6   : > { %4197 = vrot.lane.b32.xlu1 %v4196_v38, %s4302_s27  ;;  %1074 = vrot.lane.b32.xlu0 %v4525_v37, %s6779_s17 }
  0xd7   : > { %v1039_v19 = vsel %vm6783_vm13, %v1034_v60, %v1035_v17  ;;  %1827 = vmatprep.subr.bf16.mxu1 %v1648_v2 }
  0xd8   : > { %v4833_v29 = vpop.permute.xlu1 %1070  ;;  %v1069_v34 = vpop.permute.xlu0 %1068  ;;  %1828 = vmatpush1.bf16.msra.mxu1 %v1647_v45  ;;  %v1041_v18 = vsel %vm1040_vm3, %v1039_v19, %v4821_v22 }
  0xd9   : > { %v1079_v16 = vrot.slane %v4833_v29, 4  ;;  %v1078_v54 = vrot.slane %v1069_v34, 4 }
  0xda   : > { %1162 = vrot.lane.b32.xlu1 %v4525_v37, %s6775_s21  ;;  %1118 = vrot.lane.b32.xlu0 %v4525_v37, %s6777_s20 }
  0xdb   : > { %v1083_v25 = vsel %vm6783_vm13, %v1078_v54, %v1079_v16 }
  0xdc   : > { %v1085_v38 = vsel %vm6763_vm2, %v1083_v25, %v4833_v29  ;;  %v4847_v48 = vpop.permute.xlu1 %4092  ;;  %v4849_v56 = vpop.permute.xlu0 %4087 }
  0xdd   : > { %v6727_v39 = vunpack.i.h.bf16 %v4847_v48  ;;  %v4094_v11 = vunpack.i.l.bf16 %v4847_v48  ;;  %v6728_v41 = vunpack.i.h.bf16 %v4849_v56  ;;  %v4089_v7 = vunpack.i.l.bf16 %v4849_v56 }
  0xde   : > { %485 = vrot.lane.b32.xlu1 %v4790_v5, %s6784_s11  ;;  %442 = vrot.lane.b32.xlu0 %v4790_v5, %s4303_s28  ;;  %v4246_v2 = vcombine.high %v1041_v18, %v1085_v38  ;;  %v4247_v45 = vcombine.low %v1041_v18, %v1085_v38 }
  0xdf   : > { %v491_v14 = vsel %vm6725_vm6, %v4000_v10, %v4094_v11  ;;  %v4865_v60 = vsel %vm6725_vm6, %v4094_v11, %v6727_v39  ;;  %v448_v19 = vsel %vm6726_vm5, %v3995_v3, %v4089_v7  ;;  %v4873_v34 = vsel %vm6726_vm5, %v4089_v7, %v6728_v41 }
  0xe0   : > { %v4875_v54 = vpop.permute.xlu1 %1114  ;;  %v1113_v8 = vpop.permute.xlu0 %1112  ;;  %1802 = vmatprep.subr.bf16.mxu0 %v4246_v2  ;;  %v1656_v11 = vpack.c.bf16 %v491_v14, %v448_v19  ;;  %vm6772_vm6 = vcmask 302080   ;;  %vm1172_vm5 = vcmask 236544  }
  0xe1   : > { %v6736_v10 = vrot.slane %v4875_v54, 4  ;;  %v1122_v25 = vrot.slane %v1113_v8, 4  ;;  %1803 = vmatpush1.bf16.msra.mxu0 %v4247_v45 }
  0xe2   : > { %1250 = vrot.lane.b32.xlu1 %v4525_v37, %s6785_s12  ;;  %1206 = vrot.lane.b32.xlu0 %v4525_v37, %s6773_s22 }
  0xe3   : > { %v1127_v59 = vsel %vm6783_vm13, %v1122_v25, %v6736_v10  ;;  %1829 = vmatprep.subr.bf16.mxu1 %v1656_v11  ;;  %v6793_v10 = vunpack.i.h.bf16 %v4632_v58 }
  0xe4   : > { %v4887_v3 = vpop.permute.xlu1 %1158  ;;  %v1157_v38 = vpop.permute.xlu0 %1156  ;;  %1830 = vmatpush1.bf16.msra.mxu1 %v1655_v31  ;;  %v1129_v7 = vsel %vm6772_vm6, %v1127_v59, %v4875_v54 }
  0xe5   : > { %v6729_v14 = vrot.slane %v4887_v3, 4  ;;  %v1166_v2 = vrot.slane %v1157_v38, 4 }
  0xe6   : > { %571 = vrot.lane.b32.xlu1 %v4790_v5, %s6786_s26  ;;  %528 = vrot.lane.b32.xlu0 %v4790_v5, %s4305_s30 }
  0xe7   : > { %v1171_v45 = vsel %vm6783_vm13, %v1166_v2, %v6729_v14 }
  0xe8   : > { %v1173_v13 = vsel %vm1172_vm5, %v1171_v45, %v4887_v3  ;;  %v4904_v24 = vpop.permute.xlu1 %4102  ;;  %v4906_v31 = vpop.permute.xlu0 %4097 }
  0xe9   : > { %v6732_v19 = vunpack.i.h.bf16 %v4904_v24  ;;  %v4104_v8 = vunpack.i.l.bf16 %v4904_v24  ;;  %v6733_v25 = vunpack.i.h.bf16 %v4906_v31  ;;  %v4099_v11 = vunpack.i.l.bf16 %v4906_v31 }
  0xea   : > { %1338 = vrot.lane.b32.xlu1 %v4525_v37, %s6748_s29  ;;  %1294 = vrot.lane.b32.xlu0 %v4525_v37, %s6760_s6  ;;  %v4248_v2 = vcombine.high %v1129_v7, %v1173_v13  ;;  %v4249_v45 = vcombine.low %v1129_v7, %v1173_v13 }
  0xeb   : > { %v577_v59 = vsel %vm6730_vm8, %v4020_v46, %v4104_v8  ;;  %v4922_v38 = vsel %vm6730_vm8, %v4104_v8, %v6732_v19  ;;  %v534_v18 = vsel %vm6731_vm7, %v4015_v35, %v4099_v11  ;;  %v4930_v39 = vsel %vm6731_vm7, %v4099_v11, %v6733_v25 }
  0xec   : > { %v4932_v41 = vpop.permute.xlu1 %1202  ;;  %v1201_v44 = vpop.permute.xlu0 %1200  ;;  %1804 = vmatprep.subr.bf16.mxu0 %v4248_v2  ;;  %v1664_v8 = vpack.c.bf16 %v577_v59, %v534_v18  ;;  %vm1216_vm8 = vcmask 228352   ;;  %v6790_v18 = vpack.c.bf16 %v4630_v57, %v4620_v50  ;;  %vm6739_vm7 = vcmask 220160  }
  0xed   : > { %v6735_v46 = vrot.slane %v4932_v41, 4  ;;  %v1210_v14 = vrot.slane %v1201_v44, 4  ;;  %1805 = vmatpush1.bf16.msra.mxu0 %v4249_v45  ;;  %v822_v50 = vrot.slane %v4777_v32, 4 }
  0xee   : > { %657 = vrot.lane.b32.xlu1 %v4790_v5, %s4308_s8  ;;  %614 = vrot.lane.b32.xlu0 %v4790_v5, %s4307_s7 }
  0xef   : > { %v1215_v26 = vsel %vm6783_vm13, %v1210_v14, %v6735_v46  ;;  %1831 = vmatprep.subr.bf16.mxu1 %v1664_v8  ;;  %v6738_v8 = vrot.slane %v4525_v37, 4 }
  0xf0   : > { %v4944_v35 = vpop.permute.xlu1 %1246  ;;  %v1245_v13 = vpop.permute.xlu0 %1244  ;;  %1832 = vmatpush1.bf16.msra.mxu1 %v6790_v18  ;;  %v1217_v11 = vsel %vm1216_vm8, %v1215_v26, %v4932_v41 }
  0xf1   : > { %v6734_v59 = vrot.slane %v4944_v35, 4  ;;  %v1254_v2 = vrot.slane %v1245_v13, 4 }
  0xf2   : > { %1382 = vrot.lane.b32.xlu0 %v4525_v37, %s6752_s10  ;;  %700 = vrot.lane.b32.xlu1 %v4790_v5, %s6791_s23 }
  0xf3   : > { %v1259_v14 = vsel %vm6783_vm13, %v1254_v2, %v6734_v59  ;;  %v4978_v2 = vsel %vm6783_vm13, %v6738_v8, %v822_v50 }
  0xf4   : > { %v1261_v57 = vsel %vm6739_vm7, %v1259_v14, %v4944_v35  ;;  %v4962_v45 = vpop.permute.xlu1 %4112  ;;  %v4964_v44 = vpop.permute.xlu0 %4107  ;;  %v6792_v14 = vunpack.i.h.bf16 %v4644_v12  ;;  %vm299_vm7 = vcmask 850944  }
  0xf5   : > { %v6740_v26 = vunpack.i.h.bf16 %v4962_v45  ;;  %v4114_v13 = vunpack.i.l.bf16 %v4962_v45  ;;  %v6743_v18 = vunpack.i.h.bf16 %v4964_v44  ;;  %v4109_v7 = vunpack.i.l.bf16 %v4964_v44 }
  0xf6   : > { %856 = vrot.lane.b32.xlu1 %v4777_v32, %s6789_s9  ;;  %743 = vrot.lane.b32.xlu0 %v4790_v5, %s6787_s25  ;;  %v4250_v59 = vcombine.high %v1217_v11, %v1261_v57  ;;  %v4251_v46 = vcombine.low %v1217_v11, %v1261_v57 }
  0xf7   : > { %v663_v19 = vsel %vm6741_vm10, %v6792_v14, %v4114_v13  ;;  %v4986_v25 = vsel %vm6741_vm10, %v4114_v13, %v6740_v26  ;;  %v620_v21 = vsel %vm6742_vm9, %v6793_v10, %v4109_v7  ;;  %v4994_v50 = vsel %vm6742_vm9, %v4109_v7, %v6743_v18 }
  0xf8   : > { %v4996_v8 = vpop.permute.xlu1 %1290  ;;  %v1289_v12 = vpop.permute.xlu0 %1288  ;;  %v839_v14 = vunpack.c.h.bf16 %v4978_v2  ;;  %1806 = vmatprep.subr.bf16.mxu0 %v4250_v59  ;;  %v1672_v11 = vpack.c.bf16 %v663_v19, %v620_v21  ;;  %vm1304_vm10 = vcmask 154624   ;;  %v6794_v19 = vpack.c.bf16 %v4662_v40, %v4652_v28 }
  0xf9   : > { %v1299_v13 = vrot.slane %v4996_v8, 4  ;;  %v1298_v26 = vrot.slane %v1289_v12, 4  ;;  %1807 = vmatpush1.bf16.msra.mxu0 %v4251_v46  ;;  %vm6745_vm9 = vcmask 146432  }
  0xfa   : > { %786 = vrot.lane.b32.xlu1 %v4790_v5, %s4313_s13  ;;  %847 = vst.msk [vmem:[#allocation2 + $0x378] sm:$0xff] %vm299_vm7, %v839_v14  ;;  %1833 = vmatprep.subr.bf16.mxu1 %v1672_v11  ;;  %v6795_v11 = vunpack.i.h.bf16 %v4676_v4 }
  0xfb   : > { %v1303_v10 = vsel %vm6783_vm13, %v1298_v26, %v1299_v13  ;;  %900 = vrot.lane.b32.xlu0 %v4777_v32, %s6788_s24  ;;  %1834 = vmatpush1.bf16.msra.mxu1 %v6794_v19 }
  0xfc   : > { %v5010_v7 = vpop.permute.xlu1 %1334  ;;  %v1333_v21 = vpop.permute.xlu0 %1332  ;;  %v1305_v5 = vsel %vm1304_vm10, %v1303_v10, %v4996_v8  ;;  %v6825_v8 = vpack.c.bf16 %v4922_v38, %v4930_v39 }
  0xfd   : > { %v6744_v46 = vrot.slane %v5010_v7, 4  ;;  %v1342_v59 = vrot.slane %v1333_v21, 4 }
  0xfe   : > { %988 = vrot.lane.b32.xlu1 %v4777_v32, %s4316_s15 }
  0xff   : > { %v1347_v57 = vsel %vm6783_vm13, %v1342_v59, %v6744_v46  ;;  %944 = vrot.lane.b32.xlu0 %v4777_v32, %s4315_s14  ;;  %v6796_v59 = vunpack.i.h.bf16 %v4664_v42 }
 0x100   : > { %v1349_v28 = vsel %vm6745_vm9, %v1347_v57, %v5010_v7  ;;  %v5027_v40 = vpop.permute.xlu1 %4122  ;;  %v5029_v26 = vpop.permute.xlu0 %4117  ;;  %vm1392_vm9 = vcmask 138240  }
 0x101   : > { %v4124_v12 = vunpack.i.l.bf16 %v5027_v40  ;;  %v4119_v14 = vunpack.i.l.bf16 %v5029_v26  ;;  %v4252_v21 = vcombine.high %v1305_v5, %v1349_v28  ;;  %v4253_v19 = vcombine.low %v1305_v5, %v1349_v28 }
 0x102   : > { %1076 = vrot.lane.b32.xlu1 %v4777_v32, %s6779_s17  ;;  %v4120_v38 = vunpack.i.h.bf16 %v5029_v26 }
 0x103   : > { %v749_v10 = vsel %vm745_vm12, %v6795_v11, %v4124_v12  ;;  %1032 = vrot.lane.b32.xlu0 %v4777_v32, %s6781_s16  ;;  %v706_v57 = vsel %vm702_vm11, %v6796_v59, %v4119_v14  ;;  %1808 = vmatprep.subr.bf16.mxu0 %v4252_v21  ;;  %v6798_v59 = vrot.slane %v4709_v61, 4 }
 0x104   : > { %v5047_v58 = vpop.permute.xlu1 %1378  ;;  %v1377_v18 = vpop.permute.xlu0 %1376  ;;  %v1680_v11 = vpack.c.bf16 %v749_v10, %v706_v57  ;;  %1809 = vmatpush1.bf16.msra.mxu0 %v4253_v19  ;;  %v6797_v10 = vpack.c.bf16 %v4696_v1, %v4690_v27 }
 0x105   : > { %v1387_v46 = vrot.slane %v5047_v58, 4  ;;  %v1386_v4 = vrot.slane %v1377_v18, 4 }
 0x106   : > { %1164 = vrot.lane.b32.xlu1 %v4777_v32, %s6775_s21  ;;  %1835 = vmatprep.subr.bf16.mxu1 %v1680_v11  ;;  %s6896_s21 = smov 29  }
 0x107   : > { %v1391_v5 = vsel %vm6783_vm13, %v1386_v4, %v1387_v46  ;;  %1120 = vrot.lane.b32.xlu0 %v4777_v32, %s6777_s20  ;;  %1836 = vmatpush1.bf16.msra.mxu1 %v6797_v10  ;;  %v6799_v4 = vrot.slane %v4698_v43, 4  ;;  %v835_v43 = vunpack.c.h.bf16 %v4717_v36 }
 0x108   : > { %v1393_v42 = vsel %vm1392_vm9, %v1391_v5, %v5047_v58  ;;  %v5059_v28 = vpop.permute.xlu1 %896  ;;  %v5061_v18 = vpop.permute.xlu0 %852 }
 0x109   : > { %v6747_v21 = vrot.slane %v5059_v28, 4  ;;  %v6746_v19 = vrot.slane %v5061_v18, 4  ;;  %v4254_v1 = vcombine.high %v1393_v42, %v1393_v42  ;;  %v4255_v11 = vcombine.low %v1393_v42, %v1393_v42 }
 0x10a   : > { %1252 = vrot.lane.b32.xlu1 %v4777_v32, %s6785_s12 }
 0x10b   : > { %v910_v57 = vsel %vm6783_vm13, %v6798_v59, %v6747_v21  ;;  %v866_v27 = vsel %vm6783_vm13, %v6799_v4, %v6746_v19  ;;  %1208 = vrot.lane.b32.xlu0 %v4777_v32, %s6773_s22  ;;  %3878 = vmatprep.subr.msk.bf16.mxu0 %vm6783_vm13, %v4254_v1  ;;  %v1761_v19 = vsel %vm6783_vm13, %v4255_v11, 0  ;;  %v5097_v21 = vcombine.low %v4552_v52, %v4552_v52  ;;  %s6915_s22 = smov 28  }
 0x10c   : > { %v5082_v5 = vpop.permute.xlu1 %940  ;;  %v5084_v10 = vpop.permute.xlu0 %4127  ;;  %v911_v61 = vsel %vm908_vm4, %v910_v57, %v5059_v28  ;;  %v867_v59 = vsel %vm864_vm14, %v866_v27, %v5061_v18  ;;  %1811 = vmatpush1.bf16.msra.mxu0 %v1761_v19 }
 0x10d   : > { %v6751_v4 = vrot.slane %v5082_v5, 4  ;;  %v6755_v42 = vunpack.i.l.bf16 %v5084_v10 }
 0x10e   : > { %1340 = vrot.lane.b32.xlu1 %v4777_v32, %s6748_s29  ;;  %s6800_s29 = smov 111  }
 0x10f   : > { %1296 = vrot.lane.b32.xlu0 %v4777_v32, %s6760_s6  ;;  %v954_v36 = vsel %vm6783_vm13, %v947_v23, %v6751_v4  ;;  %v792_v52 = vsel %vm788_vm15, %v4070_v9, %v6755_v42  ;;  %1817 = vmatmul.mubr.bf16.vlgmr.msra.gmra.mrb[0].mxu0 %v5097_v21  ;;  %v5122_v23 = vld [vmem:[#allocation3] sm:$0xff]  ;;  %v4256_v4 = vcombine.high %v867_v59, %v911_v61  ;;  %s6806_s6 = smov 109  }
 0x110   : > { %v5113_v57 = vpop.permute.xlu1 %4132  ;;  %v5115_v27 = vpop.permute.xlu0 %984  ;;  %v955_v11 = vsel %vm6750_vm0, %v954_v36, %v5082_v5  ;;  %v1688_v63 = vpack.c.bf16 %v835_v43, %v792_v52  ;;  %vm6801_vm0 = vcmask 719872  }
 0x111   : > { %v6757_v19 = vunpack.i.h.bf16 %v5113_v57  ;;  %v6754_v1 = vrot.slane %v5115_v27, 4  ;;  %3883 = vmatprep.mubr.msk.bf16.mxu0 %vm6801_vm0, %v4563_v55  ;;  %v4134_v9 = vunpack.i.l.bf16 %v5113_v57  ;;  %vm6803_vm0 = vcmask 900096  }
 0x112   : > { %2058 = vrot.lane.b32.xlu1 %v5122_v23, %s6800_s29  ;;  %1837 = vmatprep.subr.bf16.mxu1 %v1688_v63  ;;  %v1433_v63 = vld [vmem:[#allocation2 + $0x60] sm:$0xff] }
 0x113   : > { %300 = vst.msk [vmem:[#allocation2 + $0x38] sm:$0xff] %vm299_vm7, %v6757_v19  ;;  %v998_v33 = vsel %vm6783_vm13, %v991_v6, %v6754_v1  ;;  %1384 = vrot.lane.b32.xlu0 %v4777_v32, %s6752_s10  ;;  %1838 = vmatpush1.bf16.msra.mxu1 %v4767_v62  ;;  %s6802_s10 = smov 110  }
 0x114   : > { %v999_v43 = vsel %vm6756_vm1, %v998_v33, %v5115_v27  ;;  %v5141_v36 = vpop.permute.xlu1 %1028  ;;  %v5143_v52 = vpop.permute.xlu0 %4137  ;;  %1839 = vmatprep.subr.bf16.mxu1 %v4256_v4  ;;  %v4257_v33 = vcombine.low %v867_v59, %v911_v61  ;;  %v6804_v59 = vunpack.i.h.bf16 %v4481_v15  ;;  %vm6805_vm1 = vcmask 908288  }
 0x115   : > { %v6758_v53 = vrot.slane %v5141_v36, 4  ;;  %v6759_v6 = vunpack.i.h.bf16 %v5143_v52  ;;  %v6762_v32 = vunpack.i.l.bf16 %v5143_v52  ;;  %v4258_v1 = vcombine.high %v955_v11, %v999_v43 }
 0x116   : > { %2097 = vrot.lane.b32.xlu1 %v5122_v23, %s6802_s10  ;;  %v282_v19 = vsel %vm6805_vm1, %v6804_v59, %v4134_v9  ;;  %vm6807_vm1 = vcmask 891904   ;;  %v6809_v59 = vunpack.i.h.bf16 %v4798_v49 }
 0x117   : > { %340 = vst.msk [vmem:[#allocation2 + $0x78] sm:$0xff] %vm299_vm7, %v6759_v6  ;;  %2218 = vrot.lane.b32.xlu0 %v5122_v23, %s4303_s28  ;;  %v1042_v62 = vsel %vm6783_vm13, %v1035_v17, %v6758_v53  ;;  %v323_v4 = vsel %vm6803_vm0, %v4075_v47, %v6762_v32  ;;  %1840 = vmatpush1.bf16.msra.mxu1 %v4257_v33  ;;  %v1425_v17 = vld [vmem:[#allocation2 + $0x20] sm:$0xff]  ;;  %v4080_v47 = vunpack.i.h.bf16 %v4800_v30  ;;  %vm6808_vm0 = vmmov %vm6807_vm1 }
 0x118   : > { %v5166_v42 = vpop.permute.xlu1 %4142  ;;  %v5168_v61 = vpop.permute.xlu0 %1072  ;;  %1841 = vmatprep.subr.bf16.mxu1 %v4258_v1  ;;  %v1642_v51 = vpack.c.bf16 %v323_v4, %v282_v19  ;;  %v1641_v6 = vpack.c.bf16 %v1433_v63, %v1425_v17  ;;  %v1043_v32 = vsel %vm1040_vm3, %v1042_v62, %v5141_v36  ;;  %v4259_v33 = vcombine.low %v955_v11, %v999_v43  ;;  %v1449_v43 = vld [vmem:[#allocation2 + $0xe0] sm:$0xff] }
 0x119   : > { %v6765_v22 = vunpack.i.h.bf16 %v5166_v42  ;;  %v1080_v53 = vrot.slane %v5168_v61, 4  ;;  %v6764_v15 = vunpack.i.l.bf16 %v5166_v42  ;;  %v362_v29 = vsel %vm6807_vm1, %v4079_v20, %v4080_v47 }
 0x11a   : > { %2136 = vrot.lane.b32.xlu1 %v5122_v23, %s6806_s6  ;;  %1866 = vmatprep.subr.bf16.mxu0 %v1642_v51  ;;  %vm6816_vm1 = vcmask 809984  }
 0x11b   : > { %380 = vst.msk [vmem:[#allocation2 + $0xb8] sm:$0xff] %vm299_vm7, %v6765_v22  ;;  %2302 = vrot.lane.b32.xlu0 %v5122_v23, %s4305_s30  ;;  %v1086_v19 = vsel %vm6783_vm13, %v1079_v16, %v1080_v53  ;;  %1842 = vmatpush1.bf16.msra.mxu1 %v4259_v33  ;;  %v363_v16 = vsel %vm6808_vm0, %v4080_v47, %v6764_v15  ;;  %vm6820_vm0 = vcmask 220160  }
 0x11c   : > { %v5193_v1 = vpop.permute.xlu1 %1116  ;;  %v5195_v63 = vpop.permute.xlu0 %4147  ;;  %v1087_v62 = vsel %vm6763_vm2, %v1086_v19, %v5168_v61  ;;  %1867 = vmatpush1.bf16.msra.mxu0 %v1641_v6  ;;  %vm6810_vm2 = vcmask 826368   ;;  %v6811_v6 = vrot.slane %v4875_v54, 4  ;;  %v1649_v15 = vpack.c.bf16 %v1449_v43, %v362_v29 }
 0x11d   : > { %v1124_v4 = vrot.slane %v5193_v1, 4  ;;  %v6766_v11 = vunpack.i.l.bf16 %v5195_v63  ;;  %v4260_v47 = vcombine.high %v1043_v32, %v1087_v62  ;;  %v4261_v33 = vcombine.low %v1043_v32, %v1087_v62 }
 0x11e   : > { %2260 = vrot.lane.b32.xlu1 %v5122_v23, %s6784_s11  ;;  %v6812_v54 = vrot.slane %v4887_v3, 4  ;;  %v6813_v3 = vunpack.i.h.bf16 %v4849_v56 }
 0x11f   : > { %v407_v17 = vsel %vm6810_vm2, %v6809_v59, %v6766_v11  ;;  %2386 = vrot.lane.b32.xlu0 %v5122_v23, %s4307_s7  ;;  %v1130_v30 = vsel %vm6783_vm13, %v6811_v6, %v1124_v4  ;;  %1843 = vmatprep.subr.bf16.mxu1 %v4260_v47  ;;  %vm6814_vm2 = vcmask 818176   ;;  %v6817_v47 = vrot.slane %v4932_v41, 4 }
 0x120   : > { %v5221_v20 = vpop.permute.xlu1 %4152  ;;  %v5223_v51 = vpop.permute.xlu0 %1160  ;;  %v1650_v19 = vpack.c.bf16 %v407_v17, %v363_v16  ;;  %v1131_v59 = vsel %vm6772_vm6, %v1130_v30, %v5193_v1  ;;  %1844 = vmatpush1.bf16.msra.mxu1 %v4261_v33  ;;  %v6815_v17 = vunpack.i.h.bf16 %v4847_v48  ;;  %v6853_v1 = vunpack.i.l.bf16 %v5195_v63 }
 0x121   : > { %v1168_v49 = vrot.slane %v5223_v51, 4  ;;  %v4154_v22 = vunpack.i.l.bf16 %v5221_v20  ;;  %v4155_v61 = vunpack.i.h.bf16 %v5221_v20 }
 0x122   : > { %1868 = vmatprep.subr.bf16.mxu0 %v1650_v19  ;;  %2344 = vrot.lane.b32.xlu1 %v5122_v23, %s6786_s26 }
 0x123   : > { %1869 = vmatpush1.bf16.msra.mxu0 %v1649_v15  ;;  %v1174_v6 = vsel %vm6783_vm13, %v6812_v54, %v1168_v49  ;;  %2470 = vrot.lane.b32.xlu0 %v5122_v23, %s6791_s23  ;;  %v450_v16 = vsel %vm6814_vm2, %v6813_v3, %v4154_v22  ;;  %vm6822_vm2 = vcmask 744448  }
 0x124   : > { %v5234_v32 = vpop.permute.xlu1 %1204  ;;  %v5236_v62 = vpop.permute.xlu0 %4157  ;;  %v1175_v43 = vsel %vm1172_vm5, %v1174_v6, %v5223_v51 }
 0x125   : > { %v1212_v15 = vrot.slane %v5234_v32, 4  ;;  %v4159_v29 = vunpack.i.l.bf16 %v5236_v62  ;;  %v4262_v6 = vcombine.high %v1131_v59, %v1175_v43  ;;  %v4263_v56 = vcombine.low %v1131_v59, %v1175_v43 }
 0x126   : > { %2428 = vrot.lane.b32.xlu1 %v5122_v23, %s4308_s8  ;;  %v6818_v59 = vpack.c.bf16 %v4865_v60, %v4873_v34  ;;  %v6819_v43 = vrot.slane %v4944_v35, 4  ;;  %v6821_v60 = vunpack.i.h.bf16 %v4906_v31  ;;  %v6823_v35 = vunpack.i.h.bf16 %v4904_v24 }
 0x127   : > { %v493_v30 = vsel %vm6816_vm1, %v6815_v17, %v4159_v29  ;;  %v1218_v33 = vsel %vm6783_vm13, %v6817_v47, %v1212_v15  ;;  %2554 = vrot.lane.b32.xlu0 %v5122_v23, %s4313_s13  ;;  %1845 = vmatprep.subr.bf16.mxu1 %v4262_v6  ;;  %vm6824_vm1 = vcmask 736256  }
 0x128   : > { %v5261_v19 = vpop.permute.xlu1 %4162  ;;  %v5263_v54 = vpop.permute.xlu0 %1248  ;;  %v1658_v11 = vpack.c.bf16 %v493_v30, %v450_v16  ;;  %v1219_v41 = vsel %vm1216_vm8, %v1218_v33, %v5234_v32  ;;  %1846 = vmatpush1.bf16.msra.mxu1 %v4263_v56 }
 0x129   : > { %v1256_v48 = vrot.slane %v5263_v54, 4  ;;  %v6767_v3 = vunpack.i.l.bf16 %v5261_v19 }
 0x12a   : > { %1870 = vmatprep.subr.bf16.mxu0 %v1658_v11  ;;  %2512 = vrot.lane.b32.xlu1 %v5122_v23, %s6787_s25 }
 0x12b   : > { %1871 = vmatpush1.bf16.msra.mxu0 %v6818_v59  ;;  %v1262_v16 = vsel %vm6783_vm13, %v6819_v43, %v1256_v48  ;;  %v536_v34 = vsel %vm6822_vm2, %v6821_v60, %v6767_v3  ;;  %vm6829_vm2 = vcmask 728064  }
 0x12c   : > { %v5281_v17 = vpop.permute.xlu1 %1292  ;;  %v5283_v30 = vpop.permute.xlu0 %4167  ;;  %v1263_v11 = vsel %vm6820_vm0, %v1262_v16, %v5263_v54  ;;  %vm6827_vm0 = vcmask 146432  }
 0x12d   : > { %v6769_v47 = vrot.slane %v5281_v17, 4  ;;  %v4169_v33 = vunpack.i.l.bf16 %v5283_v30  ;;  %v4264_v43 = vcombine.high %v1219_v41, %v1263_v11  ;;  %v4265_v31 = vcombine.low %v1219_v41, %v1263_v11 }
 0x12f   : > { %v579_v6 = vsel %vm6824_vm1, %v6823_v35, %v4169_v33  ;;  %v1306_v56 = vsel %vm6783_vm13, %v1299_v13, %v6769_v47  ;;  %1847 = vmatprep.subr.bf16.mxu1 %v4264_v43  ;;  %v6826_v13 = vrot.slane %v5010_v7, 4  ;;  %v6828_v7 = vunpack.i.h.bf16 %v4964_v44 }
 0x130   : > { %v5306_v59 = vpop.permute.xlu1 %4172  ;;  %v5308_v23 = vpop.permute.xlu0 %1336  ;;  %v1666_v16 = vpack.c.bf16 %v579_v6, %v536_v34  ;;  %v1307_v24 = vsel %vm1304_vm10, %v1306_v56, %v5281_v17  ;;  %1848 = vmatpush1.bf16.msra.mxu1 %v4265_v31  ;;  %v4125_v6 = vunpack.i.h.bf16 %v5027_v40  ;;  %vm6831_vm1 = vcmask 89088  }
 0x131   : > { %v1344_v60 = vrot.slane %v5308_v23, 4  ;;  %v6768_v35 = vunpack.i.l.bf16 %v5306_v59  ;;  %v4175_v20 = vunpack.i.h.bf16 %v5306_v59 }
 0x132   : > { %1872 = vmatprep.subr.bf16.mxu0 %v1666_v16 }
 0x133   : > { %1873 = vmatpush1.bf16.msra.mxu0 %v6825_v8  ;;  %v1350_v41 = vsel %vm6783_vm13, %v6826_v13, %v1344_v60  ;;  %v622_v31 = vsel %vm6829_vm2, %v6828_v7, %v6768_v35  ;;  %v6830_v8 = vunpack.i.h.bf16 %v4962_v45  ;;  %vm6841_vm2 = vcmask 908288  }
 0x134   : > { %v5322_v11 = vpop.permute.xlu1 %1380  ;;  %v5324_v34 = vpop.permute.xlu0 %4177  ;;  %v1351_v56 = vsel %vm6827_vm0, %v1350_v41, %v5308_v23  ;;  %vm6835_vm0 = vcmask 900096  }
 0x135   : > { %v1388_v43 = vrot.slane %v5322_v11, 4  ;;  %v4179_v39 = vunpack.i.l.bf16 %v5324_v34  ;;  %v4266_v7 = vcombine.high %v1307_v24, %v1351_v56  ;;  %v4267_v35 = vcombine.low %v1307_v24, %v1351_v56  ;;  %v1436_v56 = vld [vmem:[#allocation2 + $0x78] sm:$0xff] }
 0x136   : > { %v6832_v24 = vpack.c.bf16 %v4986_v25, %v4994_v50  ;;  %v1428_v25 = vld [vmem:[#allocation2 + $0x38] sm:$0xff]  ;;  %v6833_v50 = vunpack.i.h.bf16 %v5143_v52 }
 0x137   : > { %v1394_v16 = vsel %vm6783_vm13, %v1387_v46, %v1388_v43  ;;  %v665_v13 = vsel %vm6831_vm1, %v6830_v8, %v4179_v39  ;;  %v750_v46 = vsel %vm745_vm12, %v4124_v12, %v4125_v6  ;;  %1849 = vmatprep.subr.bf16.mxu1 %v4266_v7  ;;  %vm6843_vm1 = vcmask 719872  }
 0x138   : > { %v1395_v41 = vsel %vm1392_vm9, %v1394_v16, %v5322_v11  ;;  %v5349_v3 = vpop.permute.xlu1 %4187  ;;  %v5351_v44 = vpop.permute.xlu0 %4182  ;;  %v1674_v47 = vpack.c.bf16 %v665_v13, %v622_v31  ;;  %v707_v16 = vsel %vm702_vm11, %v4119_v14, %v4120_v38  ;;  %1850 = vmatpush1.bf16.msra.mxu1 %v4267_v35  ;;  %v6834_v13 = vunpack.i.l.bf16 %v5143_v52 }
 0x139   : > { %v6771_v58 = vunpack.i.l.bf16 %v5349_v3  ;;  %v6770_v45 = vunpack.i.l.bf16 %v5351_v44  ;;  %v4268_v40 = vcombine.high %v1395_v41, %v1395_v41  ;;  %v4269_v14 = vcombine.low %v1395_v41, %v1395_v41 }
 0x13a   : > { %1874 = vmatprep.subr.bf16.mxu0 %v1674_v47  ;;  %v324_v7 = vsel %vm6835_vm0, %v6834_v13, %v6833_v50  ;;  %v4130_v41 = vunpack.i.h.bf16 %v5084_v10  ;;  %v6842_v50 = vunpack.i.l.bf16 %v5084_v10  ;;  %vm6845_vm0 = vcmask 965632  }
 0x13b   : > { %v751_v8 = vsel %vm745_vm12, %v4125_v6, %v6771_v58  ;;  %1875 = vmatpush1.bf16.msra.mxu0 %v6832_v24  ;;  %v708_v12 = vsel %vm702_vm11, %v4120_v38, %v6770_v45  ;;  %3880 = vmatprep.subr.msk.bf16.mxu1 %vm6783_vm13, %v4268_v40  ;;  %v1767_v38 = vsel %vm6783_vm13, %v4269_v14, 0  ;;  %v1681_v24 = vpack.c.bf16 %v750_v46, %v707_v16 }
 0x13c   : > { %v5370_v47 = vpop.permute.xlu1 %898  ;;  %v5372_v26 = vpop.permute.xlu0 %854  ;;  %v1682_v35 = vpack.c.bf16 %v751_v8, %v708_v12  ;;  %v1644_v45 = vpack.c.bf16 %v1436_v56, %v1428_v25  ;;  %v6836_v58 = vrot.slane %v5059_v28, 4  ;;  %v6837_v8 = vrot.slane %v5061_v18, 4  ;;  %1852 = vmatpush1.bf16.msra.mxu1 %v1767_v38 }
 0x13d   : > { %v905_v31 = vrot.slane %v5370_v47, 4  ;;  %v861_v6 = vrot.slane %v5372_v26, 4  ;;  %v6838_v12 = vrot.slane %v4525_v37, 4  ;;  %v6839_v46 = vrot.slane %v4373_v0, 4 }
 0x13e   : > { %1876 = vmatprep.subr.bf16.mxu0 %v1682_v35  ;;  %v6840_v56 = vunpack.i.h.bf16 %v5113_v57  ;;  %1907 = vmatprep.subr.bf16.mxu1 %v1644_v45  ;;  %v793_v13 = vsel %vm788_vm15, %v6842_v50, %v4130_v41  ;;  %v6844_v45 = vrot.slane %v5082_v5, 4  ;;  %v6846_v5 = vrot.slane %v5115_v27, 4 }
 0x13f   : > { %v912_v40 = vsel %vm6783_vm13, %v6836_v58, %v905_v31  ;;  %v868_v52 = vsel %vm6783_vm13, %v6837_v8, %v861_v6  ;;  %v826_v16 = vsel %vm6783_vm13, %v6839_v46, %v6838_v12  ;;  %1877 = vmatpush1.bf16.msra.mxu0 %v1681_v24  ;;  %1858 = vmatmul.mubr.bf16.vlgmr.msra.gmra.mrb[0].mxu1 %v5097_v21  ;;  %v4150_v27 = vunpack.i.h.bf16 %v5195_v63 }
 0x140   : > { %v283_v28 = vsel %vm6841_vm2, %v4134_v9, %v6840_v56  ;;  %v913_v58 = vsel %vm908_vm4, %v912_v40, %v5370_v47  ;;  %v869_v18 = vsel %vm864_vm14, %v868_v52, %v5372_v26  ;;  %v5408_v14 = vpop.permute.xlu1 %942  ;;  %v5410_v35 = vpop.permute.xlu0 %4192  ;;  %v837_v37 = vunpack.c.h.bf16 %v826_v16  ;;  %3885 = vmatprep.mubr.msk.bf16.mxu1 %vm6843_vm1, %v4563_v55 }
 0x141   : > { %v1643_v0 = vpack.c.bf16 %v324_v7, %v283_v28  ;;  %v949_v25 = vrot.slane %v5408_v14, 4  ;;  %v4194_v57 = vunpack.i.l.bf16 %v5410_v35  ;;  %v836_v9 = vunpack.c.l.bf16 %v826_v16 }
 0x142   : > { %v6847_v16 = vrot.slane %v5141_v36, 4  ;;  %vm6848_vm2 = vcmask 957440   ;;  %vm6849_vm1 = vcmask 826368  }
 0x143   : > { %1908 = vmatpush1.bf16.msra.mxu1 %v1643_v0  ;;  %v956_v7 = vsel %vm6783_vm13, %v6844_v45, %v949_v25  ;;  %v794_v38 = vsel %vm788_vm15, %v4130_v41, %v4194_v57  ;;  %v1689_v12 = vpack.c.bf16 %v836_v9, %v793_v13  ;;  %v4270_v41 = vcombine.high %v869_v18, %v913_v58 }
 0x144   : > { %v5428_v24 = vpop.permute.xlu1 %1030  ;;  %v5430_v40 = vpop.permute.xlu0 %986  ;;  %v1690_v52 = vpack.c.bf16 %v837_v37, %v794_v38  ;;  %v957_v55 = vsel %vm6845_vm0, %v956_v7, %v5408_v14  ;;  %v4271_v13 = vcombine.low %v869_v18, %v913_v58  ;;  %vm6850_vm0 = vcmask 310272  }
 0x145   : > { %v1037_v10 = vrot.slane %v5428_v24, 4  ;;  %v993_v8 = vrot.slane %v5430_v40, 4 }
 0x146   : > { %1878 = vmatprep.subr.bf16.mxu0 %v1690_v52 }
 0x147   : > { %v1000_v46 = vsel %vm6783_vm13, %v6846_v5, %v993_v8  ;;  %v1044_v56 = vsel %vm6783_vm13, %v6847_v16, %v1037_v10  ;;  %1879 = vmatpush1.bf16.msra.mxu0 %v1689_v12  ;;  %v4160_v16 = vunpack.i.h.bf16 %v5236_v62 }
 0x148   : > { %v1001_v28 = vsel %vm6848_vm2, %v1000_v46, %v5430_v40  ;;  %v5448_v0 = vpop.permute.xlu1 %4197  ;;  %v5450_v37 = vpop.permute.xlu0 %1074  ;;  %1880 = vmatprep.subr.bf16.mxu0 %v4270_v41  ;;  %v1045_v36 = vsel %vm1040_vm3, %v1044_v56, %v5428_v24  ;;  %vm6851_vm2 = vcmask 809984  }
 0x149   : > { %v4199_v9 = vunpack.i.l.bf16 %v5448_v0  ;;  %v1081_v50 = vrot.slane %v5450_v37, 4  ;;  %v4272_v45 = vcombine.high %v957_v55, %v1001_v28  ;;  %v4273_v46 = vcombine.low %v957_v55, %v1001_v28 }
 0x14b   : > { %v409_v7 = vsel %vm6849_vm1, %v4150_v27, %v4199_v9  ;;  %v1088_v38 = vsel %vm6783_vm13, %v1080_v53, %v1081_v50  ;;  %1881 = vmatpush1.bf16.msra.mxu0 %v4271_v13  ;;  %vm6852_vm1 = vcmask 818176  }
 0x14c   : > { %v5463_v52 = vpop.permute.xlu1 %1162  ;;  %v5465_v12 = vpop.permute.xlu0 %1118  ;;  %425 = vst.msk [vmem:[#allocation2 + $0xf8] sm:$0xff] %vm299_vm7, %v409_v7  ;;  %v1089_v58 = vsel %vm6850_vm0, %v1088_v38, %v5450_v37  ;;  %1882 = vmatprep.subr.bf16.mxu0 %v4272_v45  ;;  %vm6854_vm0 = vcmask 826368  }
 0x14d   : > { %v1169_v18 = vrot.slane %v5463_v52, 4  ;;  %v1125_v5 = vrot.slane %v5465_v12, 4  ;;  %v4274_v51 = vcombine.high %v1045_v36, %v1089_v58  ;;  %v4275_v13 = vcombine.low %v1045_v36, %v1089_v58 }
 0x14e   : > { %v6855_v58 = vunpack.i.h.bf16 %v5166_v42 }
 0x14f   : > { %v1176_v53 = vsel %vm6783_vm13, %v1168_v49, %v1169_v18  ;;  %v1132_v41 = vsel %vm6783_vm13, %v1124_v4, %v1125_v5  ;;  %1883 = vmatpush1.bf16.msra.mxu0 %v4273_v46  ;;  %v408_v4 = vsel %vm6854_vm0, %v6853_v1, %v4150_v27  ;;  %v1444_v46 = vld [vmem:[#allocation2 + $0xb8] sm:$0xff]  ;;  %v4165_v1 = vunpack.i.h.bf16 %v5261_v19 }
 0x150   : > { %v1177_v56 = vsel %vm1172_vm5, %v1176_v53, %v5463_v52  ;;  %v1133_v55 = vsel %vm6772_vm6, %v1132_v41, %v5465_v12  ;;  %v486_v28 = vpop.permute.xlu1 %485  ;;  %v443_v9 = vpop.permute.xlu0 %442  ;;  %1884 = vmatprep.subr.bf16.mxu0 %v4274_v51  ;;  %v6856_v41 = vunpack.i.l.bf16 %v5166_v42  ;;  %vm6859_vm0 = vcmask 220160  }
 0x151   : > { %v495_v49 = vsel %vm6851_vm2, %v4160_v16, %v486_v28  ;;  %v452_v45 = vsel %vm6852_vm1, %v4155_v61, %v443_v9  ;;  %v4276_v7 = vcombine.high %v1133_v55, %v1177_v56  ;;  %vm6857_vm2 = vcmask 891904  }
 0x152   : > { %511 = vst.msk [vmem:[#allocation2 + $0x178] sm:$0xff] %vm299_vm7, %v495_v49  ;;  %468 = vst.msk [vmem:[#allocation2 + $0x138] sm:$0xff] %vm299_vm7, %v452_v45  ;;  %v364_v63 = vsel %vm6857_vm2, %v6856_v41, %v6855_v58  ;;  %v4277_v49 = vcombine.low %v1133_v55, %v1177_v56  ;;  %vm6858_vm1 = vcmask 809984   ;;  %v4170_v56 = vunpack.i.h.bf16 %v5283_v30 }
 0x153   : > { %v1452_v36 = vld [vmem:[#allocation2 + $0xf8] sm:$0xff]  ;;  %1885 = vmatpush1.bf16.msra.mxu0 %v4275_v13  ;;  %v1651_v51 = vpack.c.bf16 %v408_v4, %v364_v63  ;;  %v494_v45 = vsel %vm6858_vm1, %v4159_v29, %v4160_v16  ;;  %vm6860_vm2 = vcmask 736256   ;;  %vm6861_vm1 = vcmask 744448  }
 0x154   : > { %v5495_v38 = vpop.permute.xlu1 %1250  ;;  %v5497_v53 = vpop.permute.xlu0 %1206  ;;  %v1652_v9 = vpack.c.bf16 %v1452_v36, %v1444_v46  ;;  %1886 = vmatprep.subr.bf16.mxu0 %v4276_v7  ;;  %vm6862_vm6 = vcmask 818176   ;;  %v4185_v30 = vunpack.i.h.bf16 %v5351_v44 }
 0x155   : > { %v1257_v27 = vrot.slane %v5495_v38, 4  ;;  %v1213_v28 = vrot.slane %v5497_v53, 4  ;;  %v451_v4 = vsel %vm6862_vm6, %v4154_v22, %v4155_v61  ;;  %vm6863_vm6 = vmmov %vm6860_vm2 }
 0x156   : > { %1909 = vmatprep.subr.bf16.mxu1 %v1652_v9  ;;  %v1659_v63 = vpack.c.bf16 %v494_v45, %v451_v4  ;;  %v580_v22 = vsel %vm6863_vm6, %v4169_v33, %v4170_v56  ;;  %vm6869_vm6 = vcmask 744448  }
 0x157   : > { %v1264_v42 = vsel %vm6783_vm13, %v1256_v48, %v1257_v27  ;;  %v1220_v13 = vsel %vm6783_vm13, %v1212_v15, %v1213_v28  ;;  %1910 = vmatpush1.bf16.msra.mxu1 %v1651_v51  ;;  %1887 = vmatpush1.bf16.msra.mxu0 %v4277_v49  ;;  %v6864_v49 = vrot.slane %v5281_v17, 4 }
 0x158   : > { %v1265_v62 = vsel %vm6859_vm0, %v1264_v42, %v5495_v38  ;;  %v1221_v29 = vsel %vm1216_vm8, %v1220_v13, %v5497_v53  ;;  %v572_v54 = vpop.permute.xlu1 %571  ;;  %v529_v48 = vpop.permute.xlu0 %528  ;;  %v4180_v42 = vunpack.i.h.bf16 %v5324_v34  ;;  %vm6865_vm0 = vcmask 146432  }
 0x159   : > { %v581_v16 = vsel %vm6860_vm2, %v4170_v56, %v572_v54  ;;  %v538_v32 = vsel %vm6861_vm1, %v4165_v1, %v529_v48  ;;  %v1460_v15 = vld [vmem:[#allocation2 + $0x138] sm:$0xff]  ;;  %v4278_v46 = vcombine.high %v1221_v29, %v1265_v62  ;;  %v4279_v36 = vcombine.low %v1221_v29, %v1265_v62 }
 0x15a   : > { %v1468_v55 = vld [vmem:[#allocation2 + $0x178] sm:$0xff]  ;;  %597 = vst.msk [vmem:[#allocation2 + $0x1f8] sm:$0xff] %vm299_vm7, %v581_v16  ;;  %554 = vst.msk [vmem:[#allocation2 + $0x1b8] sm:$0xff] %vm299_vm7, %v538_v32  ;;  %vm6866_vm2 = vcmask 89088   ;;  %vm6867_vm1 = vcmask 728064   ;;  %v6868_v54 = vunpack.i.l.bf16 %v5261_v19 }
 0x15b   : > { %v1660_v7 = vpack.c.bf16 %v1468_v55, %v1460_v15  ;;  %1888 = vmatprep.subr.bf16.mxu0 %v4278_v46  ;;  %v4190_v46 = vunpack.i.h.bf16 %v5349_v3 }
 0x15c   : > { %v5532_v58 = vpop.permute.xlu1 %1338  ;;  %v5534_v41 = vpop.permute.xlu0 %1294  ;;  %1889 = vmatpush1.bf16.msra.mxu0 %v4279_v36  ;;  %v537_v48 = vsel %vm6869_vm6, %v6868_v54, %v4165_v1  ;;  %vm6876_vm6 = vcmask 965632  }
 0x15d   : > { %v1345_v9 = vrot.slane %v5532_v58, 4  ;;  %v1301_v51 = vrot.slane %v5534_v41, 4  ;;  %1911 = vmatprep.subr.bf16.mxu1 %v1660_v7  ;;  %v1667_v4 = vpack.c.bf16 %v580_v22, %v537_v48  ;;  %v4195_v22 = vunpack.i.h.bf16 %v5410_v35 }
 0x15e   : > { %1912 = vmatpush1.bf16.msra.mxu1 %v1659_v63 }
 0x15f   : > { %v1352_v61 = vsel %vm6783_vm13, %v1344_v60, %v1345_v9  ;;  %v1308_v45 = vsel %vm6783_vm13, %v6864_v49, %v1301_v51 }
 0x160   : > { %v1353_v33 = vsel %vm6865_vm0, %v1352_v61, %v5532_v58  ;;  %v1309_v13 = vsel %vm1304_vm10, %v1308_v45, %v5534_v41  ;;  %v658_v56 = vpop.permute.xlu1 %657  ;;  %v615_v23 = vpop.permute.xlu0 %614  ;;  %vm6870_vm0 = vmmov %vm6866_vm2 }
 0x161   : > { %v667_v60 = vsel %vm6866_vm2, %v4180_v42, %v658_v56  ;;  %v624_v62 = vsel %vm6867_vm1, %v4175_v20, %v615_v23  ;;  %v1476_v29 = vld [vmem:[#allocation2 + $0x1b8] sm:$0xff]  ;;  %v4280_v32 = vcombine.high %v1309_v13, %v1353_v33  ;;  %v4281_v15 = vcombine.low %v1309_v13, %v1353_v33  ;;  %vm6872_vm2 = vmmov %vm6867_vm1 }
 0x162   : > { %v1484_v17 = vld [vmem:[#allocation2 + $0x1f8] sm:$0xff]  ;;  %683 = vst.msk [vmem:[#allocation2 + $0x278] sm:$0xff] %vm299_vm7, %v667_v60  ;;  %640 = vst.msk [vmem:[#allocation2 + $0x238] sm:$0xff] %vm299_vm7, %v624_v62  ;;  %v666_v63 = vsel %vm6870_vm0, %v4179_v39, %v4180_v42  ;;  %v6871_v56 = vunpack.i.l.bf16 %v5306_v59  ;;  %vm6875_vm1 = vcmask 957440   ;;  %vm6877_vm0 = vcmask 310272  }
 0x163   : > { %v1668_v16 = vpack.c.bf16 %v1484_v17, %v1476_v29  ;;  %1890 = vmatprep.subr.bf16.mxu0 %v4280_v32 }
 0x164   : > { %v5565_v55 = vpop.permute.xlu0 %1382  ;;  %v701_v7 = vpop.permute.xlu1 %700  ;;  %1891 = vmatpush1.bf16.msra.mxu0 %v4281_v15  ;;  %v623_v11 = vsel %vm6872_vm2, %v6871_v56, %v4175_v20  ;;  %vm6878_vm2 = vcmask 302080  }
 0x165   : > { %v1389_v36 = vrot.slane %v5565_v55, 4  ;;  %1913 = vmatprep.subr.bf16.mxu1 %v1668_v16  ;;  %v710_v19 = vsel %vm702_vm11, %v4185_v30, %v701_v7  ;;  %v1675_v62 = vpack.c.bf16 %v666_v63, %v623_v11  ;;  %v6873_v16 = vunpack.i.l.bf16 %v5349_v3 }
 0x166   : > { %1914 = vmatpush1.bf16.msra.mxu1 %v1667_v4  ;;  %726 = vst.msk [vmem:[#allocation2 + $0x2b8] sm:$0xff] %vm299_vm7, %v710_v19 }
 0x167   : > { %v1396_v1 = vsel %vm6783_vm13, %v1388_v43, %v1389_v36  ;;  %v752_v26 = vsel %vm745_vm12, %v6873_v16, %v4190_v46 }
 0x168   : > { %v1397_v61 = vsel %vm1392_vm9, %v1396_v1, %v5565_v55  ;;  %v857_v49 = vpop.permute.xlu1 %856  ;;  %v744_v45 = vpop.permute.xlu0 %743 }
 0x169   : > { %v862_v33 = vrot.slane %v857_v49, 4  ;;  %v753_v13 = vsel %vm745_vm12, %v4190_v46, %v744_v45  ;;  %v1492_v23 = vld [vmem:[#allocation2 + $0x238] sm:$0xff]  ;;  %v4282_v39 = vcombine.high %v1397_v61, %v1397_v61  ;;  %v4283_v42 = vcombine.low %v1397_v61, %v1397_v61 }
 0x16a   : > { %v1500_v43 = vld [vmem:[#allocation2 + $0x278] sm:$0xff]  ;;  %769 = vst.msk [vmem:[#allocation2 + $0x2f8] sm:$0xff] %vm299_vm7, %v753_v13  ;;  %v795_v61 = vsel %vm788_vm15, %v4194_v57, %v4195_v22 }
 0x16b   : > { %v1676_v34 = vpack.c.bf16 %v1500_v43, %v1492_v23  ;;  %v870_v60 = vsel %vm6783_vm13, %v861_v6, %v862_v33  ;;  %3882 = vmatprep.subr.msk.bf16.mxu0 %vm6783_vm13, %v4282_v39  ;;  %v1773_v59 = vsel %vm6783_vm13, %v4283_v42, 0  ;;  %v6874_v6 = vunpack.i.l.bf16 %v5351_v44  ;;  %v1532_v33 = vld [vmem:[#allocation2 + $0x378] sm:$0xff] }
 0x16c   : > { %v5591_v29 = vsel %vm864_vm14, %v870_v60, %v857_v49  ;;  %v787_v17 = vpop.permute.xlu1 %786  ;;  %1893 = vmatpush1.bf16.msra.mxu0 %v1773_v59 }
 0x16d   : > { %1915 = vmatprep.subr.bf16.mxu1 %v1676_v34  ;;  %v883_v20 = vunpack.c.h.bf16 %v5591_v29  ;;  %v796_v54 = vsel %vm788_vm15, %v4195_v22, %v787_v17  ;;  %v901_v48 = vpop.permute.xlu0 %900  ;;  %v709_v32 = vsel %vm702_vm11, %v6874_v6, %v4185_v30  ;;  %v1508_v4 = vld [vmem:[#allocation2 + $0x2b8] sm:$0xff]  ;;  %v838_v30 = vunpack.c.l.bf16 %v4978_v2 }
 0x16e   : > { %1916 = vmatpush1.bf16.msra.mxu1 %v1675_v62  ;;  %812 = vst.msk [vmem:[#allocation2 + $0x338] sm:$0xff] %vm299_vm7, %v796_v54  ;;  %v906_v15 = vrot.slane %v901_v48, 4  ;;  %v1683_v63 = vpack.c.bf16 %v752_v26, %v709_v32 }
 0x16f   : > { %891 = vst.msk [vmem:[#allocation2 + $0x3b8] sm:$0xff] %vm299_vm7, %v883_v20  ;;  %1899 = vmatmul.mubr.bf16.vlgmr.msra.gmra.mrb[4].mxu0 %v5097_v21  ;;  %v1691_v11 = vpack.c.bf16 %v838_v30, %v795_v61 }
 0x170   : > { %v914_v7 = vsel %vm6783_vm13, %v905_v31, %v906_v15  ;;  %v989_v19 = vpop.permute.xlu1 %988 }
 0x171   : > { %v915_v3 = vsel %vm908_vm4, %v914_v7, %v901_v48  ;;  %v994_v46 = vrot.slane %v989_v19, 4  ;;  %v945_v1 = vpop.permute.xlu0 %944  ;;  %v1516_v44 = vld [vmem:[#allocation2 + $0x2f8] sm:$0xff] }
 0x172   : > { %v927_v49 = vunpack.c.h.bf16 %v915_v3  ;;  %v950_v45 = vrot.slane %v945_v1, 4  ;;  %v1684_v47 = vpack.c.bf16 %v1516_v44, %v1508_v4 }
 0x173   : > { %v1002_v31 = vsel %vm6783_vm13, %v993_v8, %v994_v46 }
 0x174   : > { %935 = vst.msk [vmem:[#allocation2 + $0x3f8] sm:$0xff] %vm299_vm7, %v927_v49  ;;  %v5619_v13 = vsel %vm6875_vm1, %v1002_v31, %v989_v19  ;;  %v958_v2 = vsel %vm6783_vm13, %v949_v25, %v950_v45  ;;  %v1077_v35 = vpop.permute.xlu1 %1076  ;;  %1917 = vmatprep.subr.bf16.mxu1 %v1684_v47  ;;  %vm6879_vm1 = vcmask 220160  }
 0x175   : > { %v1015_v57 = vunpack.c.h.bf16 %v5619_v13  ;;  %v959_v22 = vsel %vm6876_vm6, %v958_v2, %v945_v1  ;;  %v1082_v56 = vrot.slane %v1077_v35, 4  ;;  %v1033_v40 = vpop.permute.xlu0 %1032  ;;  %1918 = vmatpush1.bf16.msra.mxu1 %v1683_v63  ;;  %v1524_v8 = vld [vmem:[#allocation2 + $0x338] sm:$0xff]  ;;  %vm6880_vm6 = vcmask 146432  }
 0x176   : > { %v971_v23 = vunpack.c.h.bf16 %v959_v22  ;;  %v1038_v43 = vrot.slane %v1033_v40, 4  ;;  %v1692_v34 = vpack.c.bf16 %v1532_v33, %v1524_v8  ;;  %v1540_v59 = vld [vmem:[#allocation2 + $0x3b8] sm:$0xff] }
 0x177   : > { %1023 = vst.msk [vmem:[#allocation2 + $0x478] sm:$0xff] %vm299_vm7, %v1015_v57  ;;  %v1090_v14 = vsel %vm6783_vm13, %v1081_v50, %v1082_v56 }
 0x178   : > { %979 = vst.msk [vmem:[#allocation2 + $0x438] sm:$0xff] %vm299_vm7, %v971_v23  ;;  %v5632_v25 = vsel %vm6877_vm0, %v1090_v14, %v1077_v35  ;;  %v1046_v39 = vsel %vm6783_vm13, %v1037_v10, %v1038_v43  ;;  %1919 = vmatprep.subr.bf16.mxu1 %v1692_v34  ;;  %v1165_v42 = vpop.permute.xlu1 %1164  ;;  %v4284_v10 = vcombine.low %v5591_v29, %v915_v3 }
 0x179   : > { %v1103_v60 = vunpack.c.h.bf16 %v5632_v25  ;;  %v1047_v62 = vsel %vm1040_vm3, %v1046_v39, %v1033_v40  ;;  %1920 = vmatpush1.bf16.msra.mxu1 %v1691_v11  ;;  %v1170_v17 = vrot.slane %v1165_v42, 4  ;;  %v1121_v37 = vpop.permute.xlu0 %1120  ;;  %v4285_v3 = vcombine.low %v959_v22, %v5619_v13 }
 0x17a   : > { %v1059_v50 = vunpack.c.h.bf16 %v1047_v62  ;;  %v1126_v20 = vrot.slane %v1121_v37, 4  ;;  %v4286_v31 = vcombine.low %v1047_v62, %v5632_v25 }
 0x17b   : > { %1111 = vst.msk [vmem:[#allocation2 + $0x4f8] sm:$0xff] %vm299_vm7, %v1103_v60  ;;  %v1178_v24 = vsel %vm6783_vm13, %v1169_v18, %v1170_v17  ;;  %v1548_v54 = vld [vmem:[#allocation2 + $0x3f8] sm:$0xff] }
 0x17c   : > { %1067 = vst.msk [vmem:[#allocation2 + $0x4b8] sm:$0xff] %vm299_vm7, %v1059_v50  ;;  %v1179_v48 = vsel %vm1172_vm5, %v1178_v24, %v1165_v42  ;;  %v1134_v16 = vsel %vm6783_vm13, %v1125_v5, %v1126_v20  ;;  %v1700_v26 = vpack.c.bf16 %v1548_v54, %v1540_v59  ;;  %v1253_v6 = vpop.permute.xlu1 %1252  ;;  %v5688_v20 = vld [vmem:[%s6689_s3] sm:$0xff] }
 0x17d   : > { %v1191_v32 = vunpack.c.h.bf16 %v1179_v48  ;;  %v1135_v15 = vsel %vm6878_vm2, %v1134_v16, %v1121_v37  ;;  %v1258_v4 = vrot.slane %v1253_v6, 4  ;;  %v1209_v52 = vpop.permute.xlu0 %1208  ;;  %v1974_v37 = vlaneseq }
 0x17e   : > { %v1147_v7 = vunpack.c.h.bf16 %v1135_v15  ;;  %1921 = vmatprep.subr.bf16.mxu1 %v1700_v26  ;;  %v1564_v18 = vld [vmem:[#allocation2 + $0x478] sm:$0xff]  ;;  %v1214_v19 = vrot.slane %v1209_v52, 4 }
 0x17f   : > { %1199 = vst.msk [vmem:[#allocation2 + $0x578] sm:$0xff] %vm299_vm7, %v1191_v32  ;;  %1922 = vmatpush1.bf16.msra.mxu1 %v4284_v10  ;;  %v1556_v29 = vld [vmem:[#allocation2 + $0x438] sm:$0xff]  ;;  %v1266_v12 = vsel %vm6783_vm13, %v1257_v27, %v1258_v4  ;;  %v5682_v59 = vshrl.u32 %v1974_v37, 7 }
 0x180   : > { %1155 = vst.msk [vmem:[#allocation2 + $0x538] sm:$0xff] %vm299_vm7, %v1147_v7  ;;  %v1708_v5 = vpack.c.bf16 %v1564_v18, %v1556_v29  ;;  %v1267_v46 = vsel %vm6879_vm1, %v1266_v12, %v1253_v6  ;;  %v1222_v1 = vsel %vm6783_vm13, %v1213_v28, %v1214_v19  ;;  %v1341_v44 = vpop.permute.xlu1 %1340 }
 0x181   : > { %v1279_v63 = vunpack.c.h.bf16 %v1267_v46  ;;  %v1223_v30 = vsel %vm1216_vm8, %v1222_v1, %v1209_v52  ;;  %v1346_v61 = vrot.slane %v1341_v44, 4  ;;  %v1297_v49 = vpop.permute.xlu0 %1296  ;;  %v1976_v50 = vsub.s32 0, %v5682_v59 }
 0x182   : > { %1923 = vmatprep.subr.bf16.mxu1 %v1708_v5  ;;  %v1235_v45 = vunpack.c.h.bf16 %v1223_v30  ;;  %v1580_v38 = vld [vmem:[#allocation2 + $0x4f8] sm:$0xff]  ;;  %v1302_v47 = vrot.slane %v1297_v49, 4  ;;  %v4288_v34 = vcombine.low %v1223_v30, %v1267_v46  ;;  %v1980_v24 = vsub.s32 1, %v5682_v59 }
 0x183   : > { %1924 = vmatpush1.bf16.msra.mxu1 %v4285_v3  ;;  %1287 = vst.msk [vmem:[#allocation2 + $0x5f8] sm:$0xff] %vm299_vm7, %v1279_v63  ;;  %v1572_v27 = vld [vmem:[#allocation2 + $0x4b8] sm:$0xff]  ;;  %v1354_v53 = vsel %vm6783_vm13, %v1345_v9, %v1346_v61  ;;  %v4287_v9 = vcombine.low %v1135_v15, %v1179_v48  ;;  %v1977_v10 = vrot.slane %v5688_v20, %v1976_v50  ;;  %v1984_v18 = vsub.s32 2, %v5682_v59 }
 0x184   : > { %1243 = vst.msk [vmem:[#allocation2 + $0x5b8] sm:$0xff] %vm299_vm7, %v1235_v45  ;;  %v1716_v28 = vpack.c.bf16 %v1580_v38, %v1572_v27  ;;  %v1355_v33 = vsel %vm6880_vm6, %v1354_v53, %v1341_v44  ;;  %v1310_v13 = vsel %vm6783_vm13, %v1301_v51, %v1302_v47  ;;  %v1988_v19 = vsub.s32 3, %v5682_v59  ;;  %v2059_v38 = vpop.permute.xlu1 %2058 }
 0x185   : > { %v1367_v2 = vunpack.c.h.bf16 %v1355_v33  ;;  %v1311_v35 = vsel %vm1304_vm10, %v1310_v13, %v1297_v49  ;;  %v1385_v57 = vpop.permute.xlu0 %1384  ;;  %v1985_v3 = vrot.slane %v5688_v20, %v1984_v18  ;;  %v1992_v53 = vsub.s32 4, %v5682_v59 }
 0x186   : > { %1925 = vmatprep.subr.bf16.mxu1 %v1716_v28  ;;  %v1323_v22 = vunpack.c.h.bf16 %v1311_v35  ;;  %v1596_v56 = vld [vmem:[#allocation2 + $0x578] sm:$0xff]  ;;  %v1390_v40 = vrot.slane %v1385_v57, 4  ;;  %v4289_v42 = vcombine.low %v1311_v35, %v1355_v33  ;;  %v1989_v46 = vrot.slane %v5688_v20, %v1988_v19 }
 0x187   : > { %1926 = vmatpush1.bf16.msra.mxu1 %v4286_v31  ;;  %1375 = vst.msk [vmem:[#allocation2 + $0x678] sm:$0xff] %vm299_vm7, %v1367_v2  ;;  %v1588_v58 = vld [vmem:[#allocation2 + $0x538] sm:$0xff]  ;;  %v1996_v28 = vsub.s32 5, %v5682_v59  ;;  %v1993_v2 = vrot.slane %v5688_v20, %v1992_v53  ;;  %v2004_v37 = vsub.s32 7, %v5682_v59 }
 0x188   : > { %1331 = vst.msk [vmem:[#allocation2 + $0x638] sm:$0xff] %vm299_vm7, %v1323_v22  ;;  %v1724_v8 = vpack.c.bf16 %v1596_v56, %v1588_v58  ;;  %v1398_v41 = vsel %vm6783_vm13, %v1389_v36, %v1390_v40  ;;  %v5743_v47 = vpop.permute.xlu1 %2097 }
 0x189   : > { %v1399_v51 = vsel %vm1392_vm9, %v1398_v41, %v1385_v57  ;;  %v5749_v27 = vpop.permute.xlu0 %2218  ;;  %v1997_v56 = vrot.slane %v5688_v20, %v1996_v28 }
 0x18a   : > { %1927 = vmatprep.subr.bf16.mxu1 %v1724_v8  ;;  %v1411_v11 = vunpack.c.h.bf16 %v1399_v51  ;;  %v1612_v23 = vld [vmem:[#allocation2 + $0x5f8] sm:$0xff]  ;;  %v4290_v55 = vcombine.low %v1399_v51, %v1399_v51 }
 0x18b   : > { %1928 = vmatpush1.bf16.msra.mxu1 %v4287_v9  ;;  %v1604_v43 = vld [vmem:[#allocation2 + $0x5b8] sm:$0xff] }
 0x18c   : > { %1419 = vst.msk [vmem:[#allocation2 + $0x6b8] sm:$0xff] %vm299_vm7, %v1411_v11  ;;  %v1732_v14 = vpack.c.bf16 %v1612_v23, %v1604_v43  ;;  %v1779_v17 = vsel %vm6783_vm13, %v4290_v55, 0  ;;  %v5753_v31 = vpop.permute.xlu1 %2136 }
 0x18d   : > { %v5763_v33 = vpop.permute.xlu0 %2302 }
 0x18e   : > { %1929 = vmatprep.subr.bf16.mxu1 %v1732_v14  ;;  %v1628_v25 = vld [vmem:[#allocation2 + $0x678] sm:$0xff] }
 0x18f   : > { %1930 = vmatpush1.bf16.msra.mxu1 %v4288_v34  ;;  %v1620_v39 = vld [vmem:[#allocation2 + $0x638] sm:$0xff] }
 0x190   : > { %v1740_v60 = vpack.c.bf16 %v1628_v25, %v1620_v39  ;;  %v5766_v35 = vpop.permute.xlu1 %2260 }
 0x191   : > { %v5781_v23 = vpop.permute.xlu0 %2386 }
 0x192   : > { %1931 = vmatprep.subr.bf16.mxu1 %v1740_v60 }
 0x193   : > { %1932 = vmatpush1.bf16.msra.mxu1 %v4289_v42  ;;  %v1636_v36 = vld [vmem:[#allocation2 + $0x6b8] sm:$0xff] }
 0x194   : > { %v1748_v62 = vpack.c.bf16 %v1636_v36, %v1636_v36  ;;  %v5783_v43 = vpop.permute.xlu1 %2344 }
 0x195   : > { %v5793_v34 = vpop.permute.xlu0 %2470 }
 0x196   : > { %3884 = vmatprep.subr.msk.bf16.mxu1 %vm6783_vm13, %v1748_v62 }
 0x197   : > { %1934 = vmatpush1.bf16.msra.mxu1 %v1779_v17  ;;  %v2000_v17 = vsub.s32 6, %v5682_v59 }
 0x198   : > { %v5795_v14 = vpop.permute.xlu1 %2428 }
 0x199   : > { %v5803_v25 = vpop.permute.xlu0 %2554 }
 0x19a   : > { %1940 = vmatmul.mubr.bf16.vlgmr.msra.gmra.mrb[4].mxu1 %v5097_v21  ;;  %v1981_v21 = vrot.slane %v5688_v20, %v1980_v24  ;;  %v2001_v24 = vrot.slane %v5688_v20, %v2000_v17 }
 0x19c   : > { %v5805_v39 = vpop.permute.xlu1 %2512 }
 0x1e2   : > { %v1818_v54 = vpop.f32.mrb[0].mxu0 }
 0x1e3   : > { %vm1948_vm0 = vcmp.ge.f32.partialorder %v1818_v54, 0.0  ;;  %v1956_v48 = vmul.f32 0.01, %v1818_v54  ;;  %v1820_v16 = vpop.f32.mrb[1].mxu0 }
 0x1e4   : > { %vm1949_vm2 = vcmp.ge.f32.partialorder %v1820_v16, 0.0  ;;  %v1957_v26 = vmul.f32 0.01, %v1820_v16  ;;  %v1822_v6 = vpop.f32.mrb[2].mxu0 }
 0x1e5   : > { %v1964_v32 = vsel %vm1948_vm0, %v1818_v54, %v1956_v48  ;;  %v1823_v15 = vpop.f32.mrb[3].mxu0  ;;  %v2005_v48 = vrot.slane %v5688_v20, %v2004_v37 }
 0x1e6   : > { %v5693_v4 = vmul.f32 %v1977_v10, %v1964_v32  ;;  %v1965_v52 = vsel %vm1949_vm2, %v1820_v16, %v1957_v26 }
 0x1e7   : > { %v5695_v7 = vmul.f32 %v1981_v21, %v1965_v52 }
 0x1e8   : > { %2060 = vrot.lane.b32.xlu0 %v5693_v4, %s6800_s29  ;;  %2604 = vrot.lane.b32.xlu1 %v5693_v4, %s6789_s9 }
 0x1ec   : > { %2062 = vrot.lane.b32.xlu1 %v5695_v7, %s6800_s29 }
 0x212   : > { %v1859_v29 = vpop.f32.mrb[0].mxu1 }
 0x213   : > { %vm1950_vm1 = vcmp.ge.f32.partialorder %v1859_v29, 0.0  ;;  %v1958_v12 = vmul.f32 0.01, %v1859_v29  ;;  %v1861_v5 = vpop.f32.mrb[1].mxu1 }
 0x214   : > { %vm1951_vm6 = vcmp.ge.f32.partialorder %v1861_v5, 0.0  ;;  %v1959_v1 = vmul.f32 0.01, %v1861_v5  ;;  %v1863_v44 = vpop.f32.mrb[2].mxu1 }
 0x215   : > { %v1966_v63 = vsel %vm1950_vm1, %v1859_v29, %v1958_v12  ;;  %v1864_v30 = vpop.f32.mrb[3].mxu1  ;;  %vm6881_vm1 = vcmask 908288  }
 0x216   : > { %v5707_v61 = vmul.f32 %v1985_v3, %v1966_v63  ;;  %v1967_v49 = vsel %vm1951_vm6, %v1861_v5, %v1959_v1  ;;  %vm6882_vm6 = vmmov %vm6881_vm1 }
 0x217   : > { %v5709_v45 = vmul.f32 %v1989_v46, %v1967_v49 }
 0x218   : > { %2064 = vrot.lane.b32.xlu0 %v5707_v61, %s6800_s29 }
 0x219   : > { %2066 = vrot.lane.b32.xlu1 %v5709_v45, %s6800_s29 }
 0x21c   : > { %2099 = vrot.lane.b32.xlu0 %v5693_v4, %s6802_s10 }
 0x21d   : > { %2101 = vrot.lane.b32.xlu1 %v5695_v7, %s6802_s10 }
 0x220   : > { %2103 = vrot.lane.b32.xlu0 %v5707_v61, %s6802_s10 }
 0x221   : > { %2105 = vrot.lane.b32.xlu1 %v5709_v45, %s6802_s10 }
 0x224   : > { %2138 = vrot.lane.b32.xlu0 %v5693_v4, %s6806_s6 }
 0x225   : > { %2140 = vrot.lane.b32.xlu1 %v5695_v7, %s6806_s6 }
 0x228   : > { %2142 = vrot.lane.b32.xlu0 %v5707_v61, %s6806_s6 }
 0x229   : > { %2144 = vrot.lane.b32.xlu1 %v5709_v45, %s6806_s6 }
 0x22c   : > { %2178 = vrot.lane.b32.xlu0 %v5693_v4, %s4302_s27 }
 0x22d   : > { %2180 = vrot.lane.b32.xlu1 %v5695_v7, %s4302_s27 }
 0x230   : > { %2182 = vrot.lane.b32.xlu0 %v5707_v61, %s4302_s27 }
 0x231   : > { %2184 = vrot.lane.b32.xlu1 %v5709_v45, %s4302_s27 }
 0x234   : > { %2220 = vrot.lane.b32.xlu0 %v5693_v4, %s4303_s28 }
 0x235   : > { %2222 = vrot.lane.b32.xlu1 %v5695_v7, %s4303_s28 }
 0x238   : > { %2224 = vrot.lane.b32.xlu0 %v5707_v61, %s4303_s28 }
 0x239   : > { %2226 = vrot.lane.b32.xlu1 %v5709_v45, %s4303_s28 }
 0x23c   : > { %2262 = vrot.lane.b32.xlu0 %v5693_v4, %s6784_s11 }
 0x23d   : > { %2264 = vrot.lane.b32.xlu1 %v5695_v7, %s6784_s11 }
 0x240   : > { %2266 = vrot.lane.b32.xlu0 %v5707_v61, %s6784_s11 }
 0x241   : > { %2268 = vrot.lane.b32.xlu1 %v5709_v45, %s6784_s11 }
 0x242   : > { %v1900_v13 = vpop.f32.mrb[4].mxu0 }
 0x243   : > { %vm1952_vm0 = vcmp.ge.f32.partialorder %v1900_v13, 0.0  ;;  %v1960_v57 = vmul.f32 0.01, %v1900_v13  ;;  %v1902_v22 = vpop.f32.mrb[5].mxu0 }
 0x244   : > { %vm1953_vm2 = vcmp.ge.f32.partialorder %v1902_v22, 0.0  ;;  %v1961_v40 = vmul.f32 0.01, %v1902_v22  ;;  %v1904_v58 = vpop.f32.mrb[6].mxu0  ;;  %2304 = vrot.lane.b32.xlu0 %v5693_v4, %s4305_s30 }
 0x245   : > { %v1968_v9 = vsel %vm1952_vm0, %v1900_v13, %v1960_v57  ;;  %v1905_v8 = vpop.f32.mrb[7].mxu0  ;;  %2306 = vrot.lane.b32.xlu1 %v5695_v7, %s4305_s30 }
 0x246   : > { %v5773_v41 = vmul.f32 %v1993_v2, %v1968_v9  ;;  %v1969_v51 = vsel %vm1953_vm2, %v1902_v22, %v1961_v40 }
 0x247   : > { %v5775_v11 = vmul.f32 %v1997_v56, %v1969_v51 }
 0x248   : > { %2036 = vst [vmem:[#allocation3 + $0x28] sm:$0xff] %v5773_v41  ;;  %2600 = vst [vmem:[#allocation2 + $0x360] sm:$0xff] %v5773_v41  ;;  %2308 = vrot.lane.b32.xlu0 %v5707_v61, %s4305_s30 }
 0x249   : > { %2037 = vst [vmem:[#allocation3 + $0x30] sm:$0xff] %v5775_v11  ;;  %2601 = vst [vmem:[#allocation2 + $0x368] sm:$0xff] %v5775_v11  ;;  %2310 = vrot.lane.b32.xlu1 %v5709_v45, %s4305_s30 }
 0x24c   : > { %2346 = vrot.lane.b32.xlu0 %v5693_v4, %s6786_s26 }
 0x24d   : > { %2348 = vrot.lane.b32.xlu1 %v5695_v7, %s6786_s26 }
 0x250   : > { %2350 = vrot.lane.b32.xlu0 %v5707_v61, %s6786_s26 }
 0x251   : > { %2352 = vrot.lane.b32.xlu1 %v5709_v45, %s6786_s26 }
 0x254   : > { %2388 = vrot.lane.b32.xlu0 %v5693_v4, %s4307_s7 }
 0x255   : > { %2390 = vrot.lane.b32.xlu1 %v5695_v7, %s4307_s7 }
 0x258   : > { %2392 = vrot.lane.b32.xlu0 %v5707_v61, %s4307_s7 }
 0x259   : > { %2394 = vrot.lane.b32.xlu1 %v5709_v45, %s4307_s7 }
 0x25a   : > { %v2061_v42 = vpop.permute.xlu0 %2060  ;;  %v5813_v60 = vpop.permute.xlu1 %2604 }
 0x25b   : > { %v5816_v55 = vsel %vm6881_vm1, %v2059_v38, %v2061_v42 }
 0x25c   : > { %2430 = vrot.lane.b32.xlu0 %v5693_v4, %s4308_s8 }
 0x25d   : > { %2432 = vrot.lane.b32.xlu1 %v5695_v7, %s4308_s8 }
 0x25e   : > { %v2063_v36 = vpop.permute.xlu1 %2062 }
 0x25f   : > { %v2075_v62 = vsel %vm6882_vm6, %v2061_v42, %v2063_v36  ;;  %vm6883_vm6 = vmmov %vm6881_vm1 }
 0x260   : > { %2434 = vrot.lane.b32.xlu0 %v5707_v61, %s4308_s8 }
 0x261   : > { %2436 = vrot.lane.b32.xlu1 %v5709_v45, %s4308_s8 }
 0x264   : > { %2472 = vrot.lane.b32.xlu0 %v5693_v4, %s6791_s23 }
 0x265   : > { %2474 = vrot.lane.b32.xlu1 %v5695_v7, %s6791_s23 }
 0x268   : > { %2476 = vrot.lane.b32.xlu0 %v5707_v61, %s6791_s23 }
 0x269   : > { %2478 = vrot.lane.b32.xlu1 %v5709_v45, %s6791_s23 }
 0x26c   : > { %2514 = vrot.lane.b32.xlu0 %v5693_v4, %s6787_s25 }
 0x26d   : > { %v1941_v50 = vpop.f32.mrb[4].mxu1  ;;  %2516 = vrot.lane.b32.xlu1 %v5695_v7, %s6787_s25 }
 0x26e   : > { %vm1954_vm0 = vcmp.ge.f32.partialorder %v1941_v50, 0.0  ;;  %v1962_v54 = vmul.f32 0.01, %v1941_v50  ;;  %v1943_v10 = vpop.f32.mrb[5].mxu1 }
 0x26f   : > { %vm1955_vm2 = vcmp.ge.f32.partialorder %v1943_v10, 0.0  ;;  %v1963_v16 = vmul.f32 0.01, %v1943_v10  ;;  %v1945_v59 = vpop.f32.mrb[6].mxu1 }
 0x270   : > { %v1970_v21 = vsel %vm1954_vm0, %v1941_v50, %v1962_v54  ;;  %v1946_v26 = vpop.f32.mrb[7].mxu1  ;;  %2518 = vrot.lane.b32.xlu0 %v5707_v61, %s6787_s25  ;;  %vm6884_vm0 = vcmask 900096  }
 0x271   : > { %v5843_v6 = vmul.f32 %v2001_v24, %v1970_v21  ;;  %v1971_v32 = vsel %vm1955_vm2, %v1943_v10, %v1963_v16  ;;  %2520 = vrot.lane.b32.xlu1 %v5709_v45, %s6787_s25  ;;  %vm6885_vm2 = vmmov %vm6884_vm0 }
 0x272   : > { %v2021_v15 = vmul.f32 %v2005_v48, %v1971_v32 }
 0x273   : > { %2038 = vst [vmem:[#allocation3 + $0x38] sm:$0xff] %v5843_v6  ;;  %2602 = vst [vmem:[#allocation2 + $0x370] sm:$0xff] %v5843_v6 }
 0x274   : > { %2039 = vst.msk [vmem:[#allocation3 + $0x40] sm:$0xff] %vm299_vm7, %v2021_v15  ;;  %2556 = vrot.lane.b32.xlu0 %v5693_v4, %s4313_s13 }
 0x275   : > { %2558 = vrot.lane.b32.xlu1 %v5695_v7, %s4313_s13 }
 0x278   : > { %2560 = vrot.lane.b32.xlu0 %v5707_v61, %s4313_s13 }
 0x279   : > { %2562 = vrot.lane.b32.xlu1 %v5709_v45, %s4313_s13 }
 0x27b   : > { %v5858_v20 = vld [vmem:[#allocation3 + $0x40] sm:$0xff] }
 0x27c   : > { %2603 = vst.msk [vmem:[#allocation2 + $0x378] sm:$0xff] %vm299_vm7, %v5858_v20  ;;  %2608 = vrot.lane.b32.xlu0 %v5707_v61, %s6789_s9 }
 0x27d   : > { %2606 = vrot.lane.b32.xlu1 %v5695_v7, %s6789_s9 }
 0x280   : > { %2648 = vrot.lane.b32.xlu0 %v5707_v61, %s6788_s24 }
 0x281   : > { %2610 = vrot.lane.b32.xlu1 %v5709_v45, %s6789_s9 }
 0x284   : > { %2644 = vrot.lane.b32.xlu0 %v5693_v4, %s6788_s24 }
 0x285   : > { %2646 = vrot.lane.b32.xlu1 %v5695_v7, %s6788_s24 }
 0x288   : > { %2688 = vrot.lane.b32.xlu0 %v5707_v61, %s4315_s14 }
 0x289   : > { %2650 = vrot.lane.b32.xlu1 %v5709_v45, %s6788_s24 }
 0x28a   : > { %v2065_v52 = vpop.permute.xlu0 %2064 }
 0x28b   : > { %v2076_v18 = vsel %vm6881_vm1, %v2063_v36, %v2065_v52  ;;  %v5881_v19 = vpop.permute.xlu1 %2066  ;;  %vm6886_vm1 = vmmov %vm6884_vm0 }
 0x28c   : > { %v2077_v29 = vsel %vm6883_vm6, %v2065_v52, %v5881_v19  ;;  %2728 = vrot.lane.b32.xlu0 %v5707_v61, %s4316_s15  ;;  %vm6887_vm6 = vmmov %vm6884_vm0 }
 0x28d   : > { %2686 = vrot.lane.b32.xlu1 %v5695_v7, %s4315_s14 }
 0x28e   : > { %v2100_v3 = vpop.permute.xlu0 %2099 }
 0x28f   : > { %v2113_v12 = vsel %vm6884_vm0, %v5743_v47, %v2100_v3  ;;  %v2102_v5 = vpop.permute.xlu1 %2101  ;;  %vm6888_vm0 = vcmask 891904  }
 0x290   : > { %v2114_v46 = vsel %vm6885_vm2, %v2100_v3, %v2102_v5  ;;  %2724 = vrot.lane.b32.xlu0 %v5693_v4, %s4316_s15  ;;  %v3370_v63 = vpack.c.bf16 %v2113_v12, %v5816_v55  ;;  %vm6889_vm2 = vmmov %vm6888_vm0 }
 0x291   : > { %2690 = vrot.lane.b32.xlu1 %v5709_v45, %s4315_s14  ;;  %v3371_v1 = vpack.c.bf16 %v2114_v46, %v2075_v62 }
 0x292   : > { %v2104_v44 = vpop.permute.xlu0 %2103 }
 0x293   : > { %v2115_v30 = vsel %vm6886_vm1, %v2102_v5, %v2104_v44  ;;  %v5898_v49 = vpop.permute.xlu1 %2105  ;;  %3518 = vmatprep.subr.bf16.mxu0 %v3371_v1  ;;  %vm6890_vm1 = vmmov %vm6888_vm0 }
 0x294   : > { %v2116_v38 = vsel %vm6887_vm6, %v2104_v44, %v5898_v49  ;;  %2769 = vrot.lane.b32.xlu0 %v5707_v61, %s6781_s16  ;;  %3519 = vmatpush1.bf16.msra.mxu0 %v3370_v63  ;;  %v3372_v28 = vpack.c.bf16 %v2115_v30, %v2076_v18  ;;  %vm6891_vm6 = vmmov %vm6888_vm0 }
 0x295   : > { %2726 = vrot.lane.b32.xlu1 %v5695_v7, %s4316_s15  ;;  %v3373_v47 = vpack.c.bf16 %v2116_v38, %v2077_v29 }
 0x296   : > { %v2139_v53 = vpop.permute.xlu0 %2138 }
 0x297   : > { %v2152_v13 = vsel %vm6888_vm0, %v5753_v31, %v2139_v53  ;;  %v2141_v2 = vpop.permute.xlu1 %2140  ;;  %3561 = vmatprep.subr.bf16.mxu1 %v3373_v47  ;;  %v4200_v31 = vunpack.i.h.bf16 %v5448_v0  ;;  %vm6892_vm0 = vcmask 826368  }
 0x298   : > { %v2153_v57 = vsel %vm6889_vm2, %v2139_v53, %v2141_v2  ;;  %2812 = vrot.lane.b32.xlu0 %v5707_v61, %s6779_s17  ;;  %3562 = vmatpush1.bf16.msra.mxu1 %v3372_v28  ;;  %vm6893_vm2 = vmmov %vm6892_vm0 }
 0x299   : > { %2730 = vrot.lane.b32.xlu1 %v5709_v45, %s4316_s15 }
 0x29a   : > { %v2143_v22 = vpop.permute.xlu0 %2142 }
 0x29b   : > { %v2154_v56 = vsel %vm6890_vm1, %v2141_v2, %v2143_v22  ;;  %v5914_v40 = vpop.permute.xlu1 %2144  ;;  %vm6894_vm1 = vmmov %vm6892_vm0 }
 0x29c   : > { %v2155_v58 = vsel %vm6891_vm6, %v2143_v22, %v5914_v40  ;;  %2808 = vrot.lane.b32.xlu0 %v5693_v4, %s6779_s17  ;;  %vm6895_vm6 = vmmov %vm6892_vm0 }
 0x29d   : > { %2684 = vrot.lane.b32.xlu1 %v5693_v4, %s4315_s14 }
 0x29e   : > { %v2179_v9 = vpop.permute.xlu0 %2178 }
 0x29f   : > { %v2194_v8 = vsel %vm6892_vm0, %v4200_v31, %v2179_v9  ;;  %v2181_v51 = vpop.permute.xlu1 %2180  ;;  %vm6897_vm0 = vcmask 818176  }
 0x2a0   : > { %v2195_v42 = vsel %vm6893_vm2, %v2179_v9, %v2181_v51  ;;  %2855 = vrot.lane.b32.xlu0 %v5707_v61, %s6777_s20  ;;  %v3378_v62 = vpack.c.bf16 %v2194_v8, %v2152_v13  ;;  %vm6898_vm2 = vmmov %vm6897_vm0 }
 0x2a1   : > { %2767 = vrot.lane.b32.xlu1 %v5695_v7, %s6781_s16  ;;  %v3379_v55 = vpack.c.bf16 %v2195_v42, %v2153_v57 }
 0x2a2   : > { %v2183_v36 = vpop.permute.xlu0 %2182 }
 0x2a3   : > { %v2196_v0 = vsel %vm6894_vm1, %v2181_v51, %v2183_v36  ;;  %v5930_v17 = vpop.permute.xlu1 %2184  ;;  %3520 = vmatprep.subr.bf16.mxu0 %v3379_v55  ;;  %vm6899_vm1 = vmmov %vm6897_vm0 }
 0x2a4   : > { %v2197_v37 = vsel %vm6895_vm6, %v2183_v36, %v5930_v17  ;;  %2898 = vrot.lane.b32.xlu0 %v5707_v61, %s6896_s21  ;;  %3521 = vmatpush1.bf16.msra.mxu0 %v3378_v62  ;;  %v3380_v54 = vpack.c.bf16 %v2196_v0, %v2154_v56  ;;  %vm6900_vm6 = vmmov %vm6897_vm0 }
 0x2a5   : > { %2771 = vrot.lane.b32.xlu1 %v5709_v45, %s6781_s16  ;;  %v3381_v50 = vpack.c.bf16 %v2197_v37, %v2155_v58 }
 0x2a6   : > { %v2221_v24 = vpop.permute.xlu0 %2220 }
 0x2a7   : > { %v2236_v10 = vsel %vm6897_vm0, %v5749_v27, %v2221_v24  ;;  %v2223_v48 = vpop.permute.xlu1 %2222  ;;  %3563 = vmatprep.subr.bf16.mxu1 %v3381_v50  ;;  %vm6901_vm0 = vcmask 809984  }
 0x2a8   : > { %v2237_v16 = vsel %vm6898_vm2, %v2221_v24, %v2223_v48  ;;  %2894 = vrot.lane.b32.xlu0 %v5693_v4, %s6896_s21  ;;  %3564 = vmatpush1.bf16.msra.mxu1 %v3380_v54  ;;  %vm6902_vm2 = vmmov %vm6901_vm0 }
 0x2a9   : > { %2810 = vrot.lane.b32.xlu1 %v5695_v7, %s6779_s17 }
 0x2aa   : > { %v2225_v59 = vpop.permute.xlu0 %2224 }
 0x2ab   : > { %v2238_v21 = vsel %vm6899_vm1, %v2223_v48, %v2225_v59  ;;  %v5946_v26 = vpop.permute.xlu1 %2226  ;;  %vm6903_vm1 = vmmov %vm6901_vm0 }
 0x2ac   : > { %v2239_v32 = vsel %vm6900_vm6, %v2225_v59, %v5946_v26  ;;  %2068 = vrot.lane.b32.xlu0 %v5773_v41, %s6800_s29  ;;  %vm6904_vm6 = vmmov %vm6901_vm0 }
 0x2ad   : > { %2814 = vrot.lane.b32.xlu1 %v5709_v45, %s6779_s17 }
 0x2ae   : > { %v2263_v27 = vpop.permute.xlu0 %2262 }
 0x2af   : > { %v2278_v15 = vsel %vm6901_vm0, %v5766_v35, %v2263_v27  ;;  %v2265_v52 = vpop.permute.xlu1 %2264  ;;  %vm6905_vm0 = vcmask 744448  }
 0x2b0   : > { %v2279_v18 = vsel %vm6902_vm2, %v2263_v27, %v2265_v52  ;;  %2072 = vrot.lane.b32.xlu0 %v5843_v6, %s6800_s29  ;;  %v3386_v12 = vpack.c.bf16 %v2278_v15, %v2236_v10  ;;  %vm6906_vm2 = vmmov %vm6905_vm0 }
 0x2b1   : > { %2765 = vrot.lane.b32.xlu1 %v5693_v4, %s6781_s16  ;;  %v3387_v29 = vpack.c.bf16 %v2279_v18, %v2237_v16 }
 0x2b2   : > { %v2267_v3 = vpop.permute.xlu0 %2266 }
 0x2b3   : > { %v2280_v5 = vsel %vm6903_vm1, %v2265_v52, %v2267_v3  ;;  %v5962_v46 = vpop.permute.xlu1 %2268  ;;  %3522 = vmatprep.subr.bf16.mxu0 %v3387_v29  ;;  %vm6907_vm1 = vmmov %vm6905_vm0 }
 0x2b4   : > { %v2281_v35 = vsel %vm6904_vm6, %v2267_v3, %v5962_v46  ;;  %2107 = vrot.lane.b32.xlu0 %v5773_v41, %s6802_s10  ;;  %3523 = vmatpush1.bf16.msra.mxu0 %v3386_v12  ;;  %v3388_v63 = vpack.c.bf16 %v2280_v5, %v2238_v21  ;;  %vm6908_vm6 = vmmov %vm6905_vm0 }
 0x2b5   : > { %2853 = vrot.lane.b32.xlu1 %v5695_v7, %s6777_s20  ;;  %v3389_v1 = vpack.c.bf16 %v2281_v35, %v2239_v32 }
 0x2b6   : > { %v2305_v44 = vpop.permute.xlu0 %2304 }
 0x2b7   : > { %v2320_v30 = vsel %vm6905_vm0, %v5763_v33, %v2305_v44  ;;  %v2307_v38 = vpop.permute.xlu1 %2306  ;;  %3565 = vmatprep.subr.bf16.mxu1 %v3389_v1  ;;  %vm6909_vm0 = vcmask 736256  }
 0x2b8   : > { %v2321_v47 = vsel %vm6906_vm2, %v2305_v44, %v2307_v38  ;;  %2111 = vrot.lane.b32.xlu0 %v5843_v6, %s6802_s10  ;;  %3566 = vmatpush1.bf16.msra.mxu1 %v3388_v63  ;;  %vm6910_vm2 = vmmov %vm6909_vm0 }
 0x2b9   : > { %2857 = vrot.lane.b32.xlu1 %v5709_v45, %s6777_s20 }
 0x2ba   : > { %v2309_v53 = vpop.permute.xlu0 %2308 }
 0x2bb   : > { %v2322_v28 = vsel %vm6907_vm1, %v2307_v38, %v2309_v53  ;;  %v5978_v13 = vpop.permute.xlu1 %2310  ;;  %vm6911_vm1 = vmmov %vm6909_vm0 }
 0x2bc   : > { %v2323_v2 = vsel %vm6908_vm6, %v2309_v53, %v5978_v13  ;;  %2612 = vrot.lane.b32.xlu0 %v5773_v41, %s6789_s9  ;;  %vm6912_vm6 = vmmov %vm6909_vm0 }
 0x2bd   : > { %2896 = vrot.lane.b32.xlu1 %v5695_v7, %s6896_s21 }
 0x2be   : > { %v2347_v33 = vpop.permute.xlu0 %2346 }
 0x2bf   : > { %v2362_v57 = vsel %vm6909_vm0, %v5783_v43, %v2347_v33  ;;  %v2349_v22 = vpop.permute.xlu1 %2348  ;;  %vm6913_vm0 = vcmask 728064  }
 0x2c0   : > { %v2363_v56 = vsel %vm6910_vm2, %v2347_v33, %v2349_v22  ;;  %2652 = vrot.lane.b32.xlu0 %v5773_v41, %s6788_s24  ;;  %v3394_v9 = vpack.c.bf16 %v2362_v57, %v2320_v30  ;;  %vm6914_vm2 = vmmov %vm6913_vm0 }
 0x2c1   : > { %2900 = vrot.lane.b32.xlu1 %v5709_v45, %s6896_s21  ;;  %v3395_v58 = vpack.c.bf16 %v2363_v56, %v2321_v47 }
 0x2c2   : > { %v2351_v31 = vpop.permute.xlu0 %2350 }
 0x2c3   : > { %v2364_v8 = vsel %vm6911_vm1, %v2349_v22, %v2351_v31  ;;  %v5994_v51 = vpop.permute.xlu1 %2352  ;;  %3524 = vmatprep.subr.bf16.mxu0 %v3395_v58  ;;  %vm6916_vm1 = vmmov %vm6913_vm0 }
 0x2c4   : > { %v2365_v43 = vsel %vm6912_vm6, %v2351_v31, %v5994_v51  ;;  %2692 = vrot.lane.b32.xlu0 %v5773_v41, %s4315_s14  ;;  %3525 = vmatpush1.bf16.msra.mxu0 %v3394_v9  ;;  %v3396_v36 = vpack.c.bf16 %v2364_v8, %v2322_v28  ;;  %vm6917_vm6 = vmmov %vm6913_vm0 }
 0x2c5   : > { %2851 = vrot.lane.b32.xlu1 %v5693_v4, %s6777_s20  ;;  %v3397_v42 = vpack.c.bf16 %v2365_v43, %v2323_v2 }
 0x2c6   : > { %v2389_v55 = vpop.permute.xlu0 %2388 }
 0x2c7   : > { %v2404_v62 = vsel %vm6913_vm0, %v5781_v23, %v2389_v55  ;;  %v2391_v0 = vpop.permute.xlu1 %2390  ;;  %3567 = vmatprep.subr.bf16.mxu1 %v3397_v42  ;;  %vm6918_vm0 = vcmask 89088  }
 0x2c8   : > { %v2405_v37 = vsel %vm6914_vm2, %v2389_v55, %v2391_v0  ;;  %2732 = vrot.lane.b32.xlu0 %v5773_v41, %s4316_s15  ;;  %3568 = vmatpush1.bf16.msra.mxu1 %v3396_v36  ;;  %vm6919_vm2 = vmmov %vm6918_vm0 }
 0x2c9   : > { %2939 = vrot.lane.b32.xlu1 %v5695_v7, %s6915_s22 }
 0x2ca   : > { %v2393_v50 = vpop.permute.xlu0 %2392 }
 0x2cb   : > { %v2406_v24 = vsel %vm6916_vm1, %v2391_v0, %v2393_v50  ;;  %v6010_v54 = vpop.permute.xlu1 %2394  ;;  %vm6920_vm1 = vmmov %vm6918_vm0 }
 0x2cc   : > { %v2407_v10 = vsel %vm6917_vm6, %v2393_v50, %v6010_v54  ;;  %2773 = vrot.lane.b32.xlu0 %v5773_v41, %s6781_s16  ;;  %vm6921_vm6 = vmmov %vm6918_vm0 }
 0x2cd   : > { %2070 = vrot.lane.b32.xlu1 %v5775_v11, %s6800_s29  ;;  %s6922_s29 = smov 19  }
 0x2ce   : > { %v2431_v23 = vpop.permute.xlu0 %2430 }
 0x2cf   : > { %v2446_v48 = vsel %vm6918_vm0, %v5795_v14, %v2431_v23  ;;  %v2433_v16 = vpop.permute.xlu1 %2432  ;;  %vm6925_vm0 = vcmask 719872  }
 0x2d0   : > { %v2447_v59 = vsel %vm6919_vm2, %v2431_v23, %v2433_v16  ;;  %2816 = vrot.lane.b32.xlu0 %v5773_v41, %s6779_s17  ;;  %v3402_v27 = vpack.c.bf16 %v2446_v48, %v2404_v62  ;;  %vm6926_vm2 = vmmov %vm6925_vm0 }
 0x2d1   : > { %2109 = vrot.lane.b32.xlu1 %v5775_v11, %s6802_s10  ;;  %v3403_v21 = vpack.c.bf16 %v2447_v59, %v2405_v37  ;;  %s6923_s10 = smov 18  }
 0x2d2   : > { %v2435_v32 = vpop.permute.xlu0 %2434 }
 0x2d3   : > { %v2448_v15 = vsel %vm6920_vm1, %v2433_v16, %v2435_v32  ;;  %v6026_v52 = vpop.permute.xlu1 %2436  ;;  %3526 = vmatprep.subr.bf16.mxu0 %v3403_v21  ;;  %vm6927_vm1 = vcmask 965632  }
 0x2d4   : > { %v2449_v14 = vsel %vm6921_vm6, %v2435_v32, %v6026_v52  ;;  %2859 = vrot.lane.b32.xlu0 %v5773_v41, %s6777_s20  ;;  %3527 = vmatpush1.bf16.msra.mxu0 %v3402_v27  ;;  %v3404_v3 = vpack.c.bf16 %v2448_v15, %v2406_v24  ;;  %s6924_s20 = smov 17   ;;  %vm6928_vm6 = vmmov %vm6927_vm1 }
 0x2d5   : > { %2943 = vrot.lane.b32.xlu1 %v5709_v45, %s6915_s22  ;;  %v3405_v18 = vpack.c.bf16 %v2449_v14, %v2407_v10 }
 0x2d6   : > { %v2473_v29 = vpop.permute.xlu0 %2472 }
 0x2d7   : > { %v2488_v12 = vsel %vm702_vm11, %v5793_v34, %v2473_v29  ;;  %v2475_v5 = vpop.permute.xlu1 %2474  ;;  %3569 = vmatprep.subr.bf16.mxu1 %v3405_v18 }
 0x2d8   : > { %v2489_v35 = vsel %vm702_vm11, %v2473_v29, %v2475_v5  ;;  %2902 = vrot.lane.b32.xlu0 %v5773_v41, %s6896_s21  ;;  %3570 = vmatpush1.bf16.msra.mxu1 %v3404_v3 }
 0x2d9   : > { %2982 = vrot.lane.b32.xlu1 %v5695_v7, %s6785_s12 }
 0x2da   : > { %v2477_v1 = vpop.permute.xlu0 %2476 }
 0x2db   : > { %v2490_v44 = vsel %vm702_vm11, %v2475_v5, %v2477_v1  ;;  %v6042_v63 = vpop.permute.xlu1 %2478  ;;  %v6122_v5 = vld [vmem:[%s6688_s2 + $0x4] ss:$8 sps:$4 sm:$0xff]  }
 0x2dc   : > { %v2491_v30 = vsel %vm702_vm11, %v2477_v1, %v6042_v63  ;;  %2941 = vrot.lane.b32.xlu0 %v5707_v61, %s6915_s22  ;;  %3889 = vmatprep.mubr.msk.bf16.mxu0 %vm6925_vm0, %v6122_v5  ;;  %vm6929_vm0 = vcmask 957440  }
 0x2dd   : > { %2986 = vrot.lane.b32.xlu1 %v5709_v45, %s6785_s12  ;;  %3891 = vmatprep.mubr.msk.bf16.mxu1 %vm6926_vm2, %v6122_v5  ;;  %vm6930_vm2 = vmmov %vm6929_vm0 }
 0x2de   : > { %v2515_v34 = vpop.permute.xlu0 %2514 }
 0x2df   : > { %v2530_v38 = vsel %vm745_vm12, %v5805_v39, %v2515_v34  ;;  %v2517_v47 = vpop.permute.xlu1 %2516 }
 0x2e0   : > { %v2531_v53 = vsel %vm745_vm12, %v2515_v34, %v2517_v47  ;;  %2945 = vrot.lane.b32.xlu0 %v5773_v41, %s6915_s22  ;;  %v3410_v33 = vpack.c.bf16 %v2530_v38, %v2488_v12 }
 0x2e1   : > { %2937 = vrot.lane.b32.xlu1 %v5693_v4, %s6915_s22  ;;  %v3411_v28 = vpack.c.bf16 %v2531_v53, %v2489_v35 }
 0x2e2   : > { %v2519_v2 = vpop.permute.xlu0 %2518 }
 0x2e3   : > { %v2532_v57 = vsel %vm745_vm12, %v2517_v47, %v2519_v2  ;;  %v6058_v22 = vpop.permute.xlu1 %2520  ;;  %3528 = vmatprep.subr.bf16.mxu0 %v3411_v28 }
 0x2e4   : > { %v2533_v39 = vsel %vm745_vm12, %v2519_v2, %v6058_v22  ;;  %2984 = vrot.lane.b32.xlu0 %v5707_v61, %s6785_s12  ;;  %3529 = vmatpush1.bf16.msra.mxu0 %v3410_v33  ;;  %v3412_v31 = vpack.c.bf16 %v2532_v57, %v2490_v44 }
 0x2e5   : > { %3025 = vrot.lane.b32.xlu1 %v5695_v7, %s6922_s29  ;;  %v3413_v56 = vpack.c.bf16 %v2533_v39, %v2491_v30 }
 0x2e6   : > { %v2557_v58 = vpop.permute.xlu0 %2556 }
 0x2e7   : > { %v2572_v9 = vsel %vm788_vm15, %v5803_v25, %v2557_v58  ;;  %v2559_v8 = vpop.permute.xlu1 %2558  ;;  %3571 = vmatprep.subr.bf16.mxu1 %v3413_v56 }
 0x2e8   : > { %v2573_v43 = vsel %vm788_vm15, %v2557_v58, %v2559_v8  ;;  %2988 = vrot.lane.b32.xlu0 %v5773_v41, %s6785_s12  ;;  %3572 = vmatpush1.bf16.msra.mxu1 %v3412_v31  ;;  %v3418_v36 = vpack.c.bf16 %v5693_v4, %v2572_v9 }
 0x2e9   : > { %3029 = vrot.lane.b32.xlu1 %v5709_v45, %s6922_s29  ;;  %v3419_v42 = vpack.c.bf16 %v5695_v7, %v2573_v43 }
 0x2ea   : > { %v2561_v55 = vpop.permute.xlu0 %2560 }
 0x2eb   : > { %v2574_v62 = vsel %vm788_vm15, %v2559_v8, %v2561_v55  ;;  %v6076_v0 = vpop.permute.xlu1 %2562  ;;  %3530 = vmatprep.subr.bf16.mxu0 %v3419_v42 }
 0x2ec   : > { %v2575_v25 = vsel %vm788_vm15, %v2561_v55, %v6076_v0  ;;  %2980 = vrot.lane.b32.xlu0 %v5693_v4, %s6785_s12  ;;  %3531 = vmatpush1.bf16.msra.mxu0 %v3418_v36  ;;  %v3420_v24 = vpack.c.bf16 %v5707_v61, %v2574_v62 }
 0x2ed   : > { %3068 = vrot.lane.b32.xlu1 %v5695_v7, %s6923_s10  ;;  %v3421_v37 = vpack.c.bf16 %v5709_v45, %v2575_v25 }
 0x2ee   : > { %v2609_v50 = vpop.permute.xlu0 %2608 }
 0x2ef   : > { %v2607_v10 = vpop.permute.xlu1 %2606  ;;  %3573 = vmatprep.subr.bf16.mxu1 %v3421_v37 }
 0x2f0   : > { %v2621_v23 = vsel %vm864_vm14, %v5813_v60, %v2607_v10  ;;  %v2622_v48 = vsel %vm864_vm14, %v2607_v10, %v2609_v50  ;;  %3027 = vrot.lane.b32.xlu0 %v5707_v61, %s6922_s29  ;;  %3574 = vmatpush1.bf16.msra.mxu1 %v3420_v24 }
 0x2f1   : > { %3072 = vrot.lane.b32.xlu1 %v5709_v45, %s6923_s10 }
 0x2f2   : > { %v2649_v16 = vpop.permute.xlu0 %2648 }
 0x2f3   : > { %v6093_v59 = vpop.permute.xlu1 %2610 }
 0x2f4   : > { %v6097_v21 = vsel %vm864_vm14, %v2609_v50, %v6093_v59  ;;  %3031 = vrot.lane.b32.xlu0 %v5773_v41, %s6922_s29 }
 0x2f5   : > { %3023 = vrot.lane.b32.xlu1 %v5693_v4, %s6922_s29 }
 0x2f6   : > { %v2645_v60 = vpop.permute.xlu0 %2644 }
 0x2f7   : > { %v2647_v32 = vpop.permute.xlu1 %2646 }
 0x2f8   : > { %v2661_v27 = vsel %vm908_vm4, %v2645_v60, %v2647_v32  ;;  %v2662_v15 = vsel %vm908_vm4, %v2647_v32, %v2649_v16  ;;  %3070 = vrot.lane.b32.xlu0 %v5707_v61, %s6923_s10 }
 0x2f9   : > { %3109 = vrot.lane.b32.xlu1 %v5693_v4, %s6924_s20  ;;  %v3427_v14 = vpack.c.bf16 %v2662_v15, %v2622_v48  ;;  %v3426_v18 = vpack.c.bf16 %v2661_v27, %v2621_v23 }
 0x2fa   : > { %v2689_v29 = vpop.permute.xlu0 %2688 }
 0x2fb   : > { %v6109_v3 = vpop.permute.xlu1 %2650  ;;  %3532 = vmatprep.subr.bf16.mxu0 %v3427_v14 }
 0x2fc   : > { %v6113_v12 = vsel %vm908_vm4, %v2649_v16, %v6109_v3  ;;  %3074 = vrot.lane.b32.xlu0 %v5773_v41, %s6923_s10  ;;  %3533 = vmatpush1.bf16.msra.mxu0 %v3426_v18 }
 0x2fd   : > { %3113 = vrot.lane.b32.xlu1 %v5707_v61, %s6924_s20 }
 0x2fe   : > { %v2729_v35 = vpop.permute.xlu0 %2728 }
 0x2ff   : > { %v2687_v1 = vpop.permute.xlu1 %2686 }
 0x300   : > { %v2702_v44 = vsel %vm6927_vm1, %v2687_v1, %v2689_v29  ;;  %3066 = vrot.lane.b32.xlu0 %v5693_v4, %s6923_s10  ;;  %vm6931_vm1 = vmmov %vm6929_vm0 }
 0x301   : > { %3117 = vrot.lane.b32.xlu1 %v5773_v41, %s6924_s20 }
 0x302   : > { %v2725_v61 = vpop.permute.xlu0 %2724 }
 0x303   : > { %v6133_v30 = vpop.permute.xlu1 %2690 }
 0x304   : > { %v6137_v34 = vsel %vm6928_vm6, %v2689_v29, %v6133_v30  ;;  %3111 = vrot.lane.b32.xlu0 %v5695_v7, %s6924_s20 }
 0x305   : > { %2148 = vrot.lane.b32.xlu1 %v5775_v11, %s6806_s6 }
 0x306   : > { %v2770_v38 = vpop.permute.xlu0 %2769 }
 0x307   : > { %v2727_v47 = vpop.permute.xlu1 %2726 }
 0x308   : > { %v2741_v4 = vsel %vm6929_vm0, %v2725_v61, %v2727_v47  ;;  %v2742_v53 = vsel %vm6930_vm2, %v2727_v47, %v2729_v35  ;;  %3115 = vrot.lane.b32.xlu0 %v5709_v45, %s6924_s20  ;;  %vm6932_vm0 = vcmask 310272  }
 0x309   : > { %2188 = vrot.lane.b32.xlu1 %v5775_v11, %s4302_s27  ;;  %v3435_v28 = vpack.c.bf16 %v2742_v53, %v2702_v44  ;;  %vm6933_vm2 = vmmov %vm6932_vm0 }
 0x30a   : > { %v2813_v2 = vpop.permute.xlu0 %2812 }
 0x30b   : > { %v6149_v33 = vpop.permute.xlu1 %2730  ;;  %3534 = vmatprep.subr.bf16.mxu0 %v3435_v28 }
 0x30c   : > { %v6153_v7 = vsel %vm6931_vm1, %v2729_v35, %v6149_v33  ;;  %2146 = vrot.lane.b32.xlu0 %v5773_v41, %s6806_s6  ;;  %vm6934_vm1 = vcmask 908288  }
 0x30d   : > { %2192 = vrot.lane.b32.xlu1 %v5858_v20, %s4302_s27 }
 0x30e   : > { %v2809_v57 = vpop.permute.xlu0 %2808 }
 0x30f   : > { %v2685_v45 = vpop.permute.xlu1 %2684 }
 0x310   : > { %v2701_v39 = vsel %vm6928_vm6, %v2685_v45, %v2687_v1  ;;  %2186 = vrot.lane.b32.xlu0 %v5773_v41, %s4302_s27  ;;  %vm6935_vm6 = vmmov %vm6932_vm0  ;;  %v3428_v45 = vpack.c.bf16 %v6113_v12, %v6097_v21 }
 0x311   : > { %2228 = vrot.lane.b32.xlu1 %v5773_v41, %s4303_s28  ;;  %v3434_v56 = vpack.c.bf16 %v2741_v4, %v2701_v39 }
 0x312   : > { %v2856_v58 = vpop.permute.xlu0 %2855 }
 0x313   : > { %v2768_v31 = vpop.permute.xlu1 %2767  ;;  %3535 = vmatpush1.bf16.msra.mxu0 %v3434_v56 }
 0x314   : > { %v2785_v9 = vsel %vm1040_vm3, %v2768_v31, %v2770_v38  ;;  %2190 = vrot.lane.b32.xlu0 %v5843_v6, %s4302_s27 }
 0x315   : > { %2232 = vrot.lane.b32.xlu1 %v5843_v6, %s4303_s28 }
 0x316   : > { %v2899_v8 = vpop.permute.xlu0 %2898 }
 0x317   : > { %v6169_v43 = vpop.permute.xlu1 %2771 }
 0x318   : > { %v6173_v42 = vsel %vm1040_vm3, %v2770_v38, %v6169_v43  ;;  %2150 = vrot.lane.b32.xlu0 %v5843_v6, %s6806_s6  ;;  %s6960_s6 = smov 37  }
 0x319   : > { %2270 = vrot.lane.b32.xlu1 %v5773_v41, %s6784_s11 }
 0x31a   : > { %v2895_v55 = vpop.permute.xlu0 %2894 }
 0x31b   : > { %v2811_v36 = vpop.permute.xlu1 %2810 }
 0x31c   : > { %v2827_v62 = vsel %vm6932_vm0, %v2809_v57, %v2811_v36  ;;  %v2828_v25 = vsel %vm6933_vm2, %v2811_v36, %v2813_v2  ;;  %2230 = vrot.lane.b32.xlu0 %v5775_v11, %s4303_s28  ;;  %vm6936_vm0 = vcmask 900096   ;;  %vm6937_vm2 = vcmask 302080  }
 0x31d   : > { %2274 = vrot.lane.b32.xlu1 %v5843_v6, %s6784_s11  ;;  %v3443_v37 = vpack.c.bf16 %v2828_v25, %v2785_v9 }
 0x31e   : > { %v6185_v50 = vpop.permute.xlu0 %2068 }
 0x31f   : > { %v6190_v24 = vsel %vm6934_vm1, %v5881_v19, %v6185_v50  ;;  %v6192_v10 = vpop.permute.xlu1 %2814  ;;  %3536 = vmatprep.subr.bf16.mxu0 %v3443_v37  ;;  %vm6938_vm1 = vmmov %vm6937_vm2 }
 0x320   : > { %2093 = vst [vmem:[#allocation2 + $0x20] sm:$0xff] %v6190_v24  ;;  %v6197_v23 = vsel %vm6935_vm6, %v2813_v2, %v6192_v10  ;;  %2234 = vrot.lane.b32.xlu0 %v5858_v20, %s4303_s28  ;;  %vm6939_vm6 = vcmask 965632  }
 0x321   : > { %2312 = vrot.lane.b32.xlu1 %v5773_v41, %s4305_s30 }
 0x322   : > { %v6203_v48 = vpop.permute.xlu0 %2072 }
 0x323   : > { %2096 = vst.msk [vmem:[#allocation2 + $0x38] sm:$0xff] %vm299_vm7, %v6203_v48  ;;  %v2766_v19 = vpop.permute.xlu1 %2765 }
 0x324   : > { %v2784_v16 = vsel %vm1040_vm3, %v2766_v19, %v2768_v31  ;;  %2272 = vrot.lane.b32.xlu0 %v5775_v11, %s6784_s11 }
 0x325   : > { %2316 = vrot.lane.b32.xlu1 %v5843_v6, %s4305_s30  ;;  %v3442_v60 = vpack.c.bf16 %v2827_v62, %v2784_v16 }
 0x326   : > { %v2108_v32 = vpop.permute.xlu0 %2107 }
 0x327   : > { %v6214_v27 = vsel %vm6936_vm0, %v5898_v49, %v2108_v32  ;;  %v2854_v15 = vpop.permute.xlu1 %2853  ;;  %3537 = vmatpush1.bf16.msra.mxu0 %v3442_v60  ;;  %vm6940_vm0 = vmmov %vm6938_vm1  ;;  %v4238_v60 = vld [vmem:[#allocation3 + $0x28] sm:$0xff] }
 0x328   : > { %2132 = vst [vmem:[#allocation2 + $0x60] sm:$0xff] %v6214_v27  ;;  %v2871_v14 = vsel %vm6937_vm2, %v2854_v15, %v2856_v58  ;;  %2276 = vrot.lane.b32.xlu0 %v5858_v20, %s6784_s11  ;;  %v3374_v18 = vpack.c.bf16 %v6214_v27, %v6190_v24  ;;  %vm6941_vm2 = vcmask 957440  }
 0x329   : > { %2354 = vrot.lane.b32.xlu1 %v5773_v41, %s6786_s26 }
 0x32a   : > { %v2112_v29 = vpop.permute.xlu0 %2111 }
 0x32b   : > { %2135 = vst.msk [vmem:[#allocation2 + $0x78] sm:$0xff] %vm299_vm7, %v2112_v29  ;;  %v2858_v49 = vpop.permute.xlu1 %2857 }
 0x32c   : > { %v6226_v35 = vsel %vm6938_vm1, %v2856_v58, %v2858_v49  ;;  %2314 = vrot.lane.b32.xlu0 %v5775_v11, %s4305_s30  ;;  %vm6942_vm1 = vcmask 908288  }
 0x32d   : > { %2358 = vrot.lane.b32.xlu1 %v5843_v6, %s6786_s26 }
 0x32e   : > { %v6232_v1 = vpop.permute.xlu0 %2612 }
 0x32f   : > { %v2624_v44 = vsel %vm864_vm14, %v6093_v59, %v6232_v1  ;;  %v2897_v61 = vpop.permute.xlu1 %2896 }
 0x330   : > { %v2913_v38 = vsel %vm1172_vm5, %v2895_v55, %v2897_v61  ;;  %v2914_v47 = vsel %vm1172_vm5, %v2897_v61, %v2899_v8  ;;  %2318 = vrot.lane.b32.xlu0 %v5858_v20, %s4305_s30  ;;  %s6957_s30 = smov 38  }
 0x331   : > { %2396 = vrot.lane.b32.xlu1 %v5773_v41, %s4307_s7  ;;  %v3451_v4 = vpack.c.bf16 %v2914_v47, %v2871_v14 }
 0x332   : > { %v6243_v53 = vpop.permute.xlu0 %2652 }
 0x333   : > { %v2664_v28 = vsel %vm908_vm4, %v6109_v3, %v6243_v53  ;;  %v2901_v2 = vpop.permute.xlu1 %2900  ;;  %3538 = vmatprep.subr.bf16.mxu0 %v3451_v4 }
 0x334   : > { %v2915_v59 = vsel %vm1172_vm5, %v2899_v8, %v2901_v2  ;;  %2356 = vrot.lane.b32.xlu0 %v5775_v11, %s6786_s26  ;;  %v3429_v57 = vpack.c.bf16 %v2664_v28, %v2624_v44  ;;  %v3436_v8 = vpack.c.bf16 %v6153_v7, %v6137_v34 }
 0x335   : > { %2400 = vrot.lane.b32.xlu1 %v5843_v6, %s4307_s7  ;;  %v3452_v14 = vpack.c.bf16 %v2915_v59, %v6226_v35 }
 0x336   : > { %v6255_v39 = vpop.permute.xlu0 %2692  ;;  %3575 = vmatprep.subr.bf16.mxu1 %v3429_v57 }
 0x337   : > { %v2704_v3 = vsel %vm6939_vm6, %v6133_v30, %v6255_v39  ;;  %v2852_v56 = vpop.permute.xlu1 %2851  ;;  %3576 = vmatpush1.bf16.msra.mxu1 %v3428_v45  ;;  %vm6943_vm6 = vmmov %vm6942_vm1 }
 0x338   : > { %v2870_v58 = vsel %vm6940_vm0, %v2852_v56, %v2854_v15  ;;  %2360 = vrot.lane.b32.xlu0 %v5858_v20, %s6786_s26  ;;  %vm6944_vm0 = vcmask 310272  }
 0x339   : > { %2438 = vrot.lane.b32.xlu1 %v5773_v41, %s4308_s8  ;;  %v3450_v31 = vpack.c.bf16 %v2913_v38, %v2870_v58 }
 0x33a   : > { %v6265_v9 = vpop.permute.xlu0 %2732 }
 0x33b   : > { %v2744_v21 = vsel %vm6941_vm2, %v6149_v33, %v6265_v9  ;;  %v2940_v12 = vpop.permute.xlu1 %2939  ;;  %3539 = vmatpush1.bf16.msra.mxu0 %v3450_v31  ;;  %vm6945_vm2 = vcmask 900096  }
 0x33c   : > { %2398 = vrot.lane.b32.xlu0 %v5775_v11, %s4307_s7  ;;  %v3437_v30 = vpack.c.bf16 %v2744_v21, %v2704_v3 }
 0x33d   : > { %2442 = vrot.lane.b32.xlu1 %v5843_v6, %s4308_s8 }
 0x33e   : > { %v6276_v55 = vpop.permute.xlu0 %2773  ;;  %3577 = vmatprep.subr.bf16.mxu1 %v3437_v30 }
 0x33f   : > { %v2787_v36 = vsel %vm1040_vm3, %v6169_v43, %v6276_v55  ;;  %v2071_v33 = vpop.permute.xlu1 %2070  ;;  %3578 = vmatpush1.bf16.msra.mxu1 %v3436_v8 }
 0x340   : > { %v6283_v62 = vsel %vm6942_vm1, %v6185_v50, %v2071_v33  ;;  %v6287_v25 = vsel %vm6943_vm6, %v2071_v33, %v6203_v48  ;;  %2402 = vrot.lane.b32.xlu0 %v5858_v20, %s4307_s7  ;;  %vm6946_vm1 = vmmov %vm6945_vm2  ;;  %vm6947_vm6 = vcmask 302080   ;;  %s3898_s7 = sshll.u32 %s7015_s19, 6 }
 0x341   : > { %2480 = vrot.lane.b32.xlu1 %v5773_v41, %s6791_s23  ;;  %v3444_v41 = vpack.c.bf16 %v6197_v23, %v6173_v42  ;;  %v6321_v23 = vld [vmem:[#allocation3 + $0x30] sm:$0xff]  ;;  %s6667_s16 = scalar_lea.vmem %s6691_s5, %s3898_s7 }
 0x342   : > { %v6293_v34 = vpop.permute.xlu0 %2816 }
 0x343   : > { %v2830_v7 = vsel %vm6944_vm0, %v6192_v10, %v6293_v34  ;;  %v2110_v43 = vpop.permute.xlu1 %2109  ;;  %vm6948_vm0 = vcmask 220160  }
 0x344   : > { %v6299_v37 = vsel %vm6945_vm2, %v2108_v32, %v2110_v43  ;;  %v6302_v50 = vsel %vm6946_vm1, %v2110_v43, %v2112_v29  ;;  %2440 = vrot.lane.b32.xlu0 %v5775_v11, %s4308_s8  ;;  %v3445_v48 = vpack.c.bf16 %v2830_v7, %v2787_v36  ;;  %vm6949_vm2 = vmmov %vm6948_vm0 }
 0x345   : > { %2484 = vrot.lane.b32.xlu1 %v5843_v6, %s6791_s23  ;;  %vm6950_vm1 = vmmov %vm6948_vm0 }
 0x346   : > { %v6310_v19 = vpop.permute.xlu0 %2859  ;;  %3579 = vmatprep.subr.bf16.mxu1 %v3445_v48  ;;  %v6363_v48 = vld [vmem:[#allocation3 + $0x38] sm:$0xff] }
 0x347   : > { %v2873_v10 = vsel %vm6947_vm6, %v2858_v49, %v6310_v19  ;;  %v2944_v16 = vpop.permute.xlu1 %2943  ;;  %3580 = vmatpush1.bf16.msra.mxu1 %v3444_v41  ;;  %vm6951_vm6 = vmmov %vm6948_vm0 }
 0x348   : > { %2444 = vrot.lane.b32.xlu0 %v5858_v20, %s4308_s8 }
 0x349   : > { %2522 = vrot.lane.b32.xlu1 %v4238_v60, %s6787_s25 }
 0x34a   : > { %v6317_v11 = vpop.permute.xlu0 %2902 }
 0x34b   : > { %v2916_v32 = vsel %vm1172_vm5, %v2901_v2, %v6317_v11  ;;  %v2983_v42 = vpop.permute.xlu1 %2982 }
 0x34c   : > { %2482 = vrot.lane.b32.xlu0 %v6321_v23, %s6791_s23  ;;  %v3453_v15 = vpack.c.bf16 %v2916_v32, %v2873_v10 }
 0x34d   : > { %2526 = vrot.lane.b32.xlu1 %v5843_v6, %s6787_s25 }
 0x34e   : > { %v2942_v29 = vpop.permute.xlu0 %2941  ;;  %3581 = vmatprep.subr.bf16.mxu1 %v3453_v15 }
 0x34f   : > { %v2957_v49 = vsel %vm1216_vm8, %v2940_v12, %v2942_v29  ;;  %v2958_v44 = vsel %vm1216_vm8, %v2942_v29, %v2944_v16  ;;  %v2987_v61 = vpop.permute.xlu1 %2986  ;;  %3582 = vmatpush1.bf16.msra.mxu1 %v3452_v14 }
 0x350   : > { %2486 = vrot.lane.b32.xlu0 %v5858_v20, %s6791_s23 }
 0x351   : > { %2564 = vrot.lane.b32.xlu1 %v4238_v60, %s4313_s13 }
 0x352   : > { %v6333_v38 = vpop.permute.xlu0 %2945 }
 0x353   : > { %v2959_v47 = vsel %vm1216_vm8, %v2944_v16, %v6333_v38  ;;  %v2938_v4 = vpop.permute.xlu1 %2937 }
 0x354   : > { %v2956_v35 = vsel %vm1216_vm8, %v2938_v4, %v2940_v12  ;;  %2524 = vrot.lane.b32.xlu0 %v6321_v23, %s6787_s25 }
 0x355   : > { %2568 = vrot.lane.b32.xlu1 %v5843_v6, %s4313_s13 }
 0x356   : > { %v2985_v28 = vpop.permute.xlu0 %2984 }
 0x357   : > { %v3000_v2 = vsel %vm6948_vm0, %v2983_v42, %v2985_v28  ;;  %v3001_v59 = vsel %vm6949_vm2, %v2985_v28, %v2987_v61  ;;  %v3026_v57 = vpop.permute.xlu1 %3025  ;;  %vm6952_vm0 = vcmask 146432  }
 0x358   : > { %2528 = vrot.lane.b32.xlu0 %v5858_v20, %s6787_s25  ;;  %v3459_v45 = vpack.c.bf16 %v3000_v2, %v2957_v49  ;;  %v3460_v31 = vpack.c.bf16 %v3001_v59, %v2958_v44  ;;  %vm6953_vm2 = vmmov %vm6952_vm0  ;;  %s6955_s25 = smov 39  }
 0x359   : > { %2614 = vrot.lane.b32.xlu1 %v6321_v23, %s6789_s9 }
 0x35a   : > { %v6348_v3 = vpop.permute.xlu0 %2988  ;;  %3540 = vmatprep.subr.bf16.mxu0 %v3459_v45 }
 0x35b   : > { %v3002_v56 = vsel %vm6950_vm1, %v2987_v61, %v6348_v3  ;;  %v3030_v6 = vpop.permute.xlu1 %3029  ;;  %vm6954_vm1 = vmmov %vm6952_vm0 }
 0x35c   : > { %2566 = vrot.lane.b32.xlu0 %v6321_v23, %s4313_s13  ;;  %v3461_v58 = vpack.c.bf16 %v3002_v56, %v2959_v47 }
 0x35d   : > { %2654 = vrot.lane.b32.xlu1 %v6321_v23, %s6788_s24 }
 0x35e   : > { %v2981_v21 = vpop.permute.xlu0 %2980  ;;  %3583 = vmatprep.subr.bf16.mxu1 %v3461_v58  ;;  %v3152_v58 = vld [vmem:[%s6688_s2] sm:$0xff] }
 0x35f   : > { %v2999_v12 = vsel %vm6951_vm6, %v2981_v21, %v2983_v42  ;;  %v3069_v30 = vpop.permute.xlu1 %3068  ;;  %3584 = vmatpush1.bf16.msra.mxu1 %v3460_v31  ;;  %vm6956_vm6 = vmmov %vm6952_vm0  ;;  %v3153_v31 = vld [vmem:[%s6688_s2 + $0x8] sm:$0xff] }
 0x360   : > { %2570 = vrot.lane.b32.xlu0 %v5858_v20, %s4313_s13  ;;  %v3458_v8 = vpack.c.bf16 %v2999_v12, %v2956_v35  ;;  %s6656_s13 = scalar_lea.vmem %s6690_s4, %s3898_s7 }
 0x361   : > { %2618 = vrot.lane.b32.xlu1 %v5858_v20, %s6789_s9 }
 0x362   : > { %v3028_v36 = vpop.permute.xlu0 %3027  ;;  %3541 = vmatpush1.bf16.msra.mxu0 %v3458_v8 }
 0x363   : > { %v3043_v33 = vsel %vm1304_vm10, %v3026_v57, %v3028_v36  ;;  %v3044_v7 = vsel %vm1304_vm10, %v3028_v36, %v3030_v6  ;;  %v3073_v43 = vpop.permute.xlu1 %3072  ;;  %v3375_v36 = vpack.c.bf16 %v6299_v37, %v6283_v62  ;;  %v3161_v62 = vld [vmem:[#allocation2 + $0x38] sm:$0xff] }
 0x364   : > { %2616 = vrot.lane.b32.xlu0 %v6363_v48, %s6789_s9 }
 0x365   : > { %2694 = vrot.lane.b32.xlu1 %v6321_v23, %s4315_s14 }
 0x366   : > { %v6369_v41 = vpop.permute.xlu0 %3031 }
 0x367   : > { %v3045_v10 = vsel %vm1304_vm10, %v3030_v6, %v6369_v41  ;;  %v3024_v16 = vpop.permute.xlu1 %3023 }
 0x368   : > { %v3042_v60 = vsel %vm1304_vm10, %v3024_v16, %v3026_v57  ;;  %2656 = vrot.lane.b32.xlu0 %v6363_v48, %s6788_s24  ;;  %v3169_v16 = vld [vmem:[#allocation2 + $0x78] sm:$0xff] }
 0x369   : > { %2734 = vrot.lane.b32.xlu1 %v6321_v23, %s4316_s15 }
 0x36a   : > { %v3071_v32 = vpop.permute.xlu0 %3070 }
 0x36b   : > { %v3086_v42 = vsel %vm6952_vm0, %v3069_v30, %v3071_v32  ;;  %v3087_v15 = vsel %vm6953_vm2, %v3071_v32, %v3073_v43  ;;  %v3110_v14 = vpop.permute.xlu1 %3109  ;;  %vm6958_vm0 = vcmask 891904  }
 0x36c   : > { %2658 = vrot.lane.b32.xlu0 %v5858_v20, %s6788_s24  ;;  %v3467_v29 = vpack.c.bf16 %v3086_v42, %v3043_v33  ;;  %v3468_v4 = vpack.c.bf16 %v3087_v15, %v3044_v7  ;;  %v6417_v33 = vcombine.low %v3152_v58, %v3153_v31  ;;  %v3377_v15 = vpack.c.bf16 %v3169_v16, %v3161_v62  ;;  %vm6959_vm2 = vmmov %vm6958_vm0 }
 0x36d   : > { %2698 = vrot.lane.b32.xlu1 %v5858_v20, %s4315_s14 }
 0x36e   : > { %v6384_v49 = vpop.permute.xlu0 %3074  ;;  %3542 = vmatprep.subr.bf16.mxu0 %v3467_v29 }
 0x36f   : > { %v3088_v44 = vsel %vm6954_vm1, %v3073_v43, %v6384_v49  ;;  %v3114_v61 = vpop.permute.xlu1 %3113  ;;  %vm6961_vm1 = vcmask 719872  }
 0x370   : > { %2696 = vrot.lane.b32.xlu0 %v6363_v48, %s4315_s14  ;;  %v3469_v47 = vpack.c.bf16 %v3088_v44, %v3045_v10 }
 0x371   : > { %2775 = vrot.lane.b32.xlu1 %v6321_v23, %s6955_s25 }
 0x372   : > { %v3067_v35 = vpop.permute.xlu0 %3066  ;;  %3585 = vmatprep.subr.bf16.mxu1 %v3469_v47 }
 0x373   : > { %v3085_v28 = vsel %vm6956_vm6, %v3067_v35, %v3069_v30  ;;  %v6393_v2 = vpop.permute.xlu1 %3117  ;;  %3586 = vmatpush1.bf16.msra.mxu1 %v3468_v4  ;;  %vm6962_vm6 = vcmask 826368  }
 0x374   : > { %2736 = vrot.lane.b32.xlu0 %v6363_v48, %s4316_s15  ;;  %v3466_v59 = vpack.c.bf16 %v3085_v28, %v3042_v60 }
 0x375   : > { %2779 = vrot.lane.b32.xlu1 %v5858_v20, %s6955_s25 }
 0x376   : > { %v3112_v57 = vpop.permute.xlu0 %3111  ;;  %3543 = vmatpush1.bf16.msra.mxu0 %v3466_v59 }
 0x377   : > { %v3128_v45 = vsel %vm1392_vm9, %v3110_v14, %v3112_v57  ;;  %v3129_v56 = vsel %vm1392_vm9, %v3112_v57, %v3114_v61  ;;  %v6401_v6 = vpop.permute.xlu1 %2148 }
 0x378   : > { %2738 = vrot.lane.b32.xlu0 %v5858_v20, %s4316_s15  ;;  %v3475_v21 = vpack.c.bf16 %v3129_v56, %v3129_v56  ;;  %v3474_v12 = vpack.c.bf16 %v3128_v45, %v3128_v45 }
 0x379   : > { %2818 = vrot.lane.b32.xlu1 %v6321_v23, %s6957_s30 }
 0x37a   : > { %v3116_v30 = vpop.permute.xlu0 %3115  ;;  %3888 = vmatprep.subr.msk.bf16.mxu0 %vm6783_vm13, %v3475_v21  ;;  %v3495_v8 = vsel %vm6783_vm13, %v3474_v12, 0 }
 0x37b   : > { %v3130_v7 = vsel %vm1392_vm9, %v3114_v61, %v3116_v30  ;;  %v3131_v43 = vsel %vm1392_vm9, %v3116_v30, %v6393_v2  ;;  %v2189_v10 = vpop.permute.xlu1 %2188  ;;  %3545 = vmatpush1.bf16.msra.mxu0 %v3495_v8  ;;  %v6436_v61 = vld [vmem:[#allocation3] sm:$0xff] }
 0x37c   : > { %2777 = vrot.lane.b32.xlu0 %v6363_v48, %s6955_s25  ;;  %3604 = vmatprep.subr.bf16.mxu0 %v3375_v36  ;;  %v3477_v60 = vpack.c.bf16 %v3131_v43, %v3131_v43  ;;  %v3476_v32 = vpack.c.bf16 %v3130_v7, %v3130_v7 }
 0x37d   : > { %2822 = vrot.lane.b32.xlu1 %v5858_v20, %s6957_s30 }
 0x37e   : > { %v2147_v37 = vpop.permute.xlu0 %2146  ;;  %3890 = vmatprep.subr.msk.bf16.mxu1 %vm6783_vm13, %v3477_v60  ;;  %3551 = vmatmul.mubr.bf16.vlgmr.msra.gmra.mrb[8].mxu0 %v6417_v33  ;;  %v3501_v42 = vsel %vm6783_vm13, %v3476_v32, 0  ;;  %vm6965_vm13 = vcmask 818176  }
 0x37f   : > { %v2156_v14 = vsel %vm6958_vm0, %v5914_v40, %v2147_v37  ;;  %v2157_v29 = vsel %vm6959_vm2, %v2147_v37, %v6401_v6  ;;  %v2193_v44 = vpop.permute.xlu1 %2192  ;;  %3588 = vmatpush1.bf16.msra.mxu1 %v3501_v42  ;;  %3605 = vmatpush1.bf16.msra.mxu0 %v3374_v18  ;;  %v3376_v40 = vpack.c.bf16 %v6302_v50, %v6287_v25  ;;  %vm6963_vm0 = vmmov %vm6962_vm6 }
 0x380   : > { %2781 = vrot.lane.b32.xlu0 %v6436_v61, %s6955_s25  ;;  %3647 = vmatprep.subr.bf16.mxu1 %v3377_v15  ;;  %vm6964_vm2 = vmmov %vm6961_vm1 }
 0x381   : > { %2861 = vrot.lane.b32.xlu1 %v6321_v23, %s6960_s6  ;;  %3893 = vmatprep.mubr.msk.bf16.mxu0 %vm6961_vm1, %v6122_v5  ;;  %vm6966_vm1 = vmmov %vm6963_vm0 }
 0x382   : > { %v2187_v47 = vpop.permute.xlu0 %2186  ;;  %3594 = vmatmul.mubr.bf16.vlgmr.msra.gmra.mrb[8].mxu1 %v6417_v33 }
 0x383   : > { %v2198_v24 = vsel %vm6962_vm6, %v5930_v17, %v2187_v47  ;;  %v2199_v27 = vsel %vm6963_vm0, %v2187_v47, %v2189_v10  ;;  %v2229_v18 = vpop.permute.xlu1 %2228  ;;  %3648 = vmatpush1.bf16.msra.mxu1 %v3376_v40  ;;  %3895 = vmatprep.mubr.msk.bf16.mxu1 %vm6964_vm2, %v6122_v5  ;;  %vm6967_vm6 = vmmov %vm6963_vm0  ;;  %vm6969_vm0 = vcmask 809984   ;;  %vm6970_vm2 = vcmask 818176  }
 0x384   : > { %2214 = vst [vmem:[#allocation2 + $0xe0] sm:$0xff] %v2198_v24  ;;  %v2240_v25 = vsel %vm6965_vm13, %v5946_v26, %v2229_v18  ;;  %2820 = vrot.lane.b32.xlu0 %v6363_v48, %s6957_s30  ;;  %v3383_v50 = vpack.c.bf16 %v2199_v27, %v2157_v29  ;;  %v3382_v4 = vpack.c.bf16 %v2198_v24, %v2156_v14  ;;  %vm6968_vm13 = vcmask 891904  }
 0x385   : > { %2865 = vrot.lane.b32.xlu1 %v5858_v20, %s6960_s6 }
 0x386   : > { %v2191_v17 = vpop.permute.xlu0 %2190  ;;  %3606 = vmatprep.subr.bf16.mxu0 %v3383_v50 }
 0x387   : > { %v2200_v35 = vsel %vm6966_vm1, %v2189_v10, %v2191_v17  ;;  %v2201_v28 = vsel %vm6967_vm6, %v2191_v17, %v2193_v44  ;;  %v2233_v59 = vpop.permute.xlu1 %2232  ;;  %3607 = vmatpush1.bf16.msra.mxu0 %v3382_v4  ;;  %vm6971_vm1 = vmmov %vm6970_vm2 }
 0x388   : > { %2217 = vst.msk [vmem:[#allocation2 + $0xf8] sm:$0xff] %vm299_vm7, %v2201_v28  ;;  %2824 = vrot.lane.b32.xlu0 %v6436_v61, %s6957_s30  ;;  %vm6972_vm6 = vmmov %vm6971_vm1 }
 0x389   : > { %2904 = vrot.lane.b32.xlu1 %v6321_v23, %s6896_s21 }
 0x38a   : > { %v2151_v26 = vpop.permute.xlu0 %2150 }
 0x38b   : > { %v2158_v5 = vsel %vm6968_vm13, %v6401_v6, %v2151_v26  ;;  %2174 = vst.msk [vmem:[#allocation2 + $0xb8] sm:$0xff] %vm299_vm7, %v2151_v26  ;;  %v2271_v57 = vpop.permute.xlu1 %2270  ;;  %vm6973_vm13 = vcmask 744448  }
 0x38c   : > { %v2282_v45 = vsel %vm6969_vm0, %v5962_v46, %v2271_v57  ;;  %2863 = vrot.lane.b32.xlu0 %v6363_v48, %s6960_s6  ;;  %v3384_v43 = vpack.c.bf16 %v2200_v35, %v2158_v5 }
 0x38d   : > { %2908 = vrot.lane.b32.xlu1 %v5858_v20, %s6896_s21 }
 0x38e   : > { %v2231_v56 = vpop.permute.xlu0 %2230 }
 0x38f   : > { %v2241_v58 = vsel %vm6970_vm2, %v2229_v18, %v2231_v56  ;;  %v2242_v31 = vsel %vm6971_vm1, %v2231_v56, %v2233_v59  ;;  %v2275_v21 = vpop.permute.xlu1 %2274  ;;  %v3185_v12 = vld [vmem:[#allocation2 + $0xf8] sm:$0xff]  ;;  %vm6974_vm2 = vmmov %vm6969_vm0 }
 0x390   : > { %2867 = vrot.lane.b32.xlu0 %v6436_v61, %s6960_s6  ;;  %vm6975_vm1 = vmmov %vm6969_vm0 }
 0x391   : > { %2947 = vrot.lane.b32.xlu1 %v6321_v23, %s6915_s22 }
 0x392   : > { %v2235_v6 = vpop.permute.xlu0 %2234  ;;  %v3177_v46 = vld [vmem:[#allocation2 + $0xb8] sm:$0xff] }
 0x393   : > { %v2243_v30 = vsel %vm6972_vm6, %v2233_v59, %v2235_v6  ;;  %v2313_v8 = vpop.permute.xlu1 %2312  ;;  %v3385_v36 = vpack.c.bf16 %v3185_v12, %v3177_v46  ;;  %vm6976_vm6 = vcmask 736256  }
 0x394   : > { %2259 = vst.msk [vmem:[#allocation2 + $0x138] sm:$0xff] %vm299_vm7, %v2243_v30  ;;  %v2324_v7 = vsel %vm6973_vm13, %v5978_v13, %v2313_v8  ;;  %2906 = vrot.lane.b32.xlu0 %v6363_v48, %s6896_s21  ;;  %v3390_v13 = vpack.c.bf16 %v2282_v45, %v2240_v25 }
 0x395   : > { %2951 = vrot.lane.b32.xlu1 %v5858_v20, %s6915_s22  ;;  %3649 = vmatprep.subr.bf16.mxu1 %v3385_v36 }
 0x396   : > { %v2273_v10 = vpop.permute.xlu0 %2272  ;;  %3650 = vmatpush1.bf16.msra.mxu1 %v3384_v43 }
 0x397   : > { %v2283_v16 = vsel %vm6969_vm0, %v2271_v57, %v2273_v10  ;;  %v2284_v60 = vsel %vm6974_vm2, %v2273_v10, %v2275_v21  ;;  %v2317_v32 = vpop.permute.xlu1 %2316  ;;  %vm6977_vm0 = vmmov %vm6973_vm13 }
 0x398   : > { %2910 = vrot.lane.b32.xlu0 %v6436_v61, %s6896_s21  ;;  %v3391_v62 = vpack.c.bf16 %v2283_v16, %v2241_v58  ;;  %vm6978_vm2 = vmmov %vm6977_vm0  ;;  %v3392_v17 = vpack.c.bf16 %v2284_v60, %v2242_v31 }
 0x399   : > { %2990 = vrot.lane.b32.xlu1 %v6321_v23, %s6785_s12 }
 0x39a   : > { %v2277_v37 = vpop.permute.xlu0 %2276  ;;  %3608 = vmatprep.subr.bf16.mxu0 %v3391_v62 }
 0x39b   : > { %v2285_v42 = vsel %vm6975_vm1, %v2275_v21, %v2277_v37  ;;  %v2355_v15 = vpop.permute.xlu1 %2354  ;;  %3609 = vmatpush1.bf16.msra.mxu0 %v3390_v13  ;;  %v3193_v18 = vld [vmem:[#allocation2 + $0x138] sm:$0xff]  ;;  %vm6979_vm1 = vcmask 728064  }
 0x39c   : > { %2301 = vst.msk [vmem:[#allocation2 + $0x178] sm:$0xff] %vm299_vm7, %v2285_v42  ;;  %v2366_v14 = vsel %vm6976_vm6, %v5994_v51, %v2355_v15  ;;  %2949 = vrot.lane.b32.xlu0 %v6363_v48, %s6915_s22 }
 0x39d   : > { %2994 = vrot.lane.b32.xlu1 %v5858_v20, %s6785_s12  ;;  %v3398_v5 = vpack.c.bf16 %v2366_v14, %v2324_v7 }
 0x39e   : > { %v2315_v29 = vpop.permute.xlu0 %2314 }
 0x39f   : > { %v2325_v44 = vsel %vm6973_vm13, %v2313_v8, %v2315_v29  ;;  %v2326_v40 = vsel %vm6977_vm0, %v2315_v29, %v2317_v32  ;;  %v2359_v47 = vpop.permute.xlu1 %2358  ;;  %vm6980_vm13 = vmmov %vm6976_vm6 }
 0x3a0   : > { %2953 = vrot.lane.b32.xlu0 %v6436_v61, %s6915_s22  ;;  %vm6981_vm0 = vmmov %vm6976_vm6 }
 0x3a1   : > { %3033 = vrot.lane.b32.xlu1 %v6321_v23, %s6922_s29 }
 0x3a2   : > { %v2319_v24 = vpop.permute.xlu0 %2318 }
 0x3a3   : > { %v2327_v51 = vsel %vm6978_vm2, %v2317_v32, %v2319_v24  ;;  %v2397_v27 = vpop.permute.xlu1 %2396  ;;  %v3201_v25 = vld [vmem:[#allocation2 + $0x178] sm:$0xff]  ;;  %vm6982_vm2 = vcmask 89088  }
 0x3a4   : > { %2343 = vst.msk [vmem:[#allocation2 + $0x1b8] sm:$0xff] %vm299_vm7, %v2327_v51  ;;  %v2408_v50 = vsel %vm6979_vm1, %v6010_v54, %v2397_v27  ;;  %2992 = vrot.lane.b32.xlu0 %v6363_v48, %s6785_s12  ;;  %v3393_v4 = vpack.c.bf16 %v3201_v25, %v3193_v18 }
 0x3a5   : > { %3037 = vrot.lane.b32.xlu1 %v5858_v20, %s6922_s29 }
 0x3a6   : > { %v2357_v35 = vpop.permute.xlu0 %2356  ;;  %3651 = vmatprep.subr.bf16.mxu1 %v3393_v4 }
 0x3a7   : > { %v2367_v28 = vsel %vm6976_vm6, %v2355_v15, %v2357_v35  ;;  %v2368_v59 = vsel %vm6980_vm13, %v2357_v35, %v2359_v47  ;;  %3652 = vmatpush1.bf16.msra.mxu1 %v3392_v17  ;;  %v2401_v26 = vpop.permute.xlu1 %2400  ;;  %vm6983_vm6 = vmmov %vm6979_vm1 }
 0x3a8   : > { %2996 = vrot.lane.b32.xlu0 %v6436_v61, %s6785_s12  ;;  %v3399_v54 = vpack.c.bf16 %v2367_v28, %v2325_v44  ;;  %vm6984_vm13 = vmmov %vm6979_vm1  ;;  %v3400_v10 = vpack.c.bf16 %v2368_v59, %v2326_v40 }
 0x3a9   : > { %3076 = vrot.lane.b32.xlu1 %v6321_v23, %s6923_s10 }
 0x3aa   : > { %v2361_v57 = vpop.permute.xlu0 %2360  ;;  %3610 = vmatprep.subr.bf16.mxu0 %v3399_v54 }
 0x3ab   : > { %v2369_v45 = vsel %vm6981_vm0, %v2359_v47, %v2361_v57  ;;  %v2439_v56 = vpop.permute.xlu1 %2438  ;;  %3611 = vmatpush1.bf16.msra.mxu0 %v3398_v5  ;;  %v3209_v8 = vld [vmem:[#allocation2 + $0x1b8] sm:$0xff]  ;;  %vm6985_vm0 = vmmov %vm6982_vm2 }
 0x3ac   : > { %2385 = vst.msk [vmem:[#allocation2 + $0x1f8] sm:$0xff] %vm299_vm7, %v2369_v45  ;;  %v2450_v58 = vsel %vm6982_vm2, %v6026_v52, %v2439_v56  ;;  %3035 = vrot.lane.b32.xlu0 %v6363_v48, %s6922_s29  ;;  %vm6986_vm2 = vmmov %vm6985_vm0 }
 0x3ad   : > { %3080 = vrot.lane.b32.xlu1 %v5858_v20, %s6923_s10  ;;  %v3406_v62 = vpack.c.bf16 %v2450_v58, %v2408_v50 }
 0x3ae   : > { %v2399_v31 = vpop.permute.xlu0 %2398 }
 0x3af   : > { %v2409_v21 = vsel %vm6979_vm1, %v2397_v27, %v2399_v31  ;;  %v2410_v6 = vsel %vm6983_vm6, %v2399_v31, %v2401_v26  ;;  %v2443_v46 = vpop.permute.xlu1 %2442  ;;  %vm6987_vm1 = vmmov %vm6985_vm0 }
 0x3b0   : > { %3039 = vrot.lane.b32.xlu0 %v6436_v61, %s6922_s29 }
 0x3b1   : > { %3119 = vrot.lane.b32.xlu1 %v6321_v23, %s6924_s20 }
 0x3b2   : > { %v2403_v12 = vpop.permute.xlu0 %2402 }
 0x3b3   : > { %v2411_v52 = vsel %vm6984_vm13, %v2401_v26, %v2403_v12  ;;  %v2481_v30 = vpop.permute.xlu1 %2480  ;;  %v3217_v36 = vld [vmem:[#allocation2 + $0x1f8] sm:$0xff]  ;;  %vm6994_vm13 = vcmask 310272  }
 0x3b4   : > { %2427 = vst.msk [vmem:[#allocation2 + $0x238] sm:$0xff] %vm299_vm7, %v2411_v52  ;;  %v2492_v7 = vsel %vm702_vm11, %v6042_v63, %v2481_v30  ;;  %3078 = vrot.lane.b32.xlu0 %v6363_v48, %s6923_s10  ;;  %v3401_v43 = vpack.c.bf16 %v3217_v36, %v3209_v8 }
 0x3b5   : > { %3123 = vrot.lane.b32.xlu1 %v5858_v20, %s6924_s20 }
 0x3b6   : > { %v2441_v23 = vpop.permute.xlu0 %2440  ;;  %3653 = vmatprep.subr.bf16.mxu1 %v3401_v43 }
 0x3b7   : > { %v2451_v16 = vsel %vm6985_vm0, %v2439_v56, %v2441_v23  ;;  %v2452_v60 = vsel %vm6986_vm2, %v2441_v23, %v2443_v46  ;;  %3654 = vmatpush1.bf16.msra.mxu1 %v3400_v10  ;;  %v2485_v32 = vpop.permute.xlu1 %2484  ;;  %v3263_v56 = vld [vmem:[#allocation2 + $0x368] sm:$0xff]  ;;  %vm6995_vm0 = vcmask 302080   ;;  %vm6996_vm2 = vmmov %vm6994_vm13 }
 0x3b8   : > { %3082 = vrot.lane.b32.xlu0 %v6436_v61, %s6923_s10  ;;  %v3407_v63 = vpack.c.bf16 %v2451_v16, %v2409_v21  ;;  %v3408_v18 = vpack.c.bf16 %v2452_v60, %v2410_v6  ;;  %v3262_v21 = vld [vmem:[#allocation2 + $0x360] sm:$0xff] }
 0x3ba   : > { %v2445_v13 = vpop.permute.xlu0 %2444  ;;  %3612 = vmatprep.subr.bf16.mxu0 %v3407_v63 }
 0x3bb   : > { %v2453_v37 = vsel %vm6987_vm1, %v2443_v46, %v2445_v13  ;;  %v2523_v42 = vpop.permute.xlu1 %2522  ;;  %3613 = vmatpush1.bf16.msra.mxu0 %v3406_v62  ;;  %v3225_v51 = vld [vmem:[#allocation2 + $0x238] sm:$0xff]  ;;  %vm6997_vm1 = vmmov %vm6996_vm2 }
 0x3bc   : > { %2469 = vst.msk [vmem:[#allocation2 + $0x278] sm:$0xff] %vm299_vm7, %v2453_v37  ;;  %v2534_v20 = vsel %vm745_vm12, %v6058_v22, %v2523_v42  ;;  %3121 = vrot.lane.b32.xlu0 %v6363_v48, %s6924_s20  ;;  %v3265_v62 = vld [vmem:[#allocation2 + $0x378] sm:$0xff] }
 0x3bd   : > { %v3414_v35 = vpack.c.bf16 %v2534_v20, %v2492_v7 }
 0x3be   : > { %v2483_v15 = vpop.permute.xlu0 %2482 }
 0x3bf   : > { %v2493_v14 = vsel %vm702_vm11, %v2481_v30, %v2483_v15  ;;  %v2494_v29 = vsel %vm702_vm11, %v2483_v15, %v2485_v32  ;;  %v2527_v44 = vpop.permute.xlu1 %2526 }
 0x3c0   : > { %3125 = vrot.lane.b32.xlu0 %v6436_v61, %s6924_s20 }
 0x3c2   : > { %v2487_v40 = vpop.permute.xlu0 %2486 }
 0x3c3   : > { %v2495_v47 = vsel %vm702_vm11, %v2485_v32, %v2487_v40  ;;  %v2565_v24 = vpop.permute.xlu1 %2564  ;;  %v3233_v27 = vld [vmem:[#allocation2 + $0x278] sm:$0xff]  ;;  %vm6988_vm11 = vcmask 965632  }
 0x3c4   : > { %2511 = vst.msk [vmem:[#allocation2 + $0x2b8] sm:$0xff] %vm299_vm7, %v2495_v47  ;;  %v2576_v22 = vsel %vm788_vm15, %v6076_v0, %v2565_v24  ;;  %v3409_v48 = vpack.c.bf16 %v3233_v27, %v3225_v51 }
 0x3c5   : > { %v3422_v6 = vpack.c.bf16 %v3262_v21, %v2576_v22 }
 0x3c6   : > { %v2525_v25 = vpop.permute.xlu0 %2524  ;;  %3655 = vmatprep.subr.bf16.mxu1 %v3409_v48 }
 0x3c7   : > { %v2535_v50 = vsel %vm745_vm12, %v2523_v42, %v2525_v25  ;;  %v2536_v4 = vsel %vm745_vm12, %v2525_v25, %v2527_v44  ;;  %3656 = vmatpush1.bf16.msra.mxu1 %v3408_v18  ;;  %v2569_v61 = vpop.permute.xlu1 %2568  ;;  %v3264_v42 = vld [vmem:[#allocation2 + $0x370] sm:$0xff] }
 0x3c8   : > { %v3415_v17 = vpack.c.bf16 %v2535_v50, %v2493_v14  ;;  %v3416_v36 = vpack.c.bf16 %v2536_v4, %v2494_v29 }
 0x3ca   : > { %v2529_v28 = vpop.permute.xlu0 %2528  ;;  %3614 = vmatprep.subr.bf16.mxu0 %v3415_v17 }
 0x3cb   : > { %v2537_v59 = vsel %vm745_vm12, %v2527_v44, %v2529_v28  ;;  %v2615_v26 = vpop.permute.xlu1 %2614  ;;  %3615 = vmatpush1.bf16.msra.mxu0 %v3414_v35  ;;  %v3241_v30 = vld [vmem:[#allocation2 + $0x2b8] sm:$0xff]  ;;  %vm6989_vm12 = vcmask 957440  }
 0x3cc   : > { %2553 = vst.msk [vmem:[#allocation2 + $0x2f8] sm:$0xff] %vm299_vm7, %v2537_v59  ;;  %v2625_v0 = vsel %vm864_vm14, %v6232_v1, %v2615_v26 }
 0x3ce   : > { %v2567_v54 = vpop.permute.xlu0 %2566 }
 0x3cf   : > { %v2577_v5 = vsel %vm788_vm15, %v2565_v24, %v2567_v54  ;;  %v2578_v57 = vsel %vm788_vm15, %v2567_v54, %v2569_v61  ;;  %v2655_v45 = vpop.permute.xlu1 %2654 }
 0x3d0   : > { %v2665_v58 = vsel %vm908_vm4, %v6243_v53, %v2655_v45  ;;  %v3423_v31 = vpack.c.bf16 %v3263_v56, %v2577_v5  ;;  %v3424_v15 = vpack.c.bf16 %v3264_v42, %v2578_v57 }
 0x3d1   : > { %v3430_v14 = vpack.c.bf16 %v2665_v58, %v2625_v0 }
 0x3d2   : > { %v2571_v46 = vpop.permute.xlu0 %2570  ;;  %3616 = vmatprep.subr.bf16.mxu0 %v3423_v31 }
 0x3d3   : > { %v2579_v12 = vsel %vm788_vm15, %v2569_v61, %v2571_v46  ;;  %v2619_v52 = vpop.permute.xlu1 %2618  ;;  %v3249_v1 = vld [vmem:[#allocation2 + $0x2f8] sm:$0xff]  ;;  %3617 = vmatpush1.bf16.msra.mxu0 %v3422_v6  ;;  %vm6991_vm15 = vmmov %vm6988_vm11 }
 0x3d4   : > { %2595 = vst.msk [vmem:[#allocation2 + $0x338] sm:$0xff] %vm299_vm7, %v2579_v12  ;;  %2643 = vst.msk [vmem:[#allocation2 + $0x3b8] sm:$0xff] %vm299_vm7, %v2619_v52  ;;  %v3417_v8 = vpack.c.bf16 %v3249_v1, %v3241_v30 }
 0x3d6   : > { %v2617_v7 = vpop.permute.xlu0 %2616  ;;  %3657 = vmatprep.subr.bf16.mxu1 %v3417_v8 }
 0x3d7   : > { %v2626_v53 = vsel %vm864_vm14, %v2615_v26, %v2617_v7  ;;  %v2627_v43 = vsel %vm864_vm14, %v2617_v7, %v2619_v52  ;;  %3658 = vmatpush1.bf16.msra.mxu1 %v3416_v36  ;;  %v2695_v10 = vpop.permute.xlu1 %2694  ;;  %vm6990_vm14 = vmmov %vm6988_vm11 }
 0x3d8   : > { %v2705_v23 = vsel %vm6988_vm11, %v6255_v39, %v2695_v10  ;;  %vm6999_vm11 = vmmov %vm6995_vm0 }
 0x3da   : > { %v2657_v16 = vpop.permute.xlu0 %2656 }
 0x3db   : > { %v2666_v60 = vsel %vm908_vm4, %v2655_v45, %v2657_v16  ;;  %v2735_v32 = vpop.permute.xlu1 %2734  ;;  %v3257_v63 = vld [vmem:[#allocation2 + $0x338] sm:$0xff] }
 0x3dc   : > { %v2745_v13 = vsel %vm6989_vm12, %v6265_v9, %v2735_v32  ;;  %v3425_v37 = vpack.c.bf16 %v3265_v62, %v3257_v63  ;;  %v3431_v20 = vpack.c.bf16 %v2666_v60, %v2626_v53  ;;  %v3273_v22 = vld [vmem:[#allocation2 + $0x3b8] sm:$0xff] }
 0x3dd   : > { %v3438_v17 = vpack.c.bf16 %v2745_v13, %v2705_v23 }
 0x3de   : > { %v2659_v29 = vpop.permute.xlu0 %2658  ;;  %3659 = vmatprep.subr.bf16.mxu1 %v3425_v37  ;;  %3618 = vmatprep.subr.bf16.mxu0 %v3431_v20 }
 0x3df   : > { %v2667_v44 = vsel %vm908_vm4, %v2657_v16, %v2659_v29  ;;  %2683 = vst.msk [vmem:[#allocation2 + $0x3f8] sm:$0xff] %vm299_vm7, %v2659_v29  ;;  %3660 = vmatpush1.bf16.msra.mxu1 %v3424_v15  ;;  %v2699_v39 = vpop.permute.xlu1 %2698  ;;  %3619 = vmatpush1.bf16.msra.mxu0 %v3430_v14  ;;  %vm6992_vm4 = vmmov %vm6989_vm12 }
 0x3e0   : > { %2723 = vst.msk [vmem:[#allocation2 + $0x438] sm:$0xff] %vm299_vm7, %v2699_v39  ;;  %v3432_v4 = vpack.c.bf16 %v2667_v44, %v2627_v43  ;;  %vm6993_vm6 = vmmov %vm6992_vm4 }
 0x3e1   : > { %vm7000_vm12 = vmmov %vm6995_vm0 }
 0x3e2   : > { %v2697_v40 = vpop.permute.xlu0 %2696 }
 0x3e3   : > { %v2706_v9 = vsel %vm6990_vm14, %v2695_v10, %v2697_v40  ;;  %v2707_v47 = vsel %vm6991_vm15, %v2697_v40, %v2699_v39  ;;  %v2776_v24 = vpop.permute.xlu1 %2775  ;;  %vm7001_vm14 = vmmov %vm6995_vm0  ;;  %vm7002_vm15 = vcmask 220160  }
 0x3e4   : > { %v2788_v51 = vsel %vm1040_vm3, %v6276_v55, %v2776_v24 }
 0x3e6   : > { %v2737_v27 = vpop.permute.xlu0 %2736  ;;  %v3281_v48 = vld [vmem:[#allocation2 + $0x3f8] sm:$0xff] }
 0x3e7   : > { %v2746_v18 = vsel %vm6992_vm4, %v2735_v32, %v2737_v27  ;;  %v2780_v25 = vpop.permute.xlu1 %2779  ;;  %v3433_v50 = vpack.c.bf16 %v3281_v48, %v3273_v22  ;;  %v3289_v45 = vld [vmem:[#allocation2 + $0x438] sm:$0xff] }
 0x3e8   : > { %v3439_v61 = vpack.c.bf16 %v2746_v18, %v2706_v9 }
 0x3e9   : > { %3661 = vmatprep.subr.bf16.mxu1 %v3433_v50 }
 0x3ea   : > { %v2739_v35 = vpop.permute.xlu0 %2738  ;;  %3662 = vmatpush1.bf16.msra.mxu1 %v3432_v4  ;;  %3620 = vmatprep.subr.bf16.mxu0 %v3439_v61 }
 0x3eb   : > { %v2747_v28 = vsel %vm6993_vm6, %v2737_v27, %v2739_v35  ;;  %2763 = vst.msk [vmem:[#allocation2 + $0x478] sm:$0xff] %vm299_vm7, %v2739_v35  ;;  %v2819_v59 = vpop.permute.xlu1 %2818  ;;  %3621 = vmatpush1.bf16.msra.mxu0 %v3438_v17  ;;  %vm7006_vm6 = vcmask 146432  }
 0x3ec   : > { %v2831_v55 = vsel %vm6994_vm13, %v6293_v34, %v2819_v59  ;;  %v3440_v46 = vpack.c.bf16 %v2747_v28, %v2707_v47  ;;  %vm7007_vm13 = vmmov %vm7006_vm6 }
 0x3ed   : > { %v3446_v8 = vpack.c.bf16 %v2831_v55, %v2788_v51 }
 0x3ee   : > { %v2778_v26 = vpop.permute.xlu0 %2777 }
 0x3ef   : > { %v2789_v0 = vsel %vm1040_vm3, %v2776_v24, %v2778_v26  ;;  %v2790_v54 = vsel %vm1040_vm3, %v2778_v26, %v2780_v25  ;;  %v2823_v5 = vpop.permute.xlu1 %2822 }
 0x3f2   : > { %v2782_v57 = vpop.permute.xlu0 %2781  ;;  %v3297_v56 = vld [vmem:[#allocation2 + $0x478] sm:$0xff] }
 0x3f3   : > { %v2791_v58 = vsel %vm1040_vm3, %v2780_v25, %v2782_v57  ;;  %v2862_v31 = vpop.permute.xlu1 %2861  ;;  %v3441_v21 = vpack.c.bf16 %v3297_v56, %v3289_v45  ;;  %vm6998_vm3 = vmmov %vm6997_vm1 }
 0x3f4   : > { %2807 = vst.msk [vmem:[#allocation2 + $0x4b8] sm:$0xff] %vm299_vm7, %v2791_v58  ;;  %v2874_v6 = vsel %vm6995_vm0, %v6310_v19, %v2862_v31  ;;  %vm7008_vm0 = vmmov %vm7006_vm6 }
 0x3f5   : > { %3663 = vmatprep.subr.bf16.mxu1 %v3441_v21 }
 0x3f6   : > { %v2821_v34 = vpop.permute.xlu0 %2820  ;;  %3664 = vmatpush1.bf16.msra.mxu1 %v3440_v46 }
 0x3f7   : > { %v2832_v12 = vsel %vm6996_vm2, %v2819_v59, %v2821_v34  ;;  %v2833_v52 = vsel %vm6997_vm1, %v2821_v34, %v2823_v5  ;;  %v2866_v30 = vpop.permute.xlu1 %2865  ;;  %vm7010_vm2 = vcmask 1043456  }
 0x3f8   : > { %v3447_v1 = vpack.c.bf16 %v2832_v12, %v2789_v0  ;;  %v3448_v20 = vpack.c.bf16 %v2833_v52, %v2790_v54  ;;  %vm7011_vm1 = vmmov %vm7010_vm2 }
 0x3fa   : > { %v2825_v36 = vpop.permute.xlu0 %2824  ;;  %3622 = vmatprep.subr.bf16.mxu0 %v3447_v1 }
 0x3fb   : > { %v2834_v7 = vsel %vm6998_vm3, %v2823_v5, %v2825_v36  ;;  %v2905_v53 = vpop.permute.xlu1 %2904  ;;  %3623 = vmatpush1.bf16.msra.mxu0 %v3446_v8  ;;  %v3305_v62 = vld [vmem:[#allocation2 + $0x4b8] sm:$0xff]  ;;  %vm7012_vm3 = vmmov %vm7011_vm1 }
 0x3fc   : > { %2850 = vst.msk [vmem:[#allocation2 + $0x4f8] sm:$0xff] %vm299_vm7, %v2834_v7  ;;  %v2917_v19 = vsel %vm1172_vm5, %v6317_v11, %v2905_v53 }
 0x3fd   : > { %v3454_v39 = vpack.c.bf16 %v2917_v19, %v2874_v6 }
 0x3fe   : > { %v2864_v43 = vpop.permute.xlu0 %2863 }
 0x3ff   : > { %v2875_v10 = vsel %vm6999_vm11, %v2862_v31, %v2864_v43  ;;  %v2876_v23 = vsel %vm7000_vm12, %v2864_v43, %v2866_v30  ;;  %v2909_v16 = vpop.permute.xlu1 %2908  ;;  %vm7013_vm11 = vmmov %vm7011_vm1 }
 0x402   : > { %v2868_v60 = vpop.permute.xlu0 %2867 }
 0x403   : > { %v2877_v32 = vsel %vm7001_vm14, %v2866_v30, %v2868_v60  ;;  %v2948_v63 = vpop.permute.xlu1 %2947  ;;  %v3313_v13 = vld [vmem:[#allocation2 + $0x4f8] sm:$0xff] }
 0x404   : > { %2893 = vst.msk [vmem:[#allocation2 + $0x538] sm:$0xff] %vm299_vm7, %v2877_v32  ;;  %v2960_v37 = vsel %vm1216_vm8, %v6333_v38, %v2948_v63  ;;  %v3449_v42 = vpack.c.bf16 %v3313_v13, %v3305_v62 }
 0x406   : > { %v2907_v11 = vpop.permute.xlu0 %2906  ;;  %3665 = vmatprep.subr.bf16.mxu1 %v3449_v42 }
 0x407   : > { %v2918_v15 = vsel %vm1172_vm5, %v2905_v53, %v2907_v11  ;;  %v2919_v14 = vsel %vm1172_vm5, %v2907_v11, %v2909_v16  ;;  %3666 = vmatpush1.bf16.msra.mxu1 %v3448_v20  ;;  %v2952_v29 = vpop.permute.xlu1 %2951 }
 0x408   : > { %v3455_v44 = vpack.c.bf16 %v2918_v15, %v2875_v10  ;;  %v3456_v35 = vpack.c.bf16 %v2919_v14, %v2876_v23 }
 0x40a   : > { %v2911_v40 = vpop.permute.xlu0 %2910  ;;  %3624 = vmatprep.subr.bf16.mxu0 %v3455_v44 }
 0x40b   : > { %v2920_v9 = vsel %vm1172_vm5, %v2909_v16, %v2911_v40  ;;  %v2991_v47 = vpop.permute.xlu1 %2990  ;;  %3625 = vmatpush1.bf16.msra.mxu0 %v3454_v39  ;;  %v3321_v50 = vld [vmem:[#allocation2 + $0x538] sm:$0xff]  ;;  %vm7003_vm5 = vmmov %vm7002_vm15 }
 0x40c   : > { %2936 = vst.msk [vmem:[#allocation2 + $0x578] sm:$0xff] %vm299_vm7, %v2920_v9  ;;  %v3003_v38 = vsel %vm7002_vm15, %v6348_v3, %v2991_v47  ;;  %vm7004_vm4 = vmmov %vm7003_vm5 }
 0x40d   : > { %v3462_v0 = vpack.c.bf16 %v3003_v38, %v2960_v37 }
 0x40e   : > { %v2950_v24 = vpop.permute.xlu0 %2949 }
 0x40f   : > { %v2961_v51 = vsel %vm1216_vm8, %v2948_v63, %v2950_v24  ;;  %v2962_v27 = vsel %vm1216_vm8, %v2950_v24, %v2952_v29  ;;  %v2995_v22 = vpop.permute.xlu1 %2994 }
 0x412   : > { %v2954_v48 = vpop.permute.xlu0 %2953 }
 0x413   : > { %v2963_v18 = vsel %vm1216_vm8, %v2952_v29, %v2954_v48  ;;  %v3034_v25 = vpop.permute.xlu1 %3033  ;;  %v3329_v4 = vld [vmem:[#allocation2 + $0x578] sm:$0xff]  ;;  %vm7005_vm8 = vmmov %vm7004_vm4 }
 0x414   : > { %2979 = vst.msk [vmem:[#allocation2 + $0x5b8] sm:$0xff] %vm299_vm7, %v2963_v18  ;;  %v3046_v61 = vsel %vm1304_vm10, %v6369_v41, %v3034_v25  ;;  %v3457_v17 = vpack.c.bf16 %v3329_v4, %v3321_v50 }
 0x416   : > { %v2993_v3 = vpop.permute.xlu0 %2992  ;;  %3667 = vmatprep.subr.bf16.mxu1 %v3457_v17 }
 0x417   : > { %v3004_v28 = vsel %vm7003_vm5, %v2991_v47, %v2993_v3  ;;  %v3005_v59 = vsel %vm7004_vm4, %v2993_v3, %v2995_v22  ;;  %3668 = vmatpush1.bf16.msra.mxu1 %v3456_v35  ;;  %v3038_v55 = vpop.permute.xlu1 %3037 }
 0x418   : > { %v3463_v26 = vpack.c.bf16 %v3004_v28, %v2961_v51  ;;  %v3464_v1 = vpack.c.bf16 %v3005_v59, %v2962_v27 }
 0x41a   : > { %v2997_v54 = vpop.permute.xlu0 %2996  ;;  %3626 = vmatprep.subr.bf16.mxu0 %v3463_v26 }
 0x41b   : > { %v3006_v5 = vsel %vm7005_vm8, %v2995_v22, %v2997_v54  ;;  %v3077_v57 = vpop.permute.xlu1 %3076  ;;  %3627 = vmatpush1.bf16.msra.mxu0 %v3462_v0  ;;  %v3337_v34 = vld [vmem:[#allocation2 + $0x5b8] sm:$0xff] }
 0x41c   : > { %3022 = vst.msk [vmem:[#allocation2 + $0x5f8] sm:$0xff] %vm299_vm7, %v3006_v5  ;;  %v3089_v41 = vsel %vm7006_vm6, %v6384_v49, %v3077_v57 }
 0x41d   : > { %v3470_v53 = vpack.c.bf16 %v3089_v41, %v3046_v61 }
 0x41e   : > { %v3036_v45 = vpop.permute.xlu0 %3035 }
 0x41f   : > { %v3047_v56 = vsel %vm1304_vm10, %v3034_v25, %v3036_v45  ;;  %v3048_v58 = vsel %vm1304_vm10, %v3036_v45, %v3038_v55  ;;  %v3081_v31 = vpop.permute.xlu1 %3080 }
 0x422   : > { %v3040_v21 = vpop.permute.xlu0 %3039 }
 0x423   : > { %v3049_v6 = vsel %vm1304_vm10, %v3038_v55, %v3040_v21  ;;  %v3120_v46 = vpop.permute.xlu1 %3119  ;;  %v3345_v12 = vld [vmem:[#allocation2 + $0x5f8] sm:$0xff]  ;;  %vm7009_vm10 = vmmov %vm7008_vm0 }
 0x424   : > { %3065 = vst.msk [vmem:[#allocation2 + $0x638] sm:$0xff] %vm299_vm7, %v3049_v6  ;;  %v3132_v52 = vsel %vm1392_vm9, %v6393_v2, %v3120_v46  ;;  %v3465_v30 = vpack.c.bf16 %v3345_v12, %v3337_v34 }
 0x425   : > { %v3478_v23 = vpack.c.bf16 %v3132_v52, %v3132_v52 }
 0x426   : > { %v3079_v49 = vpop.permute.xlu0 %3078  ;;  %3669 = vmatprep.subr.bf16.mxu1 %v3465_v30 }
 0x427   : > { %v3090_v8 = vsel %vm7007_vm13, %v3077_v57, %v3079_v49  ;;  %v3091_v36 = vsel %vm7008_vm0, %v3079_v49, %v3081_v31  ;;  %3670 = vmatpush1.bf16.msra.mxu1 %v3464_v1  ;;  %v3124_v10 = vpop.permute.xlu1 %3123  ;;  %v3507_v62 = vsel %vm7011_vm1, %v3478_v23, 0 }
 0x428   : > { %v3471_v7 = vpack.c.bf16 %v3090_v8, %v3047_v56  ;;  %v3472_v11 = vpack.c.bf16 %v3091_v36, %v3048_v58 }
 0x42a   : > { %v3083_v19 = vpop.permute.xlu0 %3082  ;;  %3628 = vmatprep.subr.bf16.mxu0 %v3471_v7 }
 0x42b   : > { %v3092_v43 = vsel %vm7009_vm10, %v3081_v31, %v3083_v19  ;;  %3629 = vmatpush1.bf16.msra.mxu0 %v3470_v53  ;;  %v3353_v37 = vld [vmem:[#allocation2 + $0x638] sm:$0xff] }
 0x42c   : > { %3108 = vst.msk [vmem:[#allocation2 + $0x678] sm:$0xff] %vm299_vm7, %v3092_v43 }
 0x42e   : > { %v3122_v2 = vpop.permute.xlu0 %3121 }
 0x42f   : > { %v3133_v16 = vsel %vm1392_vm9, %v3120_v46, %v3122_v2  ;;  %v3134_v60 = vsel %vm1392_vm9, %v3122_v2, %v3124_v10 }
 0x430   : > { %v3479_v32 = vpack.c.bf16 %v3133_v16, %v3133_v16  ;;  %v3480_v15 = vpack.c.bf16 %v3134_v60, %v3134_v60 }
 0x432   : > { %v3126_v63 = vpop.permute.xlu0 %3125  ;;  %3892 = vmatprep.subr.msk.bf16.mxu0 %vm7010_vm2, %v3479_v32  ;;  %v3513_v44 = vsel %vm7013_vm11, %v3480_v15, 0 }
 0x433   : > { %v3135_v13 = vsel %vm1392_vm9, %v3124_v10, %v3126_v63  ;;  %v3361_v42 = vld [vmem:[#allocation2 + $0x678] sm:$0xff]  ;;  %3631 = vmatpush1.bf16.msra.mxu0 %v3507_v62 }
 0x434   : > { %3151 = vst.msk [vmem:[#allocation2 + $0x6b8] sm:$0xff] %vm299_vm7, %v3135_v13  ;;  %v3473_v20 = vpack.c.bf16 %v3361_v42, %v3353_v37 }
 0x436   : > { %3671 = vmatprep.subr.bf16.mxu1 %v3473_v20  ;;  %3637 = vmatmul.mubr.bf16.vlgmr.msra.gmra.mrb[12].mxu0 %v6417_v33 }
 0x437   : > { %3672 = vmatpush1.bf16.msra.mxu1 %v3472_v11 }
 0x43b   : > { %v3369_v14 = vld [vmem:[#allocation2 + $0x6b8] sm:$0xff] }
 0x43c   : > { %v3481_v29 = vpack.c.bf16 %v3369_v14, %v3369_v14 }
 0x43e   : > { %3894 = vmatprep.subr.msk.bf16.mxu1 %vm7012_vm3, %v3481_v29 }
 0x43f   : > { %3674 = vmatpush1.bf16.msra.mxu1 %v3513_v44 }
 0x442   : > { %3680 = vmatmul.mubr.bf16.vlgmr.msra.gmra.mrb[12].mxu1 %v6417_v33 }
 0x451   : > { %v3552_v39 = vpop.f32.mrb[8].mxu0 }
 0x452   : > { %vm3690_vm9 = vcmp.ge.f32.partialorder %v3552_v39, 0.0  ;;  %v3698_v40 = vmul.f32 0.01, %v3552_v39  ;;  %v3554_v9 = vpop.f32.mrb[9].mxu0 }
 0x453   : > { %vm3691_vm12 = vcmp.ge.f32.partialorder %v3554_v9, 0.0  ;;  %v3699_v47 = vmul.f32 0.01, %v3554_v9  ;;  %v3556_v38 = vpop.f32.mrb[10].mxu0 }
 0x454   : > { %v3706_v24 = vsel %vm3690_vm9, %v3552_v39, %v3698_v40  ;;  %v3722_v51 = vsub.f32 0.0, %v3556_v38  ;;  %v3558_v27 = vpop.f32.mrb[11].mxu0 }
 0x455   : > { %3714 = vst [vmem:[%s6656_s13] sm:$0xff] %v3706_v24  ;;  %v3595_v33 = vpop.f32.mrb[8].mxu1  ;;  %v3707_v22 = vsel %vm3691_vm12, %v3554_v9, %v3699_v47  ;;  %v3723_v48 = vsub.f32 0.0, %v3558_v27 }
 0x456   : > { %vm3692_vm14 = vcmp.ge.f32.partialorder %v3595_v33, 0.0  ;;  %v3700_v18 = vmul.f32 0.01, %v3595_v33  ;;  %3715 = vst [vmem:[%s6656_s13 + $0x8] sm:$0xff] %v3707_v22  ;;  %v3597_v25 = vpop.f32.mrb[9].mxu1 }
 0x457   : > { %v3730_v50 = vmul.f32 1.442695, %v3722_v51  ;;  %vm3693_vm15 = vcmp.ge.f32.partialorder %v3597_v25, 0.0  ;;  %v3701_v4 = vmul.f32 0.01, %v3597_v25  ;;  %v3599_v61 = vpop.f32.mrb[10].mxu1 }
 0x458   : > { %v3732_v17 = vmul.f32 1.442695, %v3723_v48  ;;  %v3708_v35 = vsel %vm3692_vm14, %v3595_v33, %v3700_v18  ;;  %v3724_v3 = vsub.f32 0.0, %v3599_v61  ;;  %v3601_v28 = vpop.f32.mrb[11].mxu1 }
 0x459   : > { %4205 = vpow2.f32 %v3730_v50  ;;  %3716 = vst [vmem:[%s6656_s13 + $0x10] sm:$0xff] %v3708_v35  ;;  %v3709_v59 = vsel %vm3693_vm15, %v3597_v25, %v3701_v4  ;;  %v3725_v55 = vsub.f32 0.0, %v3601_v28 }
 0x45a   : > { %4207 = vpow2.f32 %v3732_v17  ;;  %3717 = vst [vmem:[%s6656_s13 + $0x18] sm:$0xff] %v3709_v59  ;;  %v3734_v26 = vmul.f32 1.442695, %v3724_v3 }
 0x45b   : > { %v3736_v0 = vmul.f32 1.442695, %v3725_v55 }
 0x45c   : > { %4209 = vpow2.f32 %v3734_v26 }
 0x45d   : > { %4211 = vpow2.f32 %v3736_v0 }
 0x463   : > { %v4206_v54 = vpop.eup %4205 }
 0x464   : > { %v4208_v5 = vpop.eup %4207  ;;  %v3746_v57 = vadd.f32 1.0, %v4206_v54 }
 0x465   : > { %v3747_v41 = vadd.f32 1.0, %v4208_v5 }
 0x466   : > { %4213 = vrcp.f32 %v3746_v57  ;;  %v4210_v45 = vpop.eup %4209 }
 0x467   : > { %4215 = vrcp.f32 %v3747_v41  ;;  %v4212_v56 = vpop.eup %4211  ;;  %v3748_v58 = vadd.f32 1.0, %v4210_v45 }
 0x468   : > { %v3749_v31 = vadd.f32 1.0, %v4212_v56 }
 0x469   : > { %4217 = vrcp.f32 %v3748_v58 }
 0x46a   : > { %4219 = vrcp.f32 %v3749_v31 }
 0x470   : > { %v4214_v21 = vpop.eup %4213 }
 0x471   : > { %v4216_v6 = vpop.eup %4215  ;;  %3770 = vst [vmem:[%s6667_s16] sm:$0xff] %v4214_v21 }
 0x472   : > { %3771 = vst [vmem:[%s6667_s16 + $0x8] sm:$0xff] %v4216_v6 }
 0x473   : > { %v4218_v46 = vpop.eup %4217 }
 0x474   : > { %v4220_v34 = vpop.eup %4219  ;;  %3772 = vst [vmem:[%s6667_s16 + $0x10] sm:$0xff] %v4218_v46 }
 0x475   : > { %3773 = vst [vmem:[%s6667_s16 + $0x18] sm:$0xff] %v4220_v34 }
 0x509   : > { %v3638_v12 = vpop.f32.mrb[12].mxu0 }
 0x50a   : > { %vm3694_vm5 = vcmp.ge.f32.partialorder %v3638_v12, 0.0  ;;  %v3702_v52 = vmul.f32 0.01, %v3638_v12  ;;  %v3640_v30 = vpop.f32.mrb[13].mxu0 }
 0x50b   : > { %vm3695_vm4 = vcmp.ge.f32.partialorder %v3640_v30, 0.0  ;;  %v3703_v1 = vmul.f32 0.01, %v3640_v30  ;;  %v3642_v49 = vpop.f32.mrb[14].mxu0 }
 0x50c   : > { %v3710_v8 = vsel %vm3694_vm5, %v3638_v12, %v3702_v52  ;;  %v3726_v36 = vsub.f32 0.0, %v3642_v49  ;;  %v3644_v7 = vpop.f32.mrb[15].mxu0 }
 0x50d   : > { %3718 = vst [vmem:[%s6656_s13 + $0x20] sm:$0xff] %v3710_v8  ;;  %v3711_v53 = vsel %vm3695_vm4, %v3640_v30, %v3703_v1  ;;  %v3727_v19 = vsub.f32 0.0, %v3644_v7 }
 0x50e   : > { %3719 = vst [vmem:[%s6656_s13 + $0x28] sm:$0xff] %v3711_v53  ;;  %v3738_v43 = vmul.f32 1.442695, %v3726_v36 }
 0x50f   : > { %v3740_v10 = vmul.f32 1.442695, %v3727_v19 }
 0x510   : > { %4221 = vpow2.f32 %v3738_v43 }
 0x511   : > { %4223 = vpow2.f32 %v3740_v10 }
 0x515   : > { %v3681_v2 = vpop.f32.mrb[12].mxu1 }
 0x516   : > { %vm3696_vm8 = vcmp.ge.f32.partialorder %v3681_v2, 0.0  ;;  %v3704_v23 = vmul.f32 0.01, %v3681_v2  ;;  %v3683_v16 = vpop.f32.mrb[13].mxu1 }
 0x517   : > { %vm3697_vm6 = vcmp.ge.f32.partialorder %v3683_v16, 0.0  ;;  %v3705_v60 = vmul.f32 0.01, %v3683_v16  ;;  %v3685_v32 = vpop.f32.mrb[14].mxu1 }
 0x518   : > { %v3712_v63 = vsel %vm3696_vm8, %v3681_v2, %v3704_v23  ;;  %v3728_v62 = vsub.f32 0.0, %v3685_v32  ;;  %v3687_v13 = vpop.f32.mrb[15].mxu1 }
 0x519   : > { %3720 = vst [vmem:[%s6656_s13 + $0x30] sm:$0xff] %v3712_v63  ;;  %v3713_v37 = vsel %vm3697_vm6, %v3683_v16, %v3705_v60  ;;  %v3729_v42 = vsub.f32 0.0, %v3687_v13 }
 0x51a   : > { %v4222_v20 = vpop.eup %4221  ;;  %3721 = vst.msk [vmem:[%s6656_s13 + $0x38] sm:$0xff] %vm299_vm7, %v3713_v37  ;;  %v3742_v11 = vmul.f32 1.442695, %v3728_v62 }
 0x51b   : > { %v4224_v15 = vpop.eup %4223  ;;  %v3750_v14 = vadd.f32 1.0, %v4222_v20  ;;  %v3744_v29 = vmul.f32 1.442695, %v3729_v42 }
 0x51c   : > { %v3751_v44 = vadd.f32 1.0, %v4224_v15  ;;  %4225 = vpow2.f32 %v3742_v11 }
 0x51d   : > { %4227 = vrcp.f32 %v3750_v14 }
 0x51e   : > { %4229 = vrcp.f32 %v3751_v44 }
 0x51f   : > { %4231 = vpow2.f32 %v3744_v29 }
 0x526   : > { %v4226_v39 = vpop.eup %4225 }
 0x527   : > { %v4228_v40 = vpop.eup %4227  ;;  %v3752_v9 = vadd.f32 1.0, %v4226_v39 }
 0x528   : > { %v4230_v47 = vpop.eup %4229  ;;  %3774 = vst [vmem:[%s6667_s16 + $0x20] sm:$0xff] %v4228_v40 }
 0x529   : > { %v4232_v38 = vpop.eup %4231  ;;  %3775 = vst [vmem:[%s6667_s16 + $0x28] sm:$0xff] %v4230_v47  ;;  %4233 = vrcp.f32 %v3752_v9 }
 0x52a   : > { %v3753_v24 = vadd.f32 1.0, %v4232_v38 }
 0x52c   : > { %4235 = vrcp.f32 %v3753_v24 }
 0x533   : > { %v4234_v51 = vpop.eup %4233 }
 0x534   : > { %3776 = vst [vmem:[%s6667_s16 + $0x30] sm:$0xff] %v4234_v51 }
 0x536   : > { %v4236_v27 = vpop.eup %4235 }
 0x537   : > { %3777 = vst.msk [vmem:[%s6667_s16 + $0x38] sm:$0xff] %vm299_vm7, %v4236_v27 }
 0x538 PF: > { %s16_s18 = sadd.s32 1, %s4297_s18  }
 0x539   : > { %p13_p4 = scmp.ge.s32.totalorder %s16_s18, 4  }
 0x53b   :  { %15 = sbr.rel (!%p13_p4) target bundleno = 1 (0x1), region = 78 }

</bundles_post_ra>
